<compile_context>
chip_gen: v6e
topology: v6e:2x2x1
jax: 0.10.0
libtpu: 0.0.40
codegen_flags: <defaults>
</compile_context>

<pallas_src>
import math

import jax
import jax.numpy as jnp
from jax import lax
from jax.experimental import pallas as pl
from jax.experimental.pallas import tpu as pltpu

LANE = 128     # f32 lane width
SUBLANE = 8    # f32 sublane width


def _round_up(x, m):
    return ((x + m - 1) // m) * m


# ---------------------------------------------------------------------------
# Kernel 1: batched input projection  gates_pre = emb @ W_ih + (b_ih + b_hh)
# for both the encoder and the decoder LSTM (two big MXU matmuls per chunk).
# ---------------------------------------------------------------------------
def _input_proj_kernel(emb_ref, wih_e_ref, b_e_ref, wih_d_ref, b_d_ref,
                       ge_ref, gd_ref):
    tc, bp, ep = emb_ref.shape
    x = emb_ref[...].reshape(tc * bp, ep)
    ge = jnp.dot(x, wih_e_ref[...], preferred_element_type=jnp.float32) + b_e_ref[...]
    gd = jnp.dot(x, wih_d_ref[...], preferred_element_type=jnp.float32) + b_d_ref[...]
    ge_ref[...] = ge.reshape(tc, bp, -1)
    gd_ref[...] = gd.reshape(tc, bp, -1)


# ---------------------------------------------------------------------------
# Kernels 2/3: LSTM recurrence.  Gate layout is [i, f, o, g] so a single
# sigmoid covers the first 3H lanes and a single tanh the last H lanes.
# ---------------------------------------------------------------------------
def _lstm_chunk(g_ref, whh, h, c, hs_ref=None):
    hp = whh.shape[0]
    tc = g_ref.shape[0]
    for t in range(tc):                       # fully unrolled, tc <= 8
        gates = g_ref[t] + jnp.dot(h, whh, preferred_element_type=jnp.float32)
        sg = jax.nn.sigmoid(gates[:, : 3 * hp])     # [i | f | o]
        gg = jnp.tanh(gates[:, 3 * hp:])            # g
        c = sg[:, hp:2 * hp] * c + sg[:, :hp] * gg  # f*c + i*g
        h = sg[:, 2 * hp:] * jnp.tanh(c)            # o*tanh(c)
        if hs_ref is not None:
            hs_ref[t] = h
    return h, c


def _lstm_final_state_kernel(g_ref, h0_ref, c0_ref, whh_ref, h_ref, c_ref):
    # encoder: only the final (h, c) is needed
    @pl.when(pl.program_id(1) == 0)
    def _():
        h_ref[...] = h0_ref[...]
        c_ref[...] = c0_ref[...]
    h, c = _lstm_chunk(g_ref, whh_ref[...], h_ref[...], c_ref[...])
    h_ref[...] = h
    c_ref[...] = c


def _lstm_recurrence_kernel(g_ref, h0_ref, c0_ref, whh_ref, hs_ref, h_ref, c_ref):
    # decoder: emits every hidden state (projected to vocab by kernel 4)
    @pl.when(pl.program_id(1) == 0)
    def _():
        h_ref[...] = h0_ref[...]
        c_ref[...] = c0_ref[...]
    h, c = _lstm_chunk(g_ref, whh_ref[...], h_ref[...], c_ref[...], hs_ref)
    h_ref[...] = h
    c_ref[...] = c


# ---------------------------------------------------------------------------
# Kernel 4: batched vocab projection, tiled over (T-chunk, V-tile), writing the
# logits directly in batch-first (B, T, V) layout.
# ---------------------------------------------------------------------------
def _output_proj_kernel(hs_ref, wout_ref, bout_ref, out_ref):
    tc, bp, hp = hs_ref.shape
    x = hs_ref[...].reshape(tc * bp, hp)
    r = jnp.dot(x, wout_ref[...], preferred_element_type=jnp.float32) + bout_ref[...]
    r = r.reshape(tc, bp, -1)
    for t in range(tc):                       # static, unrolled
        out_ref[:, t, :] = r[t]


# ---------------------------------------------------------------------------
# pallas_call wrappers
# ---------------------------------------------------------------------------
def _input_proj(emb_tm, wih_e, b_e, wih_d, b_d, tc):
    T, Bp, Ep = emb_tm.shape
    G4 = wih_e.shape[1]
    out_sd = jax.ShapeDtypeStruct((T, Bp, G4), jnp.float32)
    return pl.pallas_call(
        _input_proj_kernel,
        out_shape=(out_sd, out_sd),
        grid=(T // tc,),
        in_specs=[
            pl.BlockSpec((tc, Bp, Ep), lambda t: (t, 0, 0)),
            pl.BlockSpec((Ep, G4), lambda t: (0, 0)),
            pl.BlockSpec((1, G4), lambda t: (0, 0)),
            pl.BlockSpec((Ep, G4), lambda t: (0, 0)),
            pl.BlockSpec((1, G4), lambda t: (0, 0)),
        ],
        out_specs=(
            pl.BlockSpec((tc, Bp, G4), lambda t: (t, 0, 0)),
            pl.BlockSpec((tc, Bp, G4), lambda t: (t, 0, 0)),
        ),
        compiler_params=pltpu.CompilerParams(dimension_semantics=("parallel",)),
    )(emb_tm, wih_e, b_e, wih_d, b_d)


def _run_lstm(gates, h0, c0, whh, bc, tc, collect_hs):
    T, Bp, G4 = gates.shape
    Hp = whh.shape[0]
    grid = (Bp // bc, T // tc)
    in_specs = [
        pl.BlockSpec((tc, bc, G4), lambda b, t: (t, b, 0)),
        pl.BlockSpec((bc, Hp), lambda b, t: (b, 0)),
        pl.BlockSpec((bc, Hp), lambda b, t: (b, 0)),
        pl.BlockSpec((Hp, G4), lambda b, t: (0, 0)),
    ]
    state_spec = pl.BlockSpec((bc, Hp), lambda b, t: (b, 0))
    state_sd = jax.ShapeDtypeStruct((Bp, Hp), jnp.float32)
    cp = pltpu.CompilerParams(dimension_semantics=("parallel", "arbitrary"))
    if collect_hs:
        hs, h, c = pl.pallas_call(
            _lstm_recurrence_kernel,
            out_shape=(jax.ShapeDtypeStruct((T, Bp, Hp), jnp.float32),
                       state_sd, state_sd),
            grid=grid,
            in_specs=in_specs,
            out_specs=(pl.BlockSpec((tc, bc, Hp), lambda b, t: (t, b, 0)),
                       state_spec, state_spec),
            compiler_params=cp,
        )(gates, h0, c0, whh)
        return hs, h, c
    h, c = pl.pallas_call(
        _lstm_final_state_kernel,
        out_shape=(state_sd, state_sd),
        grid=grid,
        in_specs=in_specs,
        out_specs=(state_spec, state_spec),
        compiler_params=cp,
    )(gates, h0, c0, whh)
    return None, h, c


def _run_output_proj(hs, wout, bout, tc, vt):
    T, Bp, Hp = hs.shape
    Vp = wout.shape[1]
    return pl.pallas_call(
        _output_proj_kernel,
        out_shape=jax.ShapeDtypeStruct((Bp, T, Vp), jnp.float32),
        grid=(T // tc, Vp // vt),
        in_specs=[
            pl.BlockSpec((tc, Bp, Hp), lambda t, v: (t, 0, 0)),
            pl.BlockSpec((Hp, vt), lambda t, v: (0, v)),
            pl.BlockSpec((1, vt), lambda t, v: (0, v)),
        ],
        out_specs=pl.BlockSpec((Bp, tc, vt), lambda t, v: (0, t, v)),
        compiler_params=pltpu.CompilerParams(
            dimension_semantics=("parallel", "parallel")),
    )(hs, wout, bout)


# ---------------------------------------------------------------------------
# Parameter packing (PyTorch layout -> kernel layout: transposed for x @ W,
# gate order [i,f,o,g], biases folded, zero-padded to lane/sublane alignment).
# ---------------------------------------------------------------------------
def _pack_lstm(w_ih, w_hh, b_ih, b_hh, E, H, Ep, Hp):
    order = (0, 1, 3, 2)                                  # i, f, o, g

    def gate(w, k):
        return w[k * H:(k + 1) * H]

    wih = jnp.concatenate(
        [jnp.pad(gate(w_ih, k).T, ((0, Ep - E), (0, Hp - H))) for k in order], axis=1)
    whh = jnp.concatenate(
        [jnp.pad(gate(w_hh, k).T, ((0, Hp - H), (0, Hp - H))) for k in order], axis=1)
    b = b_ih + b_hh
    bias = jnp.concatenate(
        [jnp.pad(b[k * H:(k + 1) * H], (0, Hp - H)) for k in order])[None, :]
    return wih, whh, bias


def encoder_decoder_forward(sequence, params, state=None):
    """sequence: (B, T) int32 token ids.  Returns (logits (B, T, V), (h, c))
    with h, c of shape (1, B, H) matching PyTorch's nn.LSTM convention."""
    B, T = sequence.shape
    V, E = params["embedding"].shape
    H = params["w_hh_en"].shape[1]

    Bp = _round_up(max(B, SUBLANE), SUBLANE)
    Ep = _round_up(E, LANE)
    Hp = _round_up(H, LANE)
    Vp = _round_up(V, LANE)

    tc = math.gcd(T, SUBLANE)          # time chunk (divides T, <= 8)
    bc = SUBLANE                       # batch chunk -> "parallel" megacore axis
    vt = LANE
    for cand in (512, 256, 128):       # lane-dense V tile
        if Vp % cand == 0:
            vt = cand
            break

    # ---- pack / pad parameters ----
    emb_tab = jnp.pad(params["embedding"], ((0, 0), (0, Ep - E)))
    wih_e, whh_e, b_e = _pack_lstm(params["w_ih_en"], params["w_hh_en"],
                                   params["b_ih_en"], params["b_hh_en"], E, H, Ep, Hp)
    wih_d, whh_d, b_d = _pack_lstm(params["w_ih_de"], params["w_hh_de"],
                                   params["b_ih_de"], params["b_hh_de"], E, H, Ep, Hp)
    wout = jnp.pad(params["w_out"].T, ((0, Hp - H), (0, Vp - V)))
    bout = jnp.pad(params["b_out"], (0, Vp - V))[None, :]

    # ---- embedding gather (glue), directly time-major, batch padded ----
    seq_p = jnp.pad(sequence, ((0, Bp - B), (0, 0)))
    emb_tm = jnp.take(emb_tab, seq_p.T, axis=0)           # (T, Bp, Ep)

    # ---- initial state (PyTorch: zeros when state is None) ----
    if state is None:
        h0 = jnp.zeros((Bp, Hp), jnp.float32)
        c0 = jnp.zeros((Bp, Hp), jnp.float32)
    else:
        h0 = jnp.pad(state[0][0], ((0, Bp - B), (0, Hp - H)))
        c0 = jnp.pad(state[1][0], ((0, Bp - B), (0, Hp - H)))

    # ---- pipeline ----
    gates_en, gates_de = _input_proj(emb_tm, wih_e, b_e, wih_d, b_d, tc)
    _, h_enc, c_enc = _run_lstm(gates_en, h0, c0, whh_e, bc, tc, collect_hs=False)
    hs, h_fin, c_fin = _run_lstm(gates_de, h_enc, c_enc, whh_d, bc, tc, collect_hs=True)
    logits_p = _run_output_proj(hs, wout, bout, tc, vt)   # (Bp, T, Vp), batch-first

    logits = logits_p[:B, :, :V]
    h = h_fin[:B, :H][None]
    c = c_fin[:B, :H][None]
    return logits, (h, c)


# ---------------------------------------------------------------------------
# Parameters in natural PyTorch layout ([i, f, g, o], (4H, E) / (4H, H), ...)
# ---------------------------------------------------------------------------
def init_params(key, vocab_size, dim_emb, dim_hid):
    ks = jax.random.split(key, 11)
    s = 0.1

    def r(k, shape):
        return jax.random.normal(k, shape, jnp.float32) * s

    return {
        "embedding": r(ks[0], (vocab_size, dim_emb)),
        "w_ih_en": r(ks[1], (4 * dim_hid, dim_emb)),
        "w_hh_en": r(ks[2], (4 * dim_hid, dim_hid)),
        "b_ih_en": r(ks[3], (4 * dim_hid,)),
        "b_hh_en": r(ks[4], (4 * dim_hid,)),
        "w_ih_de": r(ks[5], (4 * dim_hid, dim_emb)),
        "w_hh_de": r(ks[6], (4 * dim_hid, dim_hid)),
        "b_ih_de": r(ks[7], (4 * dim_hid,)),
        "b_hh_de": r(ks[8], (4 * dim_hid,)),
        "w_out": r(ks[9], (vocab_size, dim_hid)),
        "b_out": r(ks[10], (vocab_size,)),
    }


def _reference_forward(sequence, params):
    """Pure-JAX reference (lax.scan) mirroring the PyTorch module."""
    H = params["w_hh_en"].shape[1]
    B = sequence.shape[0]
    emb = jnp.take(params["embedding"], sequence, axis=0)  # (B, T, E)
    emb_tm = jnp.transpose(emb, (1, 0, 2))                 # (T, B, E)

    def make_cell(w_ih, w_hh, b_ih, b_hh):
        wih, whh, b = w_ih.T, w_hh.T, (b_ih + b_hh)[None, :]

        def cell(carry, x):
            h, c = carry
            gates = x @ wih + h @ whh + b
            i = jax.nn.sigmoid(gates[:, 0 * H:1 * H])
            f = jax.nn.sigmoid(gates[:, 1 * H:2 * H])
            g = jnp.tanh(gates[:, 2 * H:3 * H])
            o = jax.nn.sigmoid(gates[:, 3 * H:4 * H])
            c_new = f * c + i * g
            h_new = o * jnp.tanh(c_new)
            return (h_new, c_new), h_new
        return cell

    z = jnp.zeros((B, H), jnp.float32)
    (h, c), _ = lax.scan(make_cell(params["w_ih_en"], params["w_hh_en"],
                                   params["b_ih_en"], params["b_hh_en"]), (z, z), emb_tm)
    (h, c), hs = lax.scan(make_cell(params["w_ih_de"], params["w_hh_de"],
                                    params["b_ih_de"], params["b_hh_de"]), (h, c), emb_tm)
    logits_tm = hs @ params["w_out"].T + params["b_out"][None, :]
    return jnp.transpose(logits_tm, (1, 0, 2)), (h[None], c[None])


# TODO(synk): vocab-file loading and the autoregressive generate() loop are
# host-side control flow and are not translated to Pallas.

if __name__ == "__main__":
    B, T = 2, 8
    VOCAB, DIM_EMB, DIM_HID = 32, 16, 32

    key = jax.random.PRNGKey(0)
    k_par, k_seq = jax.random.split(key)
    params = init_params(k_par, VOCAB, DIM_EMB, DIM_HID)
    sequence = jax.random.randint(k_seq, (B, T), 0, VOCAB, dtype=jnp.int32)

    fwd = jax.jit(encoder_decoder_forward)
    logits, (h, c) = fwd(sequence, params)
    jax.block_until_ready((logits, h, c))

    ref_logits, (ref_h, ref_c) = _reference_forward(sequence, params)
    assert logits.shape == (B, T, VOCAB)
    assert h.shape == (1, B, DIM_HID) and c.shape == (1, B, DIM_HID)
    assert jnp.allclose(logits, ref_logits, atol=1e-5)
    assert jnp.allclose(h, ref_h, atol=1e-5)
    assert jnp.allclose(c, ref_c, atol=1e-5)

    print("KERNEL_OK")
</pallas_src>

<mosaic_0001>
module attributes {stable_mosaic.version = 11 : i64} {
  func.func @_input_proj_kernel(%arg0: i32, %arg1: memref<8x8x128xf32, #tpu.memory_space<vmem>>, %arg2: memref<128x512xf32, #tpu.memory_space<vmem>>, %arg3: memref<1x512xf32, #tpu.memory_space<vmem>>, %arg4: memref<128x512xf32, #tpu.memory_space<vmem>>, %arg5: memref<1x512xf32, #tpu.memory_space<vmem>>, %arg6: memref<8x8x512xf32, #tpu.memory_space<vmem>>, %arg7: memref<8x8x512xf32, #tpu.memory_space<vmem>>) attributes {dimension_semantics = [#tpu.dimension_semantics<parallel>], iteration_bounds = array<i64: 1>, scalar_prefetch = 0 : i64, scratch_operands = 0 : i64, tpu.core_type = #tpu.core_type<tc>, window_params = [{transform_indices = @transform_0, window_bounds = array<i64: 8, 8, 128>}, {pipeline_mode = #tpu.pipeline_mode<synchronous>, transform_indices = @transform_1, window_bounds = array<i64: 128, 512>}, {pipeline_mode = #tpu.pipeline_mode<synchronous>, transform_indices = @transform_2, window_bounds = array<i64: 1, 512>}, {pipeline_mode = #tpu.pipeline_mode<synchronous>, transform_indices = @transform_3, window_bounds = array<i64: 128, 512>}, {pipeline_mode = #tpu.pipeline_mode<synchronous>, transform_indices = @transform_4, window_bounds = array<i64: 1, 512>}, {transform_indices = @transform_5, window_bounds = array<i64: 8, 8, 512>}, {transform_indices = @transform_6, window_bounds = array<i64: 8, 8, 512>}]} {
    %c0 = arith.constant 0 : index
    %c0_0 = arith.constant 0 : index
    %c0_1 = arith.constant 0 : index
    %0 = vector.load %arg1[%c0, %c0_0, %c0_1] : memref<8x8x128xf32, #tpu.memory_space<vmem>>, vector<8x8x128xf32>
    %1 = vector.shape_cast %0 : vector<8x8x128xf32> to vector<64x128xf32>
    %c0_2 = arith.constant 0 : index
    %c0_3 = arith.constant 0 : index
    %2 = vector.load %arg2[%c0_2, %c0_3] : memref<128x512xf32, #tpu.memory_space<vmem>>, vector<128x512xf32>
    %cst = arith.constant dense<0.000000e+00> : vector<64x512xf32>
    %3 = tpu.matmul %1, %2, %cst {dimension_numbers = #tpu.dot_dimension_numbers<[1], [0], [0], [1], [0, 0, 1, 1], [], []>} : vector<64x128xf32>, vector<128x512xf32>, vector<64x512xf32> -> vector<64x512xf32>
    %c0_4 = arith.constant 0 : index
    %c0_5 = arith.constant 0 : index
    %4 = vector.load %arg3[%c0_4, %c0_5] : memref<1x512xf32, #tpu.memory_space<vmem>>, vector<1x512xf32>
    %5 = vector.broadcast %4 : vector<1x512xf32> to vector<64x512xf32>
    %6 = arith.addf %3, %5 : vector<64x512xf32>
    %c0_6 = arith.constant 0 : index
    %c0_7 = arith.constant 0 : index
    %7 = vector.load %arg4[%c0_6, %c0_7] : memref<128x512xf32, #tpu.memory_space<vmem>>, vector<128x512xf32>
    %cst_8 = arith.constant dense<0.000000e+00> : vector<64x512xf32>
    %8 = tpu.matmul %1, %7, %cst_8 {dimension_numbers = #tpu.dot_dimension_numbers<[1], [0], [0], [1], [0, 0, 1, 1], [], []>} : vector<64x128xf32>, vector<128x512xf32>, vector<64x512xf32> -> vector<64x512xf32>
    %c0_9 = arith.constant 0 : index
    %c0_10 = arith.constant 0 : index
    %9 = vector.load %arg5[%c0_9, %c0_10] : memref<1x512xf32, #tpu.memory_space<vmem>>, vector<1x512xf32>
    %10 = vector.broadcast %9 : vector<1x512xf32> to vector<64x512xf32>
    %11 = arith.addf %8, %10 : vector<64x512xf32>
    %12 = vector.shape_cast %6 : vector<64x512xf32> to vector<8x8x512xf32>
    %c0_11 = arith.constant 0 : index
    %c0_12 = arith.constant 0 : index
    %c0_13 = arith.constant 0 : index
    %13 = vector.load %arg6[%c0_11, %c0_12, %c0_13] : memref<8x8x512xf32, #tpu.memory_space<vmem>>, vector<8x8x512xf32>
    tpu.vector_store %arg6[%c0_11, %c0_12, %c0_13], %12 {strides = array<i32>} : memref<8x8x512xf32, #tpu.memory_space<vmem>>, vector<8x8x512xf32>,
    %14 = vector.shape_cast %11 : vector<64x512xf32> to vector<8x8x512xf32>
    %c0_14 = arith.constant 0 : index
    %c0_15 = arith.constant 0 : index
    %c0_16 = arith.constant 0 : index
    %15 = vector.load %arg7[%c0_14, %c0_15, %c0_16] : memref<8x8x512xf32, #tpu.memory_space<vmem>>, vector<8x8x512xf32>
    tpu.vector_store %arg7[%c0_14, %c0_15, %c0_16], %14 {strides = array<i32>} : memref<8x8x512xf32, #tpu.memory_space<vmem>>, vector<8x8x512xf32>,
    return
  }
  func.func @transform_0(%arg0: i32) -> (i32, i32, i32) {
    %c0_i32 = arith.constant 0 : i32
    %c0_i32_0 = arith.constant 0 : i32
    %c0_i32_1 = arith.constant 0 : i32
    return %arg0, %c0_i32, %c0_i32_0 : i32, i32, i32
  }
  func.func @transform_1(%arg0: i32) -> (i32, i32) {
    %c0_i32 = arith.constant 0 : i32
    %c0_i32_0 = arith.constant 0 : i32
    %c0_i32_1 = arith.constant 0 : i32
    return %c0_i32, %c0_i32_0 : i32, i32
  }
  func.func @transform_2(%arg0: i32) -> (i32, i32) {
    %c0_i32 = arith.constant 0 : i32
    %c0_i32_0 = arith.constant 0 : i32
    %c0_i32_1 = arith.constant 0 : i32
    return %c0_i32, %c0_i32_0 : i32, i32
  }
  func.func @transform_3(%arg0: i32) -> (i32, i32) {
    %c0_i32 = arith.constant 0 : i32
    %c0_i32_0 = arith.constant 0 : i32
    %c0_i32_1 = arith.constant 0 : i32
    return %c0_i32, %c0_i32_0 : i32, i32
  }
  func.func @transform_4(%arg0: i32) -> (i32, i32) {
    %c0_i32 = arith.constant 0 : i32
    %c0_i32_0 = arith.constant 0 : i32
    %c0_i32_1 = arith.constant 0 : i32
    return %c0_i32, %c0_i32_0 : i32, i32
  }
  func.func @transform_5(%arg0: i32) -> (i32, i32, i32) {
    %c0_i32 = arith.constant 0 : i32
    %c0_i32_0 = arith.constant 0 : i32
    %c0_i32_1 = arith.constant 0 : i32
    return %arg0, %c0_i32, %c0_i32_0 : i32, i32, i32
  }
  func.func @transform_6(%arg0: i32) -> (i32, i32, i32) {
    %c0_i32 = arith.constant 0 : i32
    %c0_i32_0 = arith.constant 0 : i32
    %c0_i32_1 = arith.constant 0 : i32
    return %arg0, %c0_i32, %c0_i32_0 : i32, i32, i32
  }
}

module attributes {stable_mosaic.version = 11 : i64} {
  func.func @_lstm_final_state_kernel(%arg0: i32, %arg1: i32, %arg2: memref<8x8x512xf32, #tpu.memory_space<vmem>>, %arg3: memref<8x128xf32, #tpu.memory_space<vmem>>, %arg4: memref<8x128xf32, #tpu.memory_space<vmem>>, %arg5: memref<128x512xf32, #tpu.memory_space<vmem>>, %arg6: memref<8x128xf32, #tpu.memory_space<vmem>>, %arg7: memref<8x128xf32, #tpu.memory_space<vmem>>) attributes {dimension_semantics = [#tpu.dimension_semantics<parallel>, #tpu.dimension_semantics<arbitrary>], iteration_bounds = array<i64: 1, 1>, scalar_prefetch = 0 : i64, scratch_operands = 0 : i64, tpu.core_type = #tpu.core_type<tc>, window_params = [{transform_indices = @transform_0, window_bounds = array<i64: 8, 8, 512>}, {transform_indices = @transform_1, window_bounds = array<i64: 8, 128>}, {transform_indices = @transform_2, window_bounds = array<i64: 8, 128>}, {pipeline_mode = #tpu.pipeline_mode<synchronous>, transform_indices = @transform_3, window_bounds = array<i64: 128, 512>}, {transform_indices = @transform_4, window_bounds = array<i64: 8, 128>}, {transform_indices = @transform_5, window_bounds = array<i64: 8, 128>}]} {
    %c0_i32 = arith.constant 0 : i32
    %0 = arith.cmpi eq, %arg1, %c0_i32 : i32
    %1 = arith.extui %0 : i1 to i32
    %c0_i32_0 = arith.constant 0 : i32
    %2 = arith.cmpi ne, %1, %c0_i32_0 : i32
    scf.if %2 {
      %c0_42 = arith.constant 0 : index
      %c0_43 = arith.constant 0 : index
      %168 = vector.load %arg3[%c0_42, %c0_43] : memref<8x128xf32, #tpu.memory_space<vmem>>, vector<8x128xf32>
      %c0_44 = arith.constant 0 : index
      %c0_45 = arith.constant 0 : index
      %169 = vector.load %arg6[%c0_44, %c0_45] : memref<8x128xf32, #tpu.memory_space<vmem>>, vector<8x128xf32>
      tpu.vector_store %arg6[%c0_44, %c0_45], %168 {strides = array<i32>} : memref<8x128xf32, #tpu.memory_space<vmem>>, vector<8x128xf32>,
      %c0_46 = arith.constant 0 : index
      %c0_47 = arith.constant 0 : index
      %170 = vector.load %arg4[%c0_46, %c0_47] : memref<8x128xf32, #tpu.memory_space<vmem>>, vector<8x128xf32>
      %c0_48 = arith.constant 0 : index
      %c0_49 = arith.constant 0 : index
      %171 = vector.load %arg7[%c0_48, %c0_49] : memref<8x128xf32, #tpu.memory_space<vmem>>, vector<8x128xf32>
      tpu.vector_store %arg7[%c0_48, %c0_49], %170 {strides = array<i32>} : memref<8x128xf32, #tpu.memory_space<vmem>>, vector<8x128xf32>,
    } else {
    }
    %c0 = arith.constant 0 : index
    %c0_1 = arith.constant 0 : index
    %3 = vector.load %arg5[%c0, %c0_1] : memref<128x512xf32, #tpu.memory_space<vmem>>, vector<128x512xf32>
    %c0_2 = arith.constant 0 : index
    %c0_3 = arith.constant 0 : index
    %4 = vector.load %arg6[%c0_2, %c0_3] : memref<8x128xf32, #tpu.memory_space<vmem>>, vector<8x128xf32>
    %c0_4 = arith.constant 0 : index
    %c0_5 = arith.constant 0 : index
    %5 = vector.load %arg7[%c0_4, %c0_5] : memref<8x128xf32, #tpu.memory_space<vmem>>, vector<8x128xf32>
    %c0_6 = arith.constant 0 : index
    %c0_7 = arith.constant 0 : index
    %c0_8 = arith.constant 0 : index
    %6 = vector.load %arg2[%c0_6, %c0_7, %c0_8] : memref<8x8x512xf32, #tpu.memory_space<vmem>>, vector<1x8x512xf32>
    %7 = vector.shape_cast %6 : vector<1x8x512xf32> to vector<8x512xf32>
    %cst = arith.constant dense<0.000000e+00> : vector<8x512xf32>
    %8 = tpu.matmul %4, %3, %cst {dimension_numbers = #tpu.dot_dimension_numbers<[1], [0], [0], [1], [0, 0, 1, 1], [], []>} : vector<8x128xf32>, vector<128x512xf32>, vector<8x512xf32> -> vector<8x512xf32>
    %9 = arith.addf %7, %8 : vector<8x512xf32>
    %10 = vector.extract_strided_slice %9 {offsets = [0, 0], sizes = [8, 384], strides = [1, 1]} : vector<8x512xf32> to vector<8x384xf32>
    %11 = arith.negf %10 : vector<8x384xf32>
    %12 = math.exp %11 : vector<8x384xf32>
    %cst_9 = arith.constant 1.000000e+00 : f32
    %13 = vector.broadcast %cst_9 : f32 to vector<8x384xf32>
    %14 = arith.addf %13, %12 : vector<8x384xf32>
    %15 = arith.divf %13, %14 : vector<8x384xf32>
    %16 = vector.extract_strided_slice %9 {offsets = [0, 384], sizes = [8, 128], strides = [1, 1]} : vector<8x512xf32> to vector<8x128xf32>
    %17 = math.tanh %16 : vector<8x128xf32>
    %18 = vector.extract_strided_slice %15 {offsets = [0, 128], sizes = [8, 128], strides = [1, 1]} : vector<8x384xf32> to vector<8x128xf32>
    %19 = arith.mulf %18, %5 : vector<8x128xf32>
    %20 = vector.extract_strided_slice %15 {offsets = [0, 0], sizes = [8, 128], strides = [1, 1]} : vector<8x384xf32> to vector<8x128xf32>
    %21 = arith.mulf %20, %17 : vector<8x128xf32>
    %22 = arith.addf %19, %21 : vector<8x128xf32>
    %23 = vector.extract_strided_slice %15 {offsets = [0, 256], sizes = [8, 128], strides = [1, 1]} : vector<8x384xf32> to vector<8x128xf32>
    %24 = math.tanh %22 : vector<8x128xf32>
    %25 = arith.mulf %23, %24 : vector<8x128xf32>
    %c1 = arith.constant 1 : index
    %c0_10 = arith.constant 0 : index
    %c0_11 = arith.constant 0 : index
    %26 = vector.load %arg2[%c1, %c0_10, %c0_11] : memref<8x8x512xf32, #tpu.memory_space<vmem>>, vector<1x8x512xf32>
    %27 = vector.shape_cast %26 : vector<1x8x512xf32> to vector<8x512xf32>
    %cst_12 = arith.constant dense<0.000000e+00> : vector<8x512xf32>
    %28 = tpu.matmul %25, %3, %cst_12 {dimension_numbers = #tpu.dot_dimension_numbers<[1], [0], [0], [1], [0, 0, 1, 1], [], []>} : vector<8x128xf32>, vector<128x512xf32>, vector<8x512xf32> -> vector<8x512xf32>
    %29 = arith.addf %27, %28 : vector<8x512xf32>
    %30 = vector.extract_strided_slice %29 {offsets = [0, 0], sizes = [8, 384], strides = [1, 1]} : vector<8x512xf32> to vector<8x384xf32>
    %31 = arith.negf %30 : vector<8x384xf32>
    %32 = math.exp %31 : vector<8x384xf32>
    %cst_13 = arith.constant 1.000000e+00 : f32
    %33 = vector.broadcast %cst_13 : f32 to vector<8x384xf32>
    %34 = arith.addf %33, %32 : vector<8x384xf32>
    %35 = arith.divf %33, %34 : vector<8x384xf32>
    %36 = vector.extract_strided_slice %29 {offsets = [0, 384], sizes = [8, 128], strides = [1, 1]} : vector<8x512xf32> to vector<8x128xf32>
    %37 = math.tanh %36 : vector<8x128xf32>
    %38 = vector.extract_strided_slice %35 {offsets = [0, 128], sizes = [8, 128], strides = [1, 1]} : vector<8x384xf32> to vector<8x128xf32>
    %39 = arith.mulf %38, %22 : vector<8x128xf32>
    %40 = vector.extract_strided_slice %35 {offsets = [0, 0], sizes = [8, 128], strides = [1, 1]} : vector<8x384xf32> to vector<8x128xf32>
    %41 = arith.mulf %40, %37 : vector<8x128xf32>
    %42 = arith.addf %39, %41 : vector<8x128xf32>
    %43 = vector.extract_strided_slice %35 {offsets = [0, 256], sizes = [8, 128], strides = [1, 1]} : vector<8x384xf32> to vector<8x128xf32>
    %44 = math.tanh %42 : vector<8x128xf32>
    %45 = arith.mulf %43, %44 : vector<8x128xf32>
    %c2 = arith.constant 2 : index
    %c0_14 = arith.constant 0 : index
    %c0_15 = arith.constant 0 : index
    %46 = vector.load %arg2[%c2, %c0_14, %c0_15] : memref<8x8x512xf32, #tpu.memory_space<vmem>>, vector<1x8x512xf32>
    %47 = vector.shape_cast %46 : vector<1x8x512xf32> to vector<8x512xf32>
    %cst_16 = arith.constant dense<0.000000e+00> : vector<8x512xf32>
    %48 = tpu.matmul %45, %3, %cst_16 {dimension_numbers = #tpu.dot_dimension_numbers<[1], [0], [0], [1], [0, 0, 1, 1], [], []>} : vector<8x128xf32>, vector<128x512xf32>, vector<8x512xf32> -> vector<8x512xf32>
    %49 = arith.addf %47, %48 : vector<8x512xf32>
    %50 = vector.extract_strided_slice %49 {offsets = [0, 0], sizes = [8, 384], strides = [1, 1]} : vector<8x512xf32> to vector<8x384xf32>
    %51 = arith.negf %50 : vector<8x384xf32>
    %52 = math.exp %51 : vector<8x384xf32>
    %cst_17 = arith.constant 1.000000e+00 : f32
    %53 = vector.broadcast %cst_17 : f32 to vector<8x384xf32>
    %54 = arith.addf %53, %52 : vector<8x384xf32>
    %55 = arith.divf %53, %54 : vector<8x384xf32>
    %56 = vector.extract_strided_slice %49 {offsets = [0, 384], sizes = [8, 128], strides = [1, 1]} : vector<8x512xf32> to vector<8x128xf32>
    %57 = math.tanh %56 : vector<8x128xf32>
    %58 = vector.extract_strided_slice %55 {offsets = [0, 128], sizes = [8, 128], strides = [1, 1]} : vector<8x384xf32> to vector<8x128xf32>
    %59 = arith.mulf %58, %42 : vector<8x128xf32>
    %60 = vector.extract_strided_slice %55 {offsets = [0, 0], sizes = [8, 128], strides = [1, 1]} : vector<8x384xf32> to vector<8x128xf32>
    %61 = arith.mulf %60, %57 : vector<8x128xf32>
    %62 = arith.addf %59, %61 : vector<8x128xf32>
    %63 = vector.extract_strided_slice %55 {offsets = [0, 256], sizes = [8, 128], strides = [1, 1]} : vector<8x384xf32> to vector<8x128xf32>
    %64 = math.tanh %62 : vector<8x128xf32>
    %65 = arith.mulf %63, %64 : vector<8x128xf32>
    %c3 = arith.constant 3 : index
    %c0_18 = arith.constant 0 : index
    %c0_19 = arith.constant 0 : index
    %66 = vector.load %arg2[%c3, %c0_18, %c0_19] : memref<8x8x512xf32, #tpu.memory_space<vmem>>, vector<1x8x512xf32>
    %67 = vector.shape_cast %66 : vector<1x8x512xf32> to vector<8x512xf32>
    %cst_20 = arith.constant dense<0.000000e+00> : vector<8x512xf32>
    %68 = tpu.matmul %65, %3, %cst_20 {dimension_numbers = #tpu.dot_dimension_numbers<[1], [0], [0], [1], [0, 0, 1, 1], [], []>} : vector<8x128xf32>, vector<128x512xf32>, vector<8x512xf32> -> vector<8x512xf32>
    %69 = arith.addf %67, %68 : vector<8x512xf32>
    %70 = vector.extract_strided_slice %69 {offsets = [0, 0], sizes = [8, 384], strides = [1, 1]} : vector<8x512xf32> to vector<8x384xf32>
    %71 = arith.negf %70 : vector<8x384xf32>
    %72 = math.exp %71 : vector<8x384xf32>
    %cst_21 = arith.constant 1.000000e+00 : f32
    %73 = vector.broadcast %cst_21 : f32 to vector<8x384xf32>
    %74 = arith.addf %73, %72 : vector<8x384xf32>
    %75 = arith.divf %73, %74 : vector<8x384xf32>
    %76 = vector.extract_strided_slice %69 {offsets = [0, 384], sizes = [8, 128], strides = [1, 1]} : vector<8x512xf32> to vector<8x128xf32>
    %77 = math.tanh %76 : vector<8x128xf32>
    %78 = vector.extract_strided_slice %75 {offsets = [0, 128], sizes = [8, 128], strides = [1, 1]} : vector<8x384xf32> to vector<8x128xf32>
    %79 = arith.mulf %78, %62 : vector<8x128xf32>
    %80 = vector.extract_strided_slice %75 {offsets = [0, 0], sizes = [8, 128], strides = [1, 1]} : vector<8x384xf32> to vector<8x128xf32>
    %81 = arith.mulf %80, %77 : vector<8x128xf32>
    %82 = arith.addf %79, %81 : vector<8x128xf32>
    %83 = vector.extract_strided_slice %75 {offsets = [0, 256], sizes = [8, 128], strides = [1, 1]} : vector<8x384xf32> to vector<8x128xf32>
    %84 = math.tanh %82 : vector<8x128xf32>
    %85 = arith.mulf %83, %84 : vector<8x128xf32>
    %c4 = arith.constant 4 : index
    %c0_22 = arith.constant 0 : index
    %c0_23 = arith.constant 0 : index
    %86 = vector.load %arg2[%c4, %c0_22, %c0_23] : memref<8x8x512xf32, #tpu.memory_space<vmem>>, vector<1x8x512xf32>
    %87 = vector.shape_cast %86 : vector<1x8x512xf32> to vector<8x512xf32>
    %cst_24 = arith.constant dense<0.000000e+00> : vector<8x512xf32>
    %88 = tpu.matmul %85, %3, %cst_24 {dimension_numbers = #tpu.dot_dimension_numbers<[1], [0], [0], [1], [0, 0, 1, 1], [], []>} : vector<8x128xf32>, vector<128x512xf32>, vector<8x512xf32> -> vector<8x512xf32>
    %89 = arith.addf %87, %88 : vector<8x512xf32>
    %90 = vector.extract_strided_slice %89 {offsets = [0, 0], sizes = [8, 384], strides = [1, 1]} : vector<8x512xf32> to vector<8x384xf32>
    %91 = arith.negf %90 : vector<8x384xf32>
    %92 = math.exp %91 : vector<8x384xf32>
    %cst_25 = arith.constant 1.000000e+00 : f32
    %93 = vector.broadcast %cst_25 : f32 to vector<8x384xf32>
    %94 = arith.addf %93, %92 : vector<8x384xf32>
    %95 = arith.divf %93, %94 : vector<8x384xf32>
    %96 = vector.extract_strided_slice %89 {offsets = [0, 384], sizes = [8, 128], strides = [1, 1]} : vector<8x512xf32> to vector<8x128xf32>
    %97 = math.tanh %96 : vector<8x128xf32>
    %98 = vector.extract_strided_slice %95 {offsets = [0, 128], sizes = [8, 128], strides = [1, 1]} : vector<8x384xf32> to vector<8x128xf32>
    %99 = arith.mulf %98, %82 : vector<8x128xf32>
    %100 = vector.extract_strided_slice %95 {offsets = [0, 0], sizes = [8, 128], strides = [1, 1]} : vector<8x384xf32> to vector<8x128xf32>
    %101 = arith.mulf %100, %97 : vector<8x128xf32>
    %102 = arith.addf %99, %101 : vector<8x128xf32>
    %103 = vector.extract_strided_slice %95 {offsets = [0, 256], sizes = [8, 128], strides = [1, 1]} : vector<8x384xf32> to vector<8x128xf32>
    %104 = math.tanh %102 : vector<8x128xf32>
    %105 = arith.mulf %103, %104 : vector<8x128xf32>
    %c5 = arith.constant 5 : index
    %c0_26 = arith.constant 0 : index
    %c0_27 = arith.constant 0 : index
    %106 = vector.load %arg2[%c5, %c0_26, %c0_27] : memref<8x8x512xf32, #tpu.memory_space<vmem>>, vector<1x8x512xf32>
    %107 = vector.shape_cast %106 : vector<1x8x512xf32> to vector<8x512xf32>
    %cst_28 = arith.constant dense<0.000000e+00> : vector<8x512xf32>
    %108 = tpu.matmul %105, %3, %cst_28 {dimension_numbers = #tpu.dot_dimension_numbers<[1], [0], [0], [1], [0, 0, 1, 1], [], []>} : vector<8x128xf32>, vector<128x512xf32>, vector<8x512xf32> -> vector<8x512xf32>
    %109 = arith.addf %107, %108 : vector<8x512xf32>
    %110 = vector.extract_strided_slice %109 {offsets = [0, 0], sizes = [8, 384], strides = [1, 1]} : vector<8x512xf32> to vector<8x384xf32>
    %111 = arith.negf %110 : vector<8x384xf32>
    %112 = math.exp %111 : vector<8x384xf32>
    %cst_29 = arith.constant 1.000000e+00 : f32
    %113 = vector.broadcast %cst_29 : f32 to vector<8x384xf32>
    %114 = arith.addf %113, %112 : vector<8x384xf32>
    %115 = arith.divf %113, %114 : vector<8x384xf32>
    %116 = vector.extract_strided_slice %109 {offsets = [0, 384], sizes = [8, 128], strides = [1, 1]} : vector<8x512xf32> to vector<8x128xf32>
    %117 = math.tanh %116 : vector<8x128xf32>
    %118 = vector.extract_strided_slice %115 {offsets = [0, 128], sizes = [8, 128], strides = [1, 1]} : vector<8x384xf32> to vector<8x128xf32>
    %119 = arith.mulf %118, %102 : vector<8x128xf32>
    %120 = vector.extract_strided_slice %115 {offsets = [0, 0], sizes = [8, 128], strides = [1, 1]} : vector<8x384xf32> to vector<8x128xf32>
    %121 = arith.mulf %120, %117 : vector<8x128xf32>
    %122 = arith.addf %119, %121 : vector<8x128xf32>
    %123 = vector.extract_strided_slice %115 {offsets = [0, 256], sizes = [8, 128], strides = [1, 1]} : vector<8x384xf32> to vector<8x128xf32>
    %124 = math.tanh %122 : vector<8x128xf32>
    %125 = arith.mulf %123, %124 : vector<8x128xf32>
    %c6 = arith.constant 6 : index
    %c0_30 = arith.constant 0 : index
    %c0_31 = arith.constant 0 : index
    %126 = vector.load %arg2[%c6, %c0_30, %c0_31] : memref<8x8x512xf32, #tpu.memory_space<vmem>>, vector<1x8x512xf32>
    %127 = vector.shape_cast %126 : vector<1x8x512xf32> to vector<8x512xf32>
    %cst_32 = arith.constant dense<0.000000e+00> : vector<8x512xf32>
    %128 = tpu.matmul %125, %3, %cst_32 {dimension_numbers = #tpu.dot_dimension_numbers<[1], [0], [0], [1], [0, 0, 1, 1], [], []>} : vector<8x128xf32>, vector<128x512xf32>, vector<8x512xf32> -> vector<8x512xf32>
    %129 = arith.addf %127, %128 : vector<8x512xf32>
    %130 = vector.extract_strided_slice %129 {offsets = [0, 0], sizes = [8, 384], strides = [1, 1]} : vector<8x512xf32> to vector<8x384xf32>
    %131 = arith.negf %130 : vector<8x384xf32>
    %132 = math.exp %131 : vector<8x384xf32>
    %cst_33 = arith.constant 1.000000e+00 : f32
    %133 = vector.broadcast %cst_33 : f32 to vector<8x384xf32>
    %134 = arith.addf %133, %132 : vector<8x384xf32>
    %135 = arith.divf %133, %134 : vector<8x384xf32>
    %136 = vector.extract_strided_slice %129 {offsets = [0, 384], sizes = [8, 128], strides = [1, 1]} : vector<8x512xf32> to vector<8x128xf32>
    %137 = math.tanh %136 : vector<8x128xf32>
    %138 = vector.extract_strided_slice %135 {offsets = [0, 128], sizes = [8, 128], strides = [1, 1]} : vector<8x384xf32> to vector<8x128xf32>
    %139 = arith.mulf %138, %122 : vector<8x128xf32>
    %140 = vector.extract_strided_slice %135 {offsets = [0, 0], sizes = [8, 128], strides = [1, 1]} : vector<8x384xf32> to vector<8x128xf32>
    %141 = arith.mulf %140, %137 : vector<8x128xf32>
    %142 = arith.addf %139, %141 : vector<8x128xf32>
    %143 = vector.extract_strided_slice %135 {offsets = [0, 256], sizes = [8, 128], strides = [1, 1]} : vector<8x384xf32> to vector<8x128xf32>
    %144 = math.tanh %142 : vector<8x128xf32>
    %145 = arith.mulf %143, %144 : vector<8x128xf32>
    %c7 = arith.constant 7 : index
    %c0_34 = arith.constant 0 : index
    %c0_35 = arith.constant 0 : index
    %146 = vector.load %arg2[%c7, %c0_34, %c0_35] : memref<8x8x512xf32, #tpu.memory_space<vmem>>, vector<1x8x512xf32>
    %147 = vector.shape_cast %146 : vector<1x8x512xf32> to vector<8x512xf32>
    %cst_36 = arith.constant dense<0.000000e+00> : vector<8x512xf32>
    %148 = tpu.matmul %145, %3, %cst_36 {dimension_numbers = #tpu.dot_dimension_numbers<[1], [0], [0], [1], [0, 0, 1, 1], [], []>} : vector<8x128xf32>, vector<128x512xf32>, vector<8x512xf32> -> vector<8x512xf32>
    %149 = arith.addf %147, %148 : vector<8x512xf32>
    %150 = vector.extract_strided_slice %149 {offsets = [0, 0], sizes = [8, 384], strides = [1, 1]} : vector<8x512xf32> to vector<8x384xf32>
    %151 = arith.negf %150 : vector<8x384xf32>
    %152 = math.exp %151 : vector<8x384xf32>
    %cst_37 = arith.constant 1.000000e+00 : f32
    %153 = vector.broadcast %cst_37 : f32 to vector<8x384xf32>
    %154 = arith.addf %153, %152 : vector<8x384xf32>
    %155 = arith.divf %153, %154 : vector<8x384xf32>
    %156 = vector.extract_strided_slice %149 {offsets = [0, 384], sizes = [8, 128], strides = [1, 1]} : vector<8x512xf32> to vector<8x128xf32>
    %157 = math.tanh %156 : vector<8x128xf32>
    %158 = vector.extract_strided_slice %155 {offsets = [0, 128], sizes = [8, 128], strides = [1, 1]} : vector<8x384xf32> to vector<8x128xf32>
    %159 = arith.mulf %158, %142 : vector<8x128xf32>
    %160 = vector.extract_strided_slice %155 {offsets = [0, 0], sizes = [8, 128], strides = [1, 1]} : vector<8x384xf32> to vector<8x128xf32>
    %161 = arith.mulf %160, %157 : vector<8x128xf32>
    %162 = arith.addf %159, %161 : vector<8x128xf32>
    %163 = vector.extract_strided_slice %155 {offsets = [0, 256], sizes = [8, 128], strides = [1, 1]} : vector<8x384xf32> to vector<8x128xf32>
    %164 = math.tanh %162 : vector<8x128xf32>
    %165 = arith.mulf %163, %164 : vector<8x128xf32>
    %c0_38 = arith.constant 0 : index
    %c0_39 = arith.constant 0 : index
    %166 = vector.load %arg6[%c0_38, %c0_39] : memref<8x128xf32, #tpu.memory_space<vmem>>, vector<8x128xf32>
    tpu.vector_store %arg6[%c0_38, %c0_39], %165 {strides = array<i32>} : memref<8x128xf32, #tpu.memory_space<vmem>>, vector<8x128xf32>,
    %c0_40 = arith.constant 0 : index
    %c0_41 = arith.constant 0 : index
    %167 = vector.load %arg7[%c0_40, %c0_41] : memref<8x128xf32, #tpu.memory_space<vmem>>, vector<8x128xf32>
    tpu.vector_store %arg7[%c0_40, %c0_41], %162 {strides = array<i32>} : memref<8x128xf32, #tpu.memory_space<vmem>>, vector<8x128xf32>,
    return
  }
  func.func @transform_0(%arg0: i32, %arg1: i32) -> (i32, i32, i32) {
    %c0_i32 = arith.constant 0 : i32
    %c0_i32_0 = arith.constant 0 : i32
    return %arg1, %arg0, %c0_i32 : i32, i32, i32
  }
  func.func @transform_1(%arg0: i32, %arg1: i32) -> (i32, i32) {
    %c0_i32 = arith.constant 0 : i32
    %c0_i32_0 = arith.constant 0 : i32
    return %arg0, %c0_i32 : i32, i32
  }
  func.func @transform_2(%arg0: i32, %arg1: i32) -> (i32, i32) {
    %c0_i32 = arith.constant 0 : i32
    %c0_i32_0 = arith.constant 0 : i32
    return %arg0, %c0_i32 : i32, i32
  }
  func.func @transform_3(%arg0: i32, %arg1: i32) -> (i32, i32) {
    %c0_i32 = arith.constant 0 : i32
    %c0_i32_0 = arith.constant 0 : i32
    %c0_i32_1 = arith.constant 0 : i32
    return %c0_i32, %c0_i32_0 : i32, i32
  }
  func.func @transform_4(%arg0: i32, %arg1: i32) -> (i32, i32) {
    %c0_i32 = arith.constant 0 : i32
    %c0_i32_0 = arith.constant 0 : i32
    return %arg0, %c0_i32 : i32, i32
  }
  func.func @transform_5(%arg0: i32, %arg1: i32) -> (i32, i32) {
    %c0_i32 = arith.constant 0 : i32
    %c0_i32_0 = arith.constant 0 : i32
    return %arg0, %c0_i32 : i32, i32
  }
}

module attributes {stable_mosaic.version = 11 : i64} {
  func.func @_lstm_recurrence_kernel(%arg0: i32, %arg1: i32, %arg2: memref<8x8x512xf32, #tpu.memory_space<vmem>>, %arg3: memref<8x128xf32, #tpu.memory_space<vmem>>, %arg4: memref<8x128xf32, #tpu.memory_space<vmem>>, %arg5: memref<128x512xf32, #tpu.memory_space<vmem>>, %arg6: memref<8x8x128xf32, #tpu.memory_space<vmem>>, %arg7: memref<8x128xf32, #tpu.memory_space<vmem>>, %arg8: memref<8x128xf32, #tpu.memory_space<vmem>>) attributes {dimension_semantics = [#tpu.dimension_semantics<parallel>, #tpu.dimension_semantics<arbitrary>], iteration_bounds = array<i64: 1, 1>, scalar_prefetch = 0 : i64, scratch_operands = 0 : i64, tpu.core_type = #tpu.core_type<tc>, window_params = [{transform_indices = @transform_0, window_bounds = array<i64: 8, 8, 512>}, {transform_indices = @transform_1, window_bounds = array<i64: 8, 128>}, {transform_indices = @transform_2, window_bounds = array<i64: 8, 128>}, {pipeline_mode = #tpu.pipeline_mode<synchronous>, transform_indices = @transform_3, window_bounds = array<i64: 128, 512>}, {transform_indices = @transform_4, window_bounds = array<i64: 8, 8, 128>}, {transform_indices = @transform_5, window_bounds = array<i64: 8, 128>}, {transform_indices = @transform_6, window_bounds = array<i64: 8, 128>}]} {
    %c0_i32 = arith.constant 0 : i32
    %0 = arith.cmpi eq, %arg1, %c0_i32 : i32
    %1 = arith.extui %0 : i1 to i32
    %c0_i32_0 = arith.constant 0 : i32
    %2 = arith.cmpi ne, %1, %c0_i32_0 : i32
    scf.if %2 {
      %c0_66 = arith.constant 0 : index
      %c0_67 = arith.constant 0 : index
      %192 = vector.load %arg3[%c0_66, %c0_67] : memref<8x128xf32, #tpu.memory_space<vmem>>, vector<8x128xf32>
      %c0_68 = arith.constant 0 : index
      %c0_69 = arith.constant 0 : index
      %193 = vector.load %arg7[%c0_68, %c0_69] : memref<8x128xf32, #tpu.memory_space<vmem>>, vector<8x128xf32>
      tpu.vector_store %arg7[%c0_68, %c0_69], %192 {strides = array<i32>} : memref<8x128xf32, #tpu.memory_space<vmem>>, vector<8x128xf32>,
      %c0_70 = arith.constant 0 : index
      %c0_71 = arith.constant 0 : index
      %194 = vector.load %arg4[%c0_70, %c0_71] : memref<8x128xf32, #tpu.memory_space<vmem>>, vector<8x128xf32>
      %c0_72 = arith.constant 0 : index
      %c0_73 = arith.constant 0 : index
      %195 = vector.load %arg8[%c0_72, %c0_73] : memref<8x128xf32, #tpu.memory_space<vmem>>, vector<8x128xf32>
      tpu.vector_store %arg8[%c0_72, %c0_73], %194 {strides = array<i32>} : memref<8x128xf32, #tpu.memory_space<vmem>>, vector<8x128xf32>,
    } else {
    }
    %c0 = arith.constant 0 : index
    %c0_1 = arith.constant 0 : index
    %3 = vector.load %arg5[%c0, %c0_1] : memref<128x512xf32, #tpu.memory_space<vmem>>, vector<128x512xf32>
    %c0_2 = arith.constant 0 : index
    %c0_3 = arith.constant 0 : index
    %4 = vector.load %arg7[%c0_2, %c0_3] : memref<8x128xf32, #tpu.memory_space<vmem>>, vector<8x128xf32>
    %c0_4 = arith.constant 0 : index
    %c0_5 = arith.constant 0 : index
    %5 = vector.load %arg8[%c0_4, %c0_5] : memref<8x128xf32, #tpu.memory_space<vmem>>, vector<8x128xf32>
    %c0_6 = arith.constant 0 : index
    %c0_7 = arith.constant 0 : index
    %c0_8 = arith.constant 0 : index
    %6 = vector.load %arg2[%c0_6, %c0_7, %c0_8] : memref<8x8x512xf32, #tpu.memory_space<vmem>>, vector<1x8x512xf32>
    %7 = vector.shape_cast %6 : vector<1x8x512xf32> to vector<8x512xf32>
    %cst = arith.constant dense<0.000000e+00> : vector<8x512xf32>
    %8 = tpu.matmul %4, %3, %cst {dimension_numbers = #tpu.dot_dimension_numbers<[1], [0], [0], [1], [0, 0, 1, 1], [], []>} : vector<8x128xf32>, vector<128x512xf32>, vector<8x512xf32> -> vector<8x512xf32>
    %9 = arith.addf %7, %8 : vector<8x512xf32>
    %10 = vector.extract_strided_slice %9 {offsets = [0, 0], sizes = [8, 384], strides = [1, 1]} : vector<8x512xf32> to vector<8x384xf32>
    %11 = arith.negf %10 : vector<8x384xf32>
    %12 = math.exp %11 : vector<8x384xf32>
    %cst_9 = arith.constant 1.000000e+00 : f32
    %13 = vector.broadcast %cst_9 : f32 to vector<8x384xf32>
    %14 = arith.addf %13, %12 : vector<8x384xf32>
    %15 = arith.divf %13, %14 : vector<8x384xf32>
    %16 = vector.extract_strided_slice %9 {offsets = [0, 384], sizes = [8, 128], strides = [1, 1]} : vector<8x512xf32> to vector<8x128xf32>
    %17 = math.tanh %16 : vector<8x128xf32>
    %18 = vector.extract_strided_slice %15 {offsets = [0, 128], sizes = [8, 128], strides = [1, 1]} : vector<8x384xf32> to vector<8x128xf32>
    %19 = arith.mulf %18, %5 : vector<8x128xf32>
    %20 = vector.extract_strided_slice %15 {offsets = [0, 0], sizes = [8, 128], strides = [1, 1]} : vector<8x384xf32> to vector<8x128xf32>
    %21 = arith.mulf %20, %17 : vector<8x128xf32>
    %22 = arith.addf %19, %21 : vector<8x128xf32>
    %23 = vector.extract_strided_slice %15 {offsets = [0, 256], sizes = [8, 128], strides = [1, 1]} : vector<8x384xf32> to vector<8x128xf32>
    %24 = math.tanh %22 : vector<8x128xf32>
    %25 = arith.mulf %23, %24 : vector<8x128xf32>
    %c0_10 = arith.constant 0 : index
    %c0_11 = arith.constant 0 : index
    %c0_12 = arith.constant 0 : index
    %26 = vector.load %arg6[%c0_10, %c0_11, %c0_12] : memref<8x8x128xf32, #tpu.memory_space<vmem>>, vector<1x8x128xf32>
    %27 = vector.shape_cast %26 : vector<1x8x128xf32> to vector<8x128xf32>
    %28 = vector.shape_cast %25 : vector<8x128xf32> to vector<1x8x128xf32>
    tpu.vector_store %arg6[%c0_10, %c0_11, %c0_12], %28 {strides = array<i32>} : memref<8x8x128xf32, #tpu.memory_space<vmem>>, vector<1x8x128xf32>,
    %c1 = arith.constant 1 : index
    %c0_13 = arith.constant 0 : index
    %c0_14 = arith.constant 0 : index
    %29 = vector.load %arg2[%c1, %c0_13, %c0_14] : memref<8x8x512xf32, #tpu.memory_space<vmem>>, vector<1x8x512xf32>
    %30 = vector.shape_cast %29 : vector<1x8x512xf32> to vector<8x512xf32>
    %cst_15 = arith.constant dense<0.000000e+00> : vector<8x512xf32>
    %31 = tpu.matmul %25, %3, %cst_15 {dimension_numbers = #tpu.dot_dimension_numbers<[1], [0], [0], [1], [0, 0, 1, 1], [], []>} : vector<8x128xf32>, vector<128x512xf32>, vector<8x512xf32> -> vector<8x512xf32>
    %32 = arith.addf %30, %31 : vector<8x512xf32>
    %33 = vector.extract_strided_slice %32 {offsets = [0, 0], sizes = [8, 384], strides = [1, 1]} : vector<8x512xf32> to vector<8x384xf32>
    %34 = arith.negf %33 : vector<8x384xf32>
    %35 = math.exp %34 : vector<8x384xf32>
    %cst_16 = arith.constant 1.000000e+00 : f32
    %36 = vector.broadcast %cst_16 : f32 to vector<8x384xf32>
    %37 = arith.addf %36, %35 : vector<8x384xf32>
    %38 = arith.divf %36, %37 : vector<8x384xf32>
    %39 = vector.extract_strided_slice %32 {offsets = [0, 384], sizes = [8, 128], strides = [1, 1]} : vector<8x512xf32> to vector<8x128xf32>
    %40 = math.tanh %39 : vector<8x128xf32>
    %41 = vector.extract_strided_slice %38 {offsets = [0, 128], sizes = [8, 128], strides = [1, 1]} : vector<8x384xf32> to vector<8x128xf32>
    %42 = arith.mulf %41, %22 : vector<8x128xf32>
    %43 = vector.extract_strided_slice %38 {offsets = [0, 0], sizes = [8, 128], strides = [1, 1]} : vector<8x384xf32> to vector<8x128xf32>
    %44 = arith.mulf %43, %40 : vector<8x128xf32>
    %45 = arith.addf %42, %44 : vector<8x128xf32>
    %46 = vector.extract_strided_slice %38 {offsets = [0, 256], sizes = [8, 128], strides = [1, 1]} : vector<8x384xf32> to vector<8x128xf32>
    %47 = math.tanh %45 : vector<8x128xf32>
    %48 = arith.mulf %46, %47 : vector<8x128xf32>
    %c1_17 = arith.constant 1 : index
    %c0_18 = arith.constant 0 : index
    %c0_19 = arith.constant 0 : index
    %49 = vector.load %arg6[%c1_17, %c0_18, %c0_19] : memref<8x8x128xf32, #tpu.memory_space<vmem>>, vector<1x8x128xf32>
    %50 = vector.shape_cast %49 : vector<1x8x128xf32> to vector<8x128xf32>
    %51 = vector.shape_cast %48 : vector<8x128xf32> to vector<1x8x128xf32>
    tpu.vector_store %arg6[%c1_17, %c0_18, %c0_19], %51 {strides = array<i32>} : memref<8x8x128xf32, #tpu.memory_space<vmem>>, vector<1x8x128xf32>,
    %c2 = arith.constant 2 : index
    %c0_20 = arith.constant 0 : index
    %c0_21 = arith.constant 0 : index
    %52 = vector.load %arg2[%c2, %c0_20, %c0_21] : memref<8x8x512xf32, #tpu.memory_space<vmem>>, vector<1x8x512xf32>
    %53 = vector.shape_cast %52 : vector<1x8x512xf32> to vector<8x512xf32>
    %cst_22 = arith.constant dense<0.000000e+00> : vector<8x512xf32>
    %54 = tpu.matmul %48, %3, %cst_22 {dimension_numbers = #tpu.dot_dimension_numbers<[1], [0], [0], [1], [0, 0, 1, 1], [], []>} : vector<8x128xf32>, vector<128x512xf32>, vector<8x512xf32> -> vector<8x512xf32>
    %55 = arith.addf %53, %54 : vector<8x512xf32>
    %56 = vector.extract_strided_slice %55 {offsets = [0, 0], sizes = [8, 384], strides = [1, 1]} : vector<8x512xf32> to vector<8x384xf32>
    %57 = arith.negf %56 : vector<8x384xf32>
    %58 = math.exp %57 : vector<8x384xf32>
    %cst_23 = arith.constant 1.000000e+00 : f32
    %59 = vector.broadcast %cst_23 : f32 to vector<8x384xf32>
    %60 = arith.addf %59, %58 : vector<8x384xf32>
    %61 = arith.divf %59, %60 : vector<8x384xf32>
    %62 = vector.extract_strided_slice %55 {offsets = [0, 384], sizes = [8, 128], strides = [1, 1]} : vector<8x512xf32> to vector<8x128xf32>
    %63 = math.tanh %62 : vector<8x128xf32>
    %64 = vector.extract_strided_slice %61 {offsets = [0, 128], sizes = [8, 128], strides = [1, 1]} : vector<8x384xf32> to vector<8x128xf32>
    %65 = arith.mulf %64, %45 : vector<8x128xf32>
    %66 = vector.extract_strided_slice %61 {offsets = [0, 0], sizes = [8, 128], strides = [1, 1]} : vector<8x384xf32> to vector<8x128xf32>
    %67 = arith.mulf %66, %63 : vector<8x128xf32>
    %68 = arith.addf %65, %67 : vector<8x128xf32>
    %69 = vector.extract_strided_slice %61 {offsets = [0, 256], sizes = [8, 128], strides = [1, 1]} : vector<8x384xf32> to vector<8x128xf32>
    %70 = math.tanh %68 : vector<8x128xf32>
    %71 = arith.mulf %69, %70 : vector<8x128xf32>
    %c2_24 = arith.constant 2 : index
    %c0_25 = arith.constant 0 : index
    %c0_26 = arith.constant 0 : index
    %72 = vector.load %arg6[%c2_24, %c0_25, %c0_26] : memref<8x8x128xf32, #tpu.memory_space<vmem>>, vector<1x8x128xf32>
    %73 = vector.shape_cast %72 : vector<1x8x128xf32> to vector<8x128xf32>
    %74 = vector.shape_cast %71 : vector<8x128xf32> to vector<1x8x128xf32>
    tpu.vector_store %arg6[%c2_24, %c0_25, %c0_26], %74 {strides = array<i32>} : memref<8x8x128xf32, #tpu.memory_space<vmem>>, vector<1x8x128xf32>,
    %c3 = arith.constant 3 : index
    %c0_27 = arith.constant 0 : index
    %c0_28 = arith.constant 0 : index
    %75 = vector.load %arg2[%c3, %c0_27, %c0_28] : memref<8x8x512xf32, #tpu.memory_space<vmem>>, vector<1x8x512xf32>
    %76 = vector.shape_cast %75 : vector<1x8x512xf32> to vector<8x512xf32>
    %cst_29 = arith.constant dense<0.000000e+00> : vector<8x512xf32>
    %77 = tpu.matmul %71, %3, %cst_29 {dimension_numbers = #tpu.dot_dimension_numbers<[1], [0], [0], [1], [0, 0, 1, 1], [], []>} : vector<8x128xf32>, vector<128x512xf32>, vector<8x512xf32> -> vector<8x512xf32>
    %78 = arith.addf %76, %77 : vector<8x512xf32>
    %79 = vector.extract_strided_slice %78 {offsets = [0, 0], sizes = [8, 384], strides = [1, 1]} : vector<8x512xf32> to vector<8x384xf32>
    %80 = arith.negf %79 : vector<8x384xf32>
    %81 = math.exp %80 : vector<8x384xf32>
    %cst_30 = arith.constant 1.000000e+00 : f32
    %82 = vector.broadcast %cst_30 : f32 to vector<8x384xf32>
    %83 = arith.addf %82, %81 : vector<8x384xf32>
    %84 = arith.divf %82, %83 : vector<8x384xf32>
    %85 = vector.extract_strided_slice %78 {offsets = [0, 384], sizes = [8, 128], strides = [1, 1]} : vector<8x512xf32> to vector<8x128xf32>
    %86 = math.tanh %85 : vector<8x128xf32>
    %87 = vector.extract_strided_slice %84 {offsets = [0, 128], sizes = [8, 128], strides = [1, 1]} : vector<8x384xf32> to vector<8x128xf32>
    %88 = arith.mulf %87, %68 : vector<8x128xf32>
    %89 = vector.extract_strided_slice %84 {offsets = [0, 0], sizes = [8, 128], strides = [1, 1]} : vector<8x384xf32> to vector<8x128xf32>
    %90 = arith.mulf %89, %86 : vector<8x128xf32>
    %91 = arith.addf %88, %90 : vector<8x128xf32>
    %92 = vector.extract_strided_slice %84 {offsets = [0, 256], sizes = [8, 128], strides = [1, 1]} : vector<8x384xf32> to vector<8x128xf32>
    %93 = math.tanh %91 : vector<8x128xf32>
    %94 = arith.mulf %92, %93 : vector<8x128xf32>
    %c3_31 = arith.constant 3 : index
    %c0_32 = arith.constant 0 : index
    %c0_33 = arith.constant 0 : index
    %95 = vector.load %arg6[%c3_31, %c0_32, %c0_33] : memref<8x8x128xf32, #tpu.memory_space<vmem>>, vector<1x8x128xf32>
    %96 = vector.shape_cast %95 : vector<1x8x128xf32> to vector<8x128xf32>
    %97 = vector.shape_cast %94 : vector<8x128xf32> to vector<1x8x128xf32>
    tpu.vector_store %arg6[%c3_31, %c0_32, %c0_33], %97 {strides = array<i32>} : memref<8x8x128xf32, #tpu.memory_space<vmem>>, vector<1x8x128xf32>,
    %c4 = arith.constant 4 : index
    %c0_34 = arith.constant 0 : index
    %c0_35 = arith.constant 0 : index
    %98 = vector.load %arg2[%c4, %c0_34, %c0_35] : memref<8x8x512xf32, #tpu.memory_space<vmem>>, vector<1x8x512xf32>
    %99 = vector.shape_cast %98 : vector<1x8x512xf32> to vector<8x512xf32>
    %cst_36 = arith.constant dense<0.000000e+00> : vector<8x512xf32>
    %100 = tpu.matmul %94, %3, %cst_36 {dimension_numbers = #tpu.dot_dimension_numbers<[1], [0], [0], [1], [0, 0, 1, 1], [], []>} : vector<8x128xf32>, vector<128x512xf32>, vector<8x512xf32> -> vector<8x512xf32>
    %101 = arith.addf %99, %100 : vector<8x512xf32>
    %102 = vector.extract_strided_slice %101 {offsets = [0, 0], sizes = [8, 384], strides = [1, 1]} : vector<8x512xf32> to vector<8x384xf32>
    %103 = arith.negf %102 : vector<8x384xf32>
    %104 = math.exp %103 : vector<8x384xf32>
    %cst_37 = arith.constant 1.000000e+00 : f32
    %105 = vector.broadcast %cst_37 : f32 to vector<8x384xf32>
    %106 = arith.addf %105, %104 : vector<8x384xf32>
    %107 = arith.divf %105, %106 : vector<8x384xf32>
    %108 = vector.extract_strided_slice %101 {offsets = [0, 384], sizes = [8, 128], strides = [1, 1]} : vector<8x512xf32> to vector<8x128xf32>
    %109 = math.tanh %108 : vector<8x128xf32>
    %110 = vector.extract_strided_slice %107 {offsets = [0, 128], sizes = [8, 128], strides = [1, 1]} : vector<8x384xf32> to vector<8x128xf32>
    %111 = arith.mulf %110, %91 : vector<8x128xf32>
    %112 = vector.extract_strided_slice %107 {offsets = [0, 0], sizes = [8, 128], strides = [1, 1]} : vector<8x384xf32> to vector<8x128xf32>
    %113 = arith.mulf %112, %109 : vector<8x128xf32>
    %114 = arith.addf %111, %113 : vector<8x128xf32>
    %115 = vector.extract_strided_slice %107 {offsets = [0, 256], sizes = [8, 128], strides = [1, 1]} : vector<8x384xf32> to vector<8x128xf32>
    %116 = math.tanh %114 : vector<8x128xf32>
    %117 = arith.mulf %115, %116 : vector<8x128xf32>
    %c4_38 = arith.constant 4 : index
    %c0_39 = arith.constant 0 : index
    %c0_40 = arith.constant 0 : index
    %118 = vector.load %arg6[%c4_38, %c0_39, %c0_40] : memref<8x8x128xf32, #tpu.memory_space<vmem>>, vector<1x8x128xf32>
    %119 = vector.shape_cast %118 : vector<1x8x128xf32> to vector<8x128xf32>
    %120 = vector.shape_cast %117 : vector<8x128xf32> to vector<1x8x128xf32>
    tpu.vector_store %arg6[%c4_38, %c0_39, %c0_40], %120 {strides = array<i32>} : memref<8x8x128xf32, #tpu.memory_space<vmem>>, vector<1x8x128xf32>,
    %c5 = arith.constant 5 : index
    %c0_41 = arith.constant 0 : index
    %c0_42 = arith.constant 0 : index
    %121 = vector.load %arg2[%c5, %c0_41, %c0_42] : memref<8x8x512xf32, #tpu.memory_space<vmem>>, vector<1x8x512xf32>
    %122 = vector.shape_cast %121 : vector<1x8x512xf32> to vector<8x512xf32>
    %cst_43 = arith.constant dense<0.000000e+00> : vector<8x512xf32>
    %123 = tpu.matmul %117, %3, %cst_43 {dimension_numbers = #tpu.dot_dimension_numbers<[1], [0], [0], [1], [0, 0, 1, 1], [], []>} : vector<8x128xf32>, vector<128x512xf32>, vector<8x512xf32> -> vector<8x512xf32>
    %124 = arith.addf %122, %123 : vector<8x512xf32>
    %125 = vector.extract_strided_slice %124 {offsets = [0, 0], sizes = [8, 384], strides = [1, 1]} : vector<8x512xf32> to vector<8x384xf32>
    %126 = arith.negf %125 : vector<8x384xf32>
    %127 = math.exp %126 : vector<8x384xf32>
    %cst_44 = arith.constant 1.000000e+00 : f32
    %128 = vector.broadcast %cst_44 : f32 to vector<8x384xf32>
    %129 = arith.addf %128, %127 : vector<8x384xf32>
    %130 = arith.divf %128, %129 : vector<8x384xf32>
    %131 = vector.extract_strided_slice %124 {offsets = [0, 384], sizes = [8, 128], strides = [1, 1]} : vector<8x512xf32> to vector<8x128xf32>
    %132 = math.tanh %131 : vector<8x128xf32>
    %133 = vector.extract_strided_slice %130 {offsets = [0, 128], sizes = [8, 128], strides = [1, 1]} : vector<8x384xf32> to vector<8x128xf32>
    %134 = arith.mulf %133, %114 : vector<8x128xf32>
    %135 = vector.extract_strided_slice %130 {offsets = [0, 0], sizes = [8, 128], strides = [1, 1]} : vector<8x384xf32> to vector<8x128xf32>
    %136 = arith.mulf %135, %132 : vector<8x128xf32>
    %137 = arith.addf %134, %136 : vector<8x128xf32>
    %138 = vector.extract_strided_slice %130 {offsets = [0, 256], sizes = [8, 128], strides = [1, 1]} : vector<8x384xf32> to vector<8x128xf32>
    %139 = math.tanh %137 : vector<8x128xf32>
    %140 = arith.mulf %138, %139 : vector<8x128xf32>
    %c5_45 = arith.constant 5 : index
    %c0_46 = arith.constant 0 : index
    %c0_47 = arith.constant 0 : index
    %141 = vector.load %arg6[%c5_45, %c0_46, %c0_47] : memref<8x8x128xf32, #tpu.memory_space<vmem>>, vector<1x8x128xf32>
    %142 = vector.shape_cast %141 : vector<1x8x128xf32> to vector<8x128xf32>
    %143 = vector.shape_cast %140 : vector<8x128xf32> to vector<1x8x128xf32>
    tpu.vector_store %arg6[%c5_45, %c0_46, %c0_47], %143 {strides = array<i32>} : memref<8x8x128xf32, #tpu.memory_space<vmem>>, vector<1x8x128xf32>,
    %c6 = arith.constant 6 : index
    %c0_48 = arith.constant 0 : index
    %c0_49 = arith.constant 0 : index
    %144 = vector.load %arg2[%c6, %c0_48, %c0_49] : memref<8x8x512xf32, #tpu.memory_space<vmem>>, vector<1x8x512xf32>
    %145 = vector.shape_cast %144 : vector<1x8x512xf32> to vector<8x512xf32>
    %cst_50 = arith.constant dense<0.000000e+00> : vector<8x512xf32>
    %146 = tpu.matmul %140, %3, %cst_50 {dimension_numbers = #tpu.dot_dimension_numbers<[1], [0], [0], [1], [0, 0, 1, 1], [], []>} : vector<8x128xf32>, vector<128x512xf32>, vector<8x512xf32> -> vector<8x512xf32>
    %147 = arith.addf %145, %146 : vector<8x512xf32>
    %148 = vector.extract_strided_slice %147 {offsets = [0, 0], sizes = [8, 384], strides = [1, 1]} : vector<8x512xf32> to vector<8x384xf32>
    %149 = arith.negf %148 : vector<8x384xf32>
    %150 = math.exp %149 : vector<8x384xf32>
    %cst_51 = arith.constant 1.000000e+00 : f32
    %151 = vector.broadcast %cst_51 : f32 to vector<8x384xf32>
    %152 = arith.addf %151, %150 : vector<8x384xf32>
    %153 = arith.divf %151, %152 : vector<8x384xf32>
    %154 = vector.extract_strided_slice %147 {offsets = [0, 384], sizes = [8, 128], strides = [1, 1]} : vector<8x512xf32> to vector<8x128xf32>
    %155 = math.tanh %154 : vector<8x128xf32>
    %156 = vector.extract_strided_slice %153 {offsets = [0, 128], sizes = [8, 128], strides = [1, 1]} : vector<8x384xf32> to vector<8x128xf32>
    %157 = arith.mulf %156, %137 : vector<8x128xf32>
    %158 = vector.extract_strided_slice %153 {offsets = [0, 0], sizes = [8, 128], strides = [1, 1]} : vector<8x384xf32> to vector<8x128xf32>
    %159 = arith.mulf %158, %155 : vector<8x128xf32>
    %160 = arith.addf %157, %159 : vector<8x128xf32>
    %161 = vector.extract_strided_slice %153 {offsets = [0, 256], sizes = [8, 128], strides = [1, 1]} : vector<8x384xf32> to vector<8x128xf32>
    %162 = math.tanh %160 : vector<8x128xf32>
    %163 = arith.mulf %161, %162 : vector<8x128xf32>
    %c6_52 = arith.constant 6 : index
    %c0_53 = arith.constant 0 : index
    %c0_54 = arith.constant 0 : index
    %164 = vector.load %arg6[%c6_52, %c0_53, %c0_54] : memref<8x8x128xf32, #tpu.memory_space<vmem>>, vector<1x8x128xf32>
    %165 = vector.shape_cast %164 : vector<1x8x128xf32> to vector<8x128xf32>
    %166 = vector.shape_cast %163 : vector<8x128xf32> to vector<1x8x128xf32>
    tpu.vector_store %arg6[%c6_52, %c0_53, %c0_54], %166 {strides = array<i32>} : memref<8x8x128xf32, #tpu.memory_space<vmem>>, vector<1x8x128xf32>,
    %c7 = arith.constant 7 : index
    %c0_55 = arith.constant 0 : index
    %c0_56 = arith.constant 0 : index
    %167 = vector.load %arg2[%c7, %c0_55, %c0_56] : memref<8x8x512xf32, #tpu.memory_space<vmem>>, vector<1x8x512xf32>
    %168 = vector.shape_cast %167 : vector<1x8x512xf32> to vector<8x512xf32>
    %cst_57 = arith.constant dense<0.000000e+00> : vector<8x512xf32>
    %169 = tpu.matmul %163, %3, %cst_57 {dimension_numbers = #tpu.dot_dimension_numbers<[1], [0], [0], [1], [0, 0, 1, 1], [], []>} : vector<8x128xf32>, vector<128x512xf32>, vector<8x512xf32> -> vector<8x512xf32>
    %170 = arith.addf %168, %169 : vector<8x512xf32>
    %171 = vector.extract_strided_slice %170 {offsets = [0, 0], sizes = [8, 384], strides = [1, 1]} : vector<8x512xf32> to vector<8x384xf32>
    %172 = arith.negf %171 : vector<8x384xf32>
    %173 = math.exp %172 : vector<8x384xf32>
    %cst_58 = arith.constant 1.000000e+00 : f32
    %174 = vector.broadcast %cst_58 : f32 to vector<8x384xf32>
    %175 = arith.addf %174, %173 : vector<8x384xf32>
    %176 = arith.divf %174, %175 : vector<8x384xf32>
    %177 = vector.extract_strided_slice %170 {offsets = [0, 384], sizes = [8, 128], strides = [1, 1]} : vector<8x512xf32> to vector<8x128xf32>
    %178 = math.tanh %177 : vector<8x128xf32>
    %179 = vector.extract_strided_slice %176 {offsets = [0, 128], sizes = [8, 128], strides = [1, 1]} : vector<8x384xf32> to vector<8x128xf32>
    %180 = arith.mulf %179, %160 : vector<8x128xf32>
    %181 = vector.extract_strided_slice %176 {offsets = [0, 0], sizes = [8, 128], strides = [1, 1]} : vector<8x384xf32> to vector<8x128xf32>
    %182 = arith.mulf %181, %178 : vector<8x128xf32>
    %183 = arith.addf %180, %182 : vector<8x128xf32>
    %184 = vector.extract_strided_slice %176 {offsets = [0, 256], sizes = [8, 128], strides = [1, 1]} : vector<8x384xf32> to vector<8x128xf32>
    %185 = math.tanh %183 : vector<8x128xf32>
    %186 = arith.mulf %184, %185 : vector<8x128xf32>
    %c7_59 = arith.constant 7 : index
    %c0_60 = arith.constant 0 : index
    %c0_61 = arith.constant 0 : index
    %187 = vector.load %arg6[%c7_59, %c0_60, %c0_61] : memref<8x8x128xf32, #tpu.memory_space<vmem>>, vector<1x8x128xf32>
    %188 = vector.shape_cast %187 : vector<1x8x128xf32> to vector<8x128xf32>
    %189 = vector.shape_cast %186 : vector<8x128xf32> to vector<1x8x128xf32>
    tpu.vector_store %arg6[%c7_59, %c0_60, %c0_61], %189 {strides = array<i32>} : memref<8x8x128xf32, #tpu.memory_space<vmem>>, vector<1x8x128xf32>,
    %c0_62 = arith.constant 0 : index
    %c0_63 = arith.constant 0 : index
    %190 = vector.load %arg7[%c0_62, %c0_63] : memref<8x128xf32, #tpu.memory_space<vmem>>, vector<8x128xf32>
    tpu.vector_store %arg7[%c0_62, %c0_63], %186 {strides = array<i32>} : memref<8x128xf32, #tpu.memory_space<vmem>>, vector<8x128xf32>,
    %c0_64 = arith.constant 0 : index
    %c0_65 = arith.constant 0 : index
    %191 = vector.load %arg8[%c0_64, %c0_65] : memref<8x128xf32, #tpu.memory_space<vmem>>, vector<8x128xf32>
    tpu.vector_store %arg8[%c0_64, %c0_65], %183 {strides = array<i32>} : memref<8x128xf32, #tpu.memory_space<vmem>>, vector<8x128xf32>,
    return
  }
  func.func @transform_0(%arg0: i32, %arg1: i32) -> (i32, i32, i32) {
    %c0_i32 = arith.constant 0 : i32
    %c0_i32_0 = arith.constant 0 : i32
    return %arg1, %arg0, %c0_i32 : i32, i32, i32
  }
  func.func @transform_1(%arg0: i32, %arg1: i32) -> (i32, i32) {
    %c0_i32 = arith.constant 0 : i32
    %c0_i32_0 = arith.constant 0 : i32
    return %arg0, %c0_i32 : i32, i32
  }
  func.func @transform_2(%arg0: i32, %arg1: i32) -> (i32, i32) {
    %c0_i32 = arith.constant 0 : i32
    %c0_i32_0 = arith.constant 0 : i32
    return %arg0, %c0_i32 : i32, i32
  }
  func.func @transform_3(%arg0: i32, %arg1: i32) -> (i32, i32) {
    %c0_i32 = arith.constant 0 : i32
    %c0_i32_0 = arith.constant 0 : i32
    %c0_i32_1 = arith.constant 0 : i32
    return %c0_i32, %c0_i32_0 : i32, i32
  }
  func.func @transform_4(%arg0: i32, %arg1: i32) -> (i32, i32, i32) {
    %c0_i32 = arith.constant 0 : i32
    %c0_i32_0 = arith.constant 0 : i32
    return %arg1, %arg0, %c0_i32 : i32, i32, i32
  }
  func.func @transform_5(%arg0: i32, %arg1: i32) -> (i32, i32) {
    %c0_i32 = arith.constant 0 : i32
    %c0_i32_0 = arith.constant 0 : i32
    return %arg0, %c0_i32 : i32, i32
  }
  func.func @transform_6(%arg0: i32, %arg1: i32) -> (i32, i32) {
    %c0_i32 = arith.constant 0 : i32
    %c0_i32_0 = arith.constant 0 : i32
    return %arg0, %c0_i32 : i32, i32
  }
}

module attributes {stable_mosaic.version = 11 : i64} {
  func.func @_output_proj_kernel(%arg0: i32, %arg1: i32, %arg2: memref<8x8x128xf32, #tpu.memory_space<vmem>>, %arg3: memref<128x128xf32, #tpu.memory_space<vmem>>, %arg4: memref<1x128xf32, #tpu.memory_space<vmem>>, %arg5: memref<8x8x128xf32, #tpu.memory_space<vmem>>) attributes {dimension_semantics = [#tpu.dimension_semantics<parallel>, #tpu.dimension_semantics<parallel>], iteration_bounds = array<i64: 1, 1>, scalar_prefetch = 0 : i64, scratch_operands = 0 : i64, tpu.core_type = #tpu.core_type<tc>, window_params = [{transform_indices = @transform_0, window_bounds = array<i64: 8, 8, 128>}, {transform_indices = @transform_1, window_bounds = array<i64: 128, 128>}, {transform_indices = @transform_2, window_bounds = array<i64: 1, 128>}, {transform_indices = @transform_3, window_bounds = array<i64: 8, 8, 128>}]} {
    %c0 = arith.constant 0 : index
    %c0_0 = arith.constant 0 : index
    %c0_1 = arith.constant 0 : index
    %0 = vector.load %arg2[%c0, %c0_0, %c0_1] : memref<8x8x128xf32, #tpu.memory_space<vmem>>, vector<8x8x128xf32>
    %1 = vector.shape_cast %0 : vector<8x8x128xf32> to vector<64x128xf32>
    %c0_2 = arith.constant 0 : index
    %c0_3 = arith.constant 0 : index
    %2 = vector.load %arg3[%c0_2, %c0_3] : memref<128x128xf32, #tpu.memory_space<vmem>>, vector<128x128xf32>
    %cst = arith.constant dense<0.000000e+00> : vector<64x128xf32>
    %3 = tpu.matmul %1, %2, %cst {dimension_numbers = #tpu.dot_dimension_numbers<[1], [0], [0], [1], [0, 0, 1, 1], [], []>} : vector<64x128xf32>, vector<128x128xf32>, vector<64x128xf32> -> vector<64x128xf32>
    %c0_4 = arith.constant 0 : index
    %c0_5 = arith.constant 0 : index
    %4 = vector.load %arg4[%c0_4, %c0_5] : memref<1x128xf32, #tpu.memory_space<vmem>>, vector<1x128xf32>
    %5 = vector.broadcast %4 : vector<1x128xf32> to vector<64x128xf32>
    %6 = arith.addf %3, %5 : vector<64x128xf32>
    %7 = vector.shape_cast %6 : vector<64x128xf32> to vector<8x8x128xf32>
    %8 = vector.extract_strided_slice %7 {offsets = [0, 0, 0], sizes = [1, 8, 128], strides = [1, 1, 1]} : vector<8x8x128xf32> to vector<1x8x128xf32>
    %9 = vector.shape_cast %8 : vector<1x8x128xf32> to vector<8x128xf32>
    %c0_6 = arith.constant 0 : index
    %c0_7 = arith.constant 0 : index
    %c0_8 = arith.constant 0 : index
    %10 = vector.load %arg5[%c0_6, %c0_7, %c0_8] : memref<8x8x128xf32, #tpu.memory_space<vmem>>, vector<8x1x128xf32>
    %11 = vector.shape_cast %10 : vector<8x1x128xf32> to vector<8x128xf32>
    %12 = vector.shape_cast %9 : vector<8x128xf32> to vector<8x1x128xf32>
    tpu.vector_store %arg5[%c0_6, %c0_7, %c0_8], %12 {strides = array<i32>} : memref<8x8x128xf32, #tpu.memory_space<vmem>>, vector<8x1x128xf32>,
    %13 = vector.extract_strided_slice %7 {offsets = [1, 0, 0], sizes = [1, 8, 128], strides = [1, 1, 1]} : vector<8x8x128xf32> to vector<1x8x128xf32>
    %14 = vector.shape_cast %13 : vector<1x8x128xf32> to vector<8x128xf32>
    %c0_9 = arith.constant 0 : index
    %c1 = arith.constant 1 : index
    %c0_10 = arith.constant 0 : index
    %15 = vector.load %arg5[%c0_9, %c1, %c0_10] : memref<8x8x128xf32, #tpu.memory_space<vmem>>, vector<8x1x128xf32>
    %16 = vector.shape_cast %15 : vector<8x1x128xf32> to vector<8x128xf32>
    %17 = vector.shape_cast %14 : vector<8x128xf32> to vector<8x1x128xf32>
    tpu.vector_store %arg5[%c0_9, %c1, %c0_10], %17 {strides = array<i32>} : memref<8x8x128xf32, #tpu.memory_space<vmem>>, vector<8x1x128xf32>,
    %18 = vector.extract_strided_slice %7 {offsets = [2, 0, 0], sizes = [1, 8, 128], strides = [1, 1, 1]} : vector<8x8x128xf32> to vector<1x8x128xf32>
    %19 = vector.shape_cast %18 : vector<1x8x128xf32> to vector<8x128xf32>
    %c0_11 = arith.constant 0 : index
    %c2 = arith.constant 2 : index
    %c0_12 = arith.constant 0 : index
    %20 = vector.load %arg5[%c0_11, %c2, %c0_12] : memref<8x8x128xf32, #tpu.memory_space<vmem>>, vector<8x1x128xf32>
    %21 = vector.shape_cast %20 : vector<8x1x128xf32> to vector<8x128xf32>
    %22 = vector.shape_cast %19 : vector<8x128xf32> to vector<8x1x128xf32>
    tpu.vector_store %arg5[%c0_11, %c2, %c0_12], %22 {strides = array<i32>} : memref<8x8x128xf32, #tpu.memory_space<vmem>>, vector<8x1x128xf32>,
    %23 = vector.extract_strided_slice %7 {offsets = [3, 0, 0], sizes = [1, 8, 128], strides = [1, 1, 1]} : vector<8x8x128xf32> to vector<1x8x128xf32>
    %24 = vector.shape_cast %23 : vector<1x8x128xf32> to vector<8x128xf32>
    %c0_13 = arith.constant 0 : index
    %c3 = arith.constant 3 : index
    %c0_14 = arith.constant 0 : index
    %25 = vector.load %arg5[%c0_13, %c3, %c0_14] : memref<8x8x128xf32, #tpu.memory_space<vmem>>, vector<8x1x128xf32>
    %26 = vector.shape_cast %25 : vector<8x1x128xf32> to vector<8x128xf32>
    %27 = vector.shape_cast %24 : vector<8x128xf32> to vector<8x1x128xf32>
    tpu.vector_store %arg5[%c0_13, %c3, %c0_14], %27 {strides = array<i32>} : memref<8x8x128xf32, #tpu.memory_space<vmem>>, vector<8x1x128xf32>,
    %28 = vector.extract_strided_slice %7 {offsets = [4, 0, 0], sizes = [1, 8, 128], strides = [1, 1, 1]} : vector<8x8x128xf32> to vector<1x8x128xf32>
    %29 = vector.shape_cast %28 : vector<1x8x128xf32> to vector<8x128xf32>
    %c0_15 = arith.constant 0 : index
    %c4 = arith.constant 4 : index
    %c0_16 = arith.constant 0 : index
    %30 = vector.load %arg5[%c0_15, %c4, %c0_16] : memref<8x8x128xf32, #tpu.memory_space<vmem>>, vector<8x1x128xf32>
    %31 = vector.shape_cast %30 : vector<8x1x128xf32> to vector<8x128xf32>
    %32 = vector.shape_cast %29 : vector<8x128xf32> to vector<8x1x128xf32>
    tpu.vector_store %arg5[%c0_15, %c4, %c0_16], %32 {strides = array<i32>} : memref<8x8x128xf32, #tpu.memory_space<vmem>>, vector<8x1x128xf32>,
    %33 = vector.extract_strided_slice %7 {offsets = [5, 0, 0], sizes = [1, 8, 128], strides = [1, 1, 1]} : vector<8x8x128xf32> to vector<1x8x128xf32>
    %34 = vector.shape_cast %33 : vector<1x8x128xf32> to vector<8x128xf32>
    %c0_17 = arith.constant 0 : index
    %c5 = arith.constant 5 : index
    %c0_18 = arith.constant 0 : index
    %35 = vector.load %arg5[%c0_17, %c5, %c0_18] : memref<8x8x128xf32, #tpu.memory_space<vmem>>, vector<8x1x128xf32>
    %36 = vector.shape_cast %35 : vector<8x1x128xf32> to vector<8x128xf32>
    %37 = vector.shape_cast %34 : vector<8x128xf32> to vector<8x1x128xf32>
    tpu.vector_store %arg5[%c0_17, %c5, %c0_18], %37 {strides = array<i32>} : memref<8x8x128xf32, #tpu.memory_space<vmem>>, vector<8x1x128xf32>,
    %38 = vector.extract_strided_slice %7 {offsets = [6, 0, 0], sizes = [1, 8, 128], strides = [1, 1, 1]} : vector<8x8x128xf32> to vector<1x8x128xf32>
    %39 = vector.shape_cast %38 : vector<1x8x128xf32> to vector<8x128xf32>
    %c0_19 = arith.constant 0 : index
    %c6 = arith.constant 6 : index
    %c0_20 = arith.constant 0 : index
    %40 = vector.load %arg5[%c0_19, %c6, %c0_20] : memref<8x8x128xf32, #tpu.memory_space<vmem>>, vector<8x1x128xf32>
    %41 = vector.shape_cast %40 : vector<8x1x128xf32> to vector<8x128xf32>
    %42 = vector.shape_cast %39 : vector<8x128xf32> to vector<8x1x128xf32>
    tpu.vector_store %arg5[%c0_19, %c6, %c0_20], %42 {strides = array<i32>} : memref<8x8x128xf32, #tpu.memory_space<vmem>>, vector<8x1x128xf32>,
    %43 = vector.extract_strided_slice %7 {offsets = [7, 0, 0], sizes = [1, 8, 128], strides = [1, 1, 1]} : vector<8x8x128xf32> to vector<1x8x128xf32>
    %44 = vector.shape_cast %43 : vector<1x8x128xf32> to vector<8x128xf32>
    %c0_21 = arith.constant 0 : index
    %c7 = arith.constant 7 : index
    %c0_22 = arith.constant 0 : index
    %45 = vector.load %arg5[%c0_21, %c7, %c0_22] : memref<8x8x128xf32, #tpu.memory_space<vmem>>, vector<8x1x128xf32>
    %46 = vector.shape_cast %45 : vector<8x1x128xf32> to vector<8x128xf32>
    %47 = vector.shape_cast %44 : vector<8x128xf32> to vector<8x1x128xf32>
    tpu.vector_store %arg5[%c0_21, %c7, %c0_22], %47 {strides = array<i32>} : memref<8x8x128xf32, #tpu.memory_space<vmem>>, vector<8x1x128xf32>,
    return
  }
  func.func @transform_0(%arg0: i32, %arg1: i32) -> (i32, i32, i32) {
    %c0_i32 = arith.constant 0 : i32
    %c0_i32_0 = arith.constant 0 : i32
    %c0_i32_1 = arith.constant 0 : i32
    return %arg0, %c0_i32, %c0_i32_0 : i32, i32, i32
  }
  func.func @transform_1(%arg0: i32, %arg1: i32) -> (i32, i32) {
    %c0_i32 = arith.constant 0 : i32
    %c0_i32_0 = arith.constant 0 : i32
    return %c0_i32, %arg1 : i32, i32
  }
  func.func @transform_2(%arg0: i32, %arg1: i32) -> (i32, i32) {
    %c0_i32 = arith.constant 0 : i32
    %c0_i32_0 = arith.constant 0 : i32
    return %c0_i32, %arg1 : i32, i32
  }
  func.func @transform_3(%arg0: i32, %arg1: i32) -> (i32, i32, i32) {
    %c0_i32 = arith.constant 0 : i32
    %c0_i32_0 = arith.constant 0 : i32
    return %c0_i32, %arg0, %arg1 : i32, i32, i32
  }
}

</mosaic_0001>

<bundles_post_ra>
// kernel: encoder_decoder_forward.4
= control target key start
LH: loop header
LB: loop body
LE: loop exit
PB: predicated region body
PF: predicated region fallthrough
CT: control target
= control target key end

     0   :  { %v727_v3 = vmov 0.0   ;;  %s1545_s1 = inlined_call_operand.vmem [shape: f32[128,512], index: 1, kind: input, shape index: {}]   ;;  %s1546_s0 = inlined_call_operand.vmem [shape: f32[8,8,128], index: 0, kind: input, shape index: {}]   ;;  %s1547_s3 = inlined_call_operand.vmem [shape: f32[128,512], index: 3, kind: input, shape index: {}]   ;;  %s1548_s2 = inlined_call_operand.vmem [shape: f32[1,512], index: 2, kind: input, shape index: {}]   ;;  %s1549_s5 = inlined_call_operand.vmem [shape: f32[8,8,512], index: 5, kind: output, shape index: {0}]   ;;  %s1550_s4 = inlined_call_operand.vmem [shape: f32[1,512], index: 4, kind: input, shape index: {}]   ;;  %s1551_s6 = inlined_call_operand.vmem [shape: f32[8,8,512], index: 6, kind: output, shape index: {1}]  }
   0x1   :  { %v91_v0 = vld [vmem:[%s1545_s1 + $0x1e8] sm:$0xff]  ;;  %v93_v1 = vld [vmem:[%s1545_s1 + $0x1f8] sm:$0xff]  ;;  %v90_v2 = vld [vmem:[%s1545_s1 + $0x1e0] sm:$0xff]  ;;  %180 = vmatprep.mubr.f32.mxu0 %v727_v3  ;;  %293 = vmatprep.mubr.f32.mxu1 %v727_v3 }
   0x2   :  { %116 = vmatprep.subr.mxu0 %v91_v0  ;;  %229 = vmatprep.subr.mxu1 %v93_v1  ;;  %v92_v4 = vld [vmem:[%s1545_s1 + $0x1f0] sm:$0xff]  ;;  %v87_v5 = vld [vmem:[%s1545_s1 + $0x1c8] sm:$0xff]  ;;  %v89_v6 = vld [vmem:[%s1545_s1 + $0x1d8] sm:$0xff] }
   0x3   :  { %117 = vmatpush1.msra.mxu0 %v90_v2  ;;  %230 = vmatpush1.msra.mxu1 %v92_v4  ;;  %v86_v7 = vld [vmem:[%s1545_s1 + $0x1c0] sm:$0xff]  ;;  %v88_v8 = vld [vmem:[%s1545_s1 + $0x1d0] sm:$0xff]  ;;  %v83_v9 = vld [vmem:[%s1545_s1 + $0x1a8] sm:$0xff] }
   0x4   :  { %118 = vmatprep.subr.mxu0 %v87_v5  ;;  %231 = vmatprep.subr.mxu1 %v89_v6  ;;  %v85_v10 = vld [vmem:[%s1545_s1 + $0x1b8] sm:$0xff]  ;;  %v82_v11 = vld [vmem:[%s1545_s1 + $0x1a0] sm:$0xff]  ;;  %v84_v12 = vld [vmem:[%s1545_s1 + $0x1b0] sm:$0xff] }
   0x5   :  { %119 = vmatpush1.msra.mxu0 %v86_v7  ;;  %232 = vmatpush1.msra.mxu1 %v88_v8  ;;  %v79_v13 = vld [vmem:[%s1545_s1 + $0x188] sm:$0xff]  ;;  %v81_v14 = vld [vmem:[%s1545_s1 + $0x198] sm:$0xff]  ;;  %v78_v15 = vld [vmem:[%s1545_s1 + $0x180] sm:$0xff] }
   0x6   :  { %120 = vmatprep.subr.mxu0 %v83_v9  ;;  %233 = vmatprep.subr.mxu1 %v85_v10  ;;  %v80_v16 = vld [vmem:[%s1545_s1 + $0x190] sm:$0xff]  ;;  %v75_v17 = vld [vmem:[%s1545_s1 + $0x168] sm:$0xff]  ;;  %v77_v18 = vld [vmem:[%s1545_s1 + $0x178] sm:$0xff] }
   0x7   :  { %121 = vmatpush1.msra.mxu0 %v82_v11  ;;  %234 = vmatpush1.msra.mxu1 %v84_v12  ;;  %v74_v19 = vld [vmem:[%s1545_s1 + $0x160] sm:$0xff]  ;;  %v76_v20 = vld [vmem:[%s1545_s1 + $0x170] sm:$0xff]  ;;  %v71_v21 = vld [vmem:[%s1545_s1 + $0x148] sm:$0xff] }
   0x8   :  { %122 = vmatprep.subr.mxu0 %v79_v13  ;;  %235 = vmatprep.subr.mxu1 %v81_v14  ;;  %v73_v22 = vld [vmem:[%s1545_s1 + $0x158] sm:$0xff]  ;;  %v70_v23 = vld [vmem:[%s1545_s1 + $0x140] sm:$0xff]  ;;  %v72_v24 = vld [vmem:[%s1545_s1 + $0x150] sm:$0xff] }
   0x9   :  { %123 = vmatpush1.msra.mxu0 %v78_v15  ;;  %236 = vmatpush1.msra.mxu1 %v80_v16  ;;  %v67_v25 = vld [vmem:[%s1545_s1 + $0x128] sm:$0xff]  ;;  %v69_v26 = vld [vmem:[%s1545_s1 + $0x138] sm:$0xff]  ;;  %v66_v27 = vld [vmem:[%s1545_s1 + $0x120] sm:$0xff] }
   0xa   :  { %124 = vmatprep.subr.mxu0 %v75_v17  ;;  %237 = vmatprep.subr.mxu1 %v77_v18  ;;  %v68_v28 = vld [vmem:[%s1545_s1 + $0x130] sm:$0xff]  ;;  %v63_v29 = vld [vmem:[%s1545_s1 + $0x108] sm:$0xff]  ;;  %v65_v30 = vld [vmem:[%s1545_s1 + $0x118] sm:$0xff] }
   0xb   :  { %125 = vmatpush1.msra.mxu0 %v74_v19  ;;  %238 = vmatpush1.msra.mxu1 %v76_v20  ;;  %v62_v31 = vld [vmem:[%s1545_s1 + $0x100] sm:$0xff]  ;;  %v64_v32 = vld [vmem:[%s1545_s1 + $0x110] sm:$0xff]  ;;  %v59_v33 = vld [vmem:[%s1545_s1 + $0xe8] sm:$0xff] }
   0xc   :  { %126 = vmatprep.subr.mxu0 %v71_v21  ;;  %239 = vmatprep.subr.mxu1 %v73_v22  ;;  %v61_v34 = vld [vmem:[%s1545_s1 + $0xf8] sm:$0xff]  ;;  %v58_v35 = vld [vmem:[%s1545_s1 + $0xe0] sm:$0xff]  ;;  %v60_v36 = vld [vmem:[%s1545_s1 + $0xf0] sm:$0xff] }
   0xd   :  { %127 = vmatpush1.msra.mxu0 %v70_v23  ;;  %240 = vmatpush1.msra.mxu1 %v72_v24  ;;  %v55_v37 = vld [vmem:[%s1545_s1 + $0xc8] sm:$0xff]  ;;  %v57_v38 = vld [vmem:[%s1545_s1 + $0xd8] sm:$0xff]  ;;  %v54_v39 = vld [vmem:[%s1545_s1 + $0xc0] sm:$0xff] }
   0xe   :  { %128 = vmatprep.subr.mxu0 %v67_v25  ;;  %241 = vmatprep.subr.mxu1 %v69_v26  ;;  %v56_v40 = vld [vmem:[%s1545_s1 + $0xd0] sm:$0xff]  ;;  %v51_v41 = vld [vmem:[%s1545_s1 + $0xa8] sm:$0xff]  ;;  %v53_v42 = vld [vmem:[%s1545_s1 + $0xb8] sm:$0xff] }
   0xf   :  { %129 = vmatpush1.msra.mxu0 %v66_v27  ;;  %242 = vmatpush1.msra.mxu1 %v68_v28  ;;  %v50_v43 = vld [vmem:[%s1545_s1 + $0xa0] sm:$0xff]  ;;  %v52_v44 = vld [vmem:[%s1545_s1 + $0xb0] sm:$0xff]  ;;  %v47_v45 = vld [vmem:[%s1545_s1 + $0x88] sm:$0xff] }
  0x10   :  { %130 = vmatprep.subr.mxu0 %v63_v29  ;;  %243 = vmatprep.subr.mxu1 %v65_v30  ;;  %v49_v46 = vld [vmem:[%s1545_s1 + $0x98] sm:$0xff]  ;;  %v46_v47 = vld [vmem:[%s1545_s1 + $0x80] sm:$0xff]  ;;  %v48_v48 = vld [vmem:[%s1545_s1 + $0x90] sm:$0xff] }
  0x11   :  { %131 = vmatpush1.msra.mxu0 %v62_v31  ;;  %244 = vmatpush1.msra.mxu1 %v64_v32  ;;  %v43_v49 = vld [vmem:[%s1545_s1 + $0x68] sm:$0xff]  ;;  %v45_v50 = vld [vmem:[%s1545_s1 + $0x78] sm:$0xff]  ;;  %v42_v51 = vld [vmem:[%s1545_s1 + $0x60] sm:$0xff] }
  0x12   :  { %132 = vmatprep.subr.mxu0 %v59_v33  ;;  %245 = vmatprep.subr.mxu1 %v61_v34  ;;  %v44_v52 = vld [vmem:[%s1545_s1 + $0x70] sm:$0xff]  ;;  %v39_v53 = vld [vmem:[%s1545_s1 + $0x48] sm:$0xff]  ;;  %v41_v54 = vld [vmem:[%s1545_s1 + $0x58] sm:$0xff] }
  0x13   :  { %133 = vmatpush1.msra.mxu0 %v58_v35  ;;  %246 = vmatpush1.msra.mxu1 %v60_v36  ;;  %v38_v55 = vld [vmem:[%s1545_s1 + $0x40] sm:$0xff]  ;;  %v40_v56 = vld [vmem:[%s1545_s1 + $0x50] sm:$0xff]  ;;  %v35_v57 = vld [vmem:[%s1545_s1 + $0x28] sm:$0xff] }
  0x14   :  { %134 = vmatprep.subr.mxu0 %v55_v37  ;;  %247 = vmatprep.subr.mxu1 %v57_v38  ;;  %v37_v58 = vld [vmem:[%s1545_s1 + $0x38] sm:$0xff]  ;;  %v34_v59 = vld [vmem:[%s1545_s1 + $0x20] sm:$0xff]  ;;  %v36_v60 = vld [vmem:[%s1545_s1 + $0x30] sm:$0xff] }
  0x15   :  { %135 = vmatpush1.msra.mxu0 %v54_v39  ;;  %248 = vmatpush1.msra.mxu1 %v56_v40  ;;  %v31_v61 = vld [vmem:[%s1545_s1 + $0x8] sm:$0xff]  ;;  %v33_v62 = vld [vmem:[%s1545_s1 + $0x18] sm:$0xff]  ;;  %v30_v63 = vld [vmem:[%s1545_s1] sm:$0xff] }
  0x16   :  { %136 = vmatprep.subr.mxu0 %v51_v41  ;;  %249 = vmatprep.subr.mxu1 %v53_v42  ;;  %v32_v0 = vld [vmem:[%s1545_s1 + $0x10] sm:$0xff]  ;;  %v960_v1 = vld [vmem:[%s1546_s0] sm:$0xff]  ;;  %v403_v2 = vld [vmem:[%s1547_s3 + $0x1e8] sm:$0xff] }
  0x17   :  { %137 = vmatpush1.msra.mxu0 %v50_v43  ;;  %250 = vmatpush1.msra.mxu1 %v52_v44  ;;  %v405_v4 = vld [vmem:[%s1547_s3 + $0x1f8] sm:$0xff]  ;;  %v402_v5 = vld [vmem:[%s1547_s3 + $0x1e0] sm:$0xff]  ;;  %v404_v6 = vld [vmem:[%s1547_s3 + $0x1f0] sm:$0xff] }
  0x18   :  { %138 = vmatprep.subr.mxu0 %v47_v45  ;;  %251 = vmatprep.subr.mxu1 %v49_v46  ;;  %v399_v7 = vld [vmem:[%s1547_s3 + $0x1c8] sm:$0xff]  ;;  %v401_v8 = vld [vmem:[%s1547_s3 + $0x1d8] sm:$0xff]  ;;  %v398_v9 = vld [vmem:[%s1547_s3 + $0x1c0] sm:$0xff] }
  0x19   :  { %139 = vmatpush1.msra.mxu0 %v46_v47  ;;  %252 = vmatpush1.msra.mxu1 %v48_v48  ;;  %v400_v10 = vld [vmem:[%s1547_s3 + $0x1d0] sm:$0xff]  ;;  %v991_v11 = vld [vmem:[%s1546_s0 + $0x8] sm:$0xff]  ;;  %v397_v13 = vld [vmem:[%s1547_s3 + $0x1b8] sm:$0xff] }
  0x1a   :  { %140 = vmatprep.subr.mxu0 %v43_v49  ;;  %253 = vmatprep.subr.mxu1 %v45_v50  ;;  %v395_v12 = vld [vmem:[%s1547_s3 + $0x1a8] sm:$0xff]  ;;  %v394_v14 = vld [vmem:[%s1547_s3 + $0x1a0] sm:$0xff]  ;;  %v396_v15 = vld [vmem:[%s1547_s3 + $0x1b0] sm:$0xff] }
  0x1b   :  { %141 = vmatpush1.msra.mxu0 %v42_v51  ;;  %254 = vmatpush1.msra.mxu1 %v44_v52  ;;  %v391_v16 = vld [vmem:[%s1547_s3 + $0x188] sm:$0xff]  ;;  %v393_v17 = vld [vmem:[%s1547_s3 + $0x198] sm:$0xff]  ;;  %v390_v18 = vld [vmem:[%s1547_s3 + $0x180] sm:$0xff] }
  0x1c   :  { %142 = vmatprep.subr.mxu0 %v39_v53  ;;  %255 = vmatprep.subr.mxu1 %v41_v54  ;;  %v392_v19 = vld [vmem:[%s1547_s3 + $0x190] sm:$0xff]  ;;  %v387_v21 = vld [vmem:[%s1547_s3 + $0x168] sm:$0xff]  ;;  %v389_v22 = vld [vmem:[%s1547_s3 + $0x178] sm:$0xff] }
  0x1d   :  { %143 = vmatpush1.msra.mxu0 %v38_v55  ;;  %256 = vmatpush1.msra.mxu1 %v40_v56  ;;  %v1024_v20 = vld [vmem:[%s1546_s0 + $0x10] sm:$0xff]  ;;  %v386_v23 = vld [vmem:[%s1547_s3 + $0x160] sm:$0xff]  ;;  %v383_v25 = vld [vmem:[%s1547_s3 + $0x148] sm:$0xff] }
  0x1e   :  { %144 = vmatprep.subr.mxu0 %v35_v57  ;;  %257 = vmatprep.subr.mxu1 %v37_v58  ;;  %v388_v24 = vld [vmem:[%s1547_s3 + $0x170] sm:$0xff]  ;;  %v385_v26 = vld [vmem:[%s1547_s3 + $0x158] sm:$0xff]  ;;  %v382_v27 = vld [vmem:[%s1547_s3 + $0x140] sm:$0xff] }
  0x1f   :  { %145 = vmatpush1.msra.mxu0 %v34_v59  ;;  %258 = vmatpush1.msra.mxu1 %v36_v60  ;;  %v384_v28 = vld [vmem:[%s1547_s3 + $0x150] sm:$0xff]  ;;  %v1057_v29 = vld [vmem:[%s1546_s0 + $0x18] sm:$0xff]  ;;  %v379_v30 = vld [vmem:[%s1547_s3 + $0x128] sm:$0xff] }
  0x20   :  { %146 = vmatprep.subr.mxu0 %v31_v61  ;;  %259 = vmatprep.subr.mxu1 %v33_v62  ;;  %v381_v31 = vld [vmem:[%s1547_s3 + $0x138] sm:$0xff]  ;;  %v378_v32 = vld [vmem:[%s1547_s3 + $0x120] sm:$0xff]  ;;  %v380_v33 = vld [vmem:[%s1547_s3 + $0x130] sm:$0xff] }
  0x21   :  { %147 = vmatpush1.msra.mxu0 %v30_v63  ;;  %260 = vmatpush1.msra.mxu1 %v32_v0  ;;  %v375_v34 = vld [vmem:[%s1547_s3 + $0x108] sm:$0xff]  ;;  %v377_v35 = vld [vmem:[%s1547_s3 + $0x118] sm:$0xff]  ;;  %v374_v36 = vld [vmem:[%s1547_s3 + $0x100] sm:$0xff] }
  0x22   :  { %181 = vmatmul.mubr.f32.vlgmr.msra.gmra.mxu0 %v960_v1  ;;  %294 = vmatmul.mubr.f32.vlgmr.msra.gmra.mxu1 %v960_v1  ;;  %v376_v37 = vld [vmem:[%s1547_s3 + $0x110] sm:$0xff]  ;;  %v1090_v38 = vld [vmem:[%s1546_s0 + $0x20] sm:$0xff]  ;;  %v371_v39 = vld [vmem:[%s1547_s3 + $0xe8] sm:$0xff] }
  0x23   :  { %428 = vmatprep.subr.mxu0 %v403_v2  ;;  %541 = vmatprep.subr.mxu1 %v405_v4  ;;  %v373_v40 = vld [vmem:[%s1547_s3 + $0xf8] sm:$0xff]  ;;  %v370_v41 = vld [vmem:[%s1547_s3 + $0xe0] sm:$0xff]  ;;  %v372_v42 = vld [vmem:[%s1547_s3 + $0xf0] sm:$0xff] }
  0x24   :  { %429 = vmatpush1.msra.mxu0 %v402_v5  ;;  %542 = vmatpush1.msra.mxu1 %v404_v6  ;;  %v367_v43 = vld [vmem:[%s1547_s3 + $0xc8] sm:$0xff]  ;;  %v369_v44 = vld [vmem:[%s1547_s3 + $0xd8] sm:$0xff]  ;;  %v366_v45 = vld [vmem:[%s1547_s3 + $0xc0] sm:$0xff] }
  0x25   :  { %430 = vmatprep.subr.mxu0 %v399_v7  ;;  %543 = vmatprep.subr.mxu1 %v401_v8  ;;  %v368_v46 = vld [vmem:[%s1547_s3 + $0xd0] sm:$0xff]  ;;  %v1123_v47 = vld [vmem:[%s1546_s0 + $0x28] sm:$0xff]  ;;  %v365_v49 = vld [vmem:[%s1547_s3 + $0xb8] sm:$0xff] }
  0x26   :  { %186 = vmatprep.mubr.f32.mxu0 %v727_v3  ;;  %299 = vmatprep.mubr.f32.mxu1 %v727_v3  ;;  %v363_v48 = vld [vmem:[%s1547_s3 + $0xa8] sm:$0xff]  ;;  %v362_v50 = vld [vmem:[%s1547_s3 + $0xa0] sm:$0xff]  ;;  %v364_v51 = vld [vmem:[%s1547_s3 + $0xb0] sm:$0xff] }
  0x27   :  { %431 = vmatpush1.msra.mxu0 %v398_v9  ;;  %544 = vmatpush1.msra.mxu1 %v400_v10  ;;  %v359_v52 = vld [vmem:[%s1547_s3 + $0x88] sm:$0xff]  ;;  %v361_v53 = vld [vmem:[%s1547_s3 + $0x98] sm:$0xff]  ;;  %v358_v54 = vld [vmem:[%s1547_s3 + $0x80] sm:$0xff] }
  0x28   :  { %187 = vmatmul.mubr.f32.gmra.mxu0 %v991_v11  ;;  %300 = vmatmul.mubr.f32.gmra.mxu1 %v991_v11  ;;  %v360_v55 = vld [vmem:[%s1547_s3 + $0x90] sm:$0xff]  ;;  %v355_v57 = vld [vmem:[%s1547_s3 + $0x68] sm:$0xff]  ;;  %v357_v58 = vld [vmem:[%s1547_s3 + $0x78] sm:$0xff] }
  0x29   :  { %432 = vmatprep.subr.mxu0 %v395_v12  ;;  %545 = vmatprep.subr.mxu1 %v397_v13  ;;  %v1156_v56 = vld [vmem:[%s1546_s0 + $0x30] sm:$0xff]  ;;  %v354_v59 = vld [vmem:[%s1547_s3 + $0x60] sm:$0xff]  ;;  %v351_v61 = vld [vmem:[%s1547_s3 + $0x48] sm:$0xff] }
  0x2a   :  { %433 = vmatpush1.msra.mxu0 %v394_v14  ;;  %546 = vmatpush1.msra.mxu1 %v396_v15  ;;  %v356_v60 = vld [vmem:[%s1547_s3 + $0x70] sm:$0xff]  ;;  %v353_v62 = vld [vmem:[%s1547_s3 + $0x58] sm:$0xff]  ;;  %v350_v63 = vld [vmem:[%s1547_s3 + $0x40] sm:$0xff] }
  0x2b   :  { %434 = vmatprep.subr.mxu0 %v391_v16  ;;  %547 = vmatprep.subr.mxu1 %v393_v17  ;;  %v352_v0 = vld [vmem:[%s1547_s3 + $0x50] sm:$0xff]  ;;  %v29_v2 = vld [vmem:[%s1546_s0 + $0x38] sm:$0xff]  ;;  %v347_v4 = vld [vmem:[%s1547_s3 + $0x28] sm:$0xff] }
  0x2c   :  { %192 = vmatprep.mubr.f32.mxu0 %v727_v3  ;;  %305 = vmatprep.mubr.f32.mxu1 %v727_v3  ;;  %v349_v5 = vld [vmem:[%s1547_s3 + $0x38] sm:$0xff]  ;;  %v346_v6 = vld [vmem:[%s1547_s3 + $0x20] sm:$0xff]  ;;  %v348_v7 = vld [vmem:[%s1547_s3 + $0x30] sm:$0xff] }
  0x2d   :  { %435 = vmatpush1.msra.mxu0 %v390_v18  ;;  %548 = vmatpush1.msra.mxu1 %v392_v19  ;;  %v343_v8 = vld [vmem:[%s1547_s3 + $0x8] sm:$0xff]  ;;  %v345_v9 = vld [vmem:[%s1547_s3 + $0x18] sm:$0xff]  ;;  %v342_v10 = vld [vmem:[%s1547_s3] sm:$0xff] }
  0x2e   :  { %193 = vmatmul.mubr.f32.gmra.mxu0 %v1024_v20  ;;  %306 = vmatmul.mubr.f32.gmra.mxu1 %v1024_v20  ;;  %v344_v12 = vld [vmem:[%s1547_s3 + $0x10] sm:$0xff]  ;;  %v94_v15 = vld [vmem:[%s1548_s2] sm:$0xf] }
  0x2f   :  { %436 = vmatprep.subr.mxu0 %v387_v21  ;;  %549 = vmatprep.subr.mxu1 %v389_v22 }
  0x30   :  { %437 = vmatpush1.msra.mxu0 %v386_v23  ;;  %550 = vmatpush1.msra.mxu1 %v388_v24 }
  0x31   :  { %438 = vmatprep.subr.mxu0 %v383_v25  ;;  %551 = vmatprep.subr.mxu1 %v385_v26 }
  0x32   :  { %198 = vmatprep.mubr.f32.mxu0 %v727_v3  ;;  %311 = vmatprep.mubr.f32.mxu1 %v727_v3 }
  0x33   :  { %439 = vmatpush1.msra.mxu0 %v382_v27  ;;  %552 = vmatpush1.msra.mxu1 %v384_v28 }
  0x34   :  { %199 = vmatmul.mubr.f32.gmra.mxu0 %v1057_v29  ;;  %312 = vmatmul.mubr.f32.gmra.mxu1 %v1057_v29 }
  0x35   :  { %440 = vmatprep.subr.mxu0 %v379_v30  ;;  %553 = vmatprep.subr.mxu1 %v381_v31 }
  0x36   :  { %441 = vmatpush1.msra.mxu0 %v378_v32  ;;  %554 = vmatpush1.msra.mxu1 %v380_v33 }
  0x37   :  { %442 = vmatprep.subr.mxu0 %v375_v34  ;;  %555 = vmatprep.subr.mxu1 %v377_v35 }
  0x38   :  { %204 = vmatprep.mubr.f32.mxu0 %v727_v3  ;;  %317 = vmatprep.mubr.f32.mxu1 %v727_v3 }
  0x39   :  { %443 = vmatpush1.msra.mxu0 %v374_v36  ;;  %556 = vmatpush1.msra.mxu1 %v376_v37 }
  0x3a   :  { %205 = vmatmul.mubr.f32.gmra.mxu0 %v1090_v38  ;;  %318 = vmatmul.mubr.f32.gmra.mxu1 %v1090_v38 }
  0x3b   :  { %444 = vmatprep.subr.mxu0 %v371_v39  ;;  %557 = vmatprep.subr.mxu1 %v373_v40 }
  0x3c   :  { %445 = vmatpush1.msra.mxu0 %v370_v41  ;;  %558 = vmatpush1.msra.mxu1 %v372_v42 }
  0x3d   :  { %446 = vmatprep.subr.mxu0 %v367_v43  ;;  %559 = vmatprep.subr.mxu1 %v369_v44 }
  0x3e   :  { %210 = vmatprep.mubr.f32.mxu0 %v727_v3  ;;  %323 = vmatprep.mubr.f32.mxu1 %v727_v3 }
  0x3f   :  { %447 = vmatpush1.msra.mxu0 %v366_v45  ;;  %560 = vmatpush1.msra.mxu1 %v368_v46 }
  0x40   :  { %211 = vmatmul.mubr.f32.gmra.mxu0 %v1123_v47  ;;  %324 = vmatmul.mubr.f32.gmra.mxu1 %v1123_v47 }
  0x41   :  { %448 = vmatprep.subr.mxu0 %v363_v48  ;;  %561 = vmatprep.subr.mxu1 %v365_v49 }
  0x42   :  { %449 = vmatpush1.msra.mxu0 %v362_v50  ;;  %562 = vmatpush1.msra.mxu1 %v364_v51 }
  0x43   :  { %450 = vmatprep.subr.mxu0 %v359_v52  ;;  %563 = vmatprep.subr.mxu1 %v361_v53 }
  0x44   :  { %216 = vmatprep.mubr.f32.mxu0 %v727_v3  ;;  %329 = vmatprep.mubr.f32.mxu1 %v727_v3 }
  0x45   :  { %451 = vmatpush1.msra.mxu0 %v358_v54  ;;  %564 = vmatpush1.msra.mxu1 %v360_v55 }
  0x46   :  { %217 = vmatmul.mubr.f32.gmra.mxu0 %v1156_v56  ;;  %330 = vmatmul.mubr.f32.gmra.mxu1 %v1156_v56 }
  0x47   :  { %452 = vmatprep.subr.mxu0 %v355_v57  ;;  %565 = vmatprep.subr.mxu1 %v357_v58 }
  0x48   :  { %453 = vmatpush1.msra.mxu0 %v354_v59  ;;  %566 = vmatpush1.msra.mxu1 %v356_v60 }
  0x49   :  { %454 = vmatprep.subr.mxu0 %v351_v61  ;;  %567 = vmatprep.subr.mxu1 %v353_v62 }
  0x4a   :  { %222 = vmatprep.mubr.f32.mxu0 %v727_v3  ;;  %335 = vmatprep.mubr.f32.mxu1 %v727_v3 }
  0x4b   :  { %455 = vmatpush1.msra.mxu0 %v350_v63  ;;  %568 = vmatpush1.msra.mxu1 %v352_v0 }
  0x4c   :  { %223 = vmatmul.mubr.f32.gmra.mxu0 %v29_v2  ;;  %336 = vmatmul.mubr.f32.gmra.mxu1 %v29_v2 }
  0x4d   :  { %456 = vmatprep.subr.mxu0 %v347_v4  ;;  %569 = vmatprep.subr.mxu1 %v349_v5 }
  0x4e   :  { %457 = vmatpush1.msra.mxu0 %v346_v6  ;;  %570 = vmatpush1.msra.mxu1 %v348_v7 }
  0x4f   :  { %458 = vmatprep.subr.mxu0 %v343_v8  ;;  %571 = vmatprep.subr.mxu1 %v345_v9 }
  0x50   :  { %459 = vmatpush1.msra.mxu0 %v342_v10  ;;  %492 = vmatprep.mubr.f32.mxu0 %v727_v3 }
  0x51   :  { %572 = vmatpush1.msra.mxu1 %v344_v12  ;;  %605 = vmatprep.mubr.f32.mxu1 %v727_v3 }
  0x52   :  { %493 = vmatmul.mubr.f32.vlgmr.msra.gmra.mxu0 %v960_v1  ;;  %606 = vmatmul.mubr.f32.vlgmr.msra.gmra.mxu1 %v960_v1  ;;  %v96_v1 = vlaneseq }
  0x53   :  { %498 = vmatprep.mubr.f32.mxu0 %v727_v3  ;;  %611 = vmatprep.mubr.f32.mxu1 %v727_v3 }
  0x56   :  { %499 = vmatmul.mubr.f32.gmra.mxu0 %v991_v11  ;;  %612 = vmatmul.mubr.f32.gmra.mxu1 %v991_v11  ;;  %v1245_v11 = vshrl.u32 %v96_v1, 7 }
  0x57   :  { %504 = vmatprep.mubr.f32.mxu0 %v727_v3  ;;  %617 = vmatprep.mubr.f32.mxu1 %v727_v3 }
  0x58   :  { %v98_v13 = vsub.s32 0, %v1245_v11  ;;  %v106_v14 = vsub.s32 2, %v1245_v11  ;;  %v102_v16 = vsub.s32 1, %v1245_v11  ;;  %v110_v17 = vsub.s32 3, %v1245_v11 }
  0x5a   :  { %505 = vmatmul.mubr.f32.gmra.mxu0 %v1024_v20  ;;  %618 = vmatmul.mubr.f32.gmra.mxu1 %v1024_v20  ;;  %v1260_v18 = vrot.slane %v94_v15, %v106_v14  ;;  %v1264_v19 = vrot.slane %v94_v15, %v102_v16  ;;  %v1268_v20 = vrot.slane %v94_v15, %v110_v17 }
  0x5b   :  { %510 = vmatprep.mubr.f32.mxu0 %v727_v3  ;;  %623 = vmatprep.mubr.f32.mxu1 %v727_v3 }
  0x5e   :  { %511 = vmatmul.mubr.f32.gmra.mxu0 %v1057_v29  ;;  %624 = vmatmul.mubr.f32.gmra.mxu1 %v1057_v29 }
  0x5f   :  { %516 = vmatprep.mubr.f32.mxu0 %v727_v3  ;;  %629 = vmatprep.mubr.f32.mxu1 %v727_v3 }
  0x62   :  { %517 = vmatmul.mubr.f32.gmra.mxu0 %v1090_v38  ;;  %630 = vmatmul.mubr.f32.gmra.mxu1 %v1090_v38 }
  0x63   :  { %522 = vmatprep.mubr.f32.mxu0 %v727_v3  ;;  %635 = vmatprep.mubr.f32.mxu1 %v727_v3 }
  0x66   :  { %523 = vmatmul.mubr.f32.gmra.mxu0 %v1123_v47  ;;  %636 = vmatmul.mubr.f32.gmra.mxu1 %v1123_v47 }
  0x67   :  { %528 = vmatprep.mubr.f32.mxu0 %v727_v3  ;;  %641 = vmatprep.mubr.f32.mxu1 %v727_v3 }
  0x6a   :  { %529 = vmatmul.mubr.f32.gmra.mxu0 %v1156_v56  ;;  %642 = vmatmul.mubr.f32.gmra.mxu1 %v1156_v56 }
  0x6b   :  { %534 = vmatprep.mubr.f32.mxu0 %v727_v3  ;;  %647 = vmatprep.mubr.f32.mxu1 %v727_v3  ;;  %v1256_v3 = vrot.slane %v94_v15, %v98_v13 }
  0x6e   :  { %535 = vmatmul.mubr.f32.gmra.mxu0 %v29_v2  ;;  %648 = vmatmul.mubr.f32.gmra.mxu1 %v29_v2 }
  0xe2   :  { %v182_v21 = vpop.f32.mrf.mxu0  ;;  %v295_v22 = vpop.f32.mrf.mxu1 }
  0xe3   :  { %v183_v23 = vadd.f32 %v182_v21, %v1256_v3  ;;  %v296_v24 = vadd.f32 %v295_v22, %v1260_v18 }
  0xe4   :  { %v184_v25 = vpop.f32.mrf.mxu0  ;;  %v297_v26 = vpop.f32.mrf.mxu1 }
  0xe5   :  { %654 = vst [vmem:[%s1549_s5] sm:$0xff] %v183_v23  ;;  %656 = vst [vmem:[%s1549_s5 + $0x10] sm:$0xff] %v296_v24  ;;  %v185_v27 = vadd.f32 %v184_v25, %v1264_v19  ;;  %v298_v28 = vadd.f32 %v297_v26, %v1268_v20  ;;  %v406_v24 = vld [vmem:[%s1550_s4] sm:$0xf] }
  0xe7   :  { %655 = vst [vmem:[%s1549_s5 + $0x8] sm:$0xff] %v185_v27  ;;  %657 = vst [vmem:[%s1549_s5 + $0x18] sm:$0xff] %v298_v28 }
  0xe8   :  { %v188_v29 = vpop.f32.mrf.mxu0  ;;  %v301_v30 = vpop.f32.mrf.mxu1 }
  0xe9   :  { %v189_v31 = vadd.f32 %v188_v29, %v1256_v3  ;;  %v302_v32 = vadd.f32 %v301_v30, %v1260_v18 }
  0xea   :  { %v190_v33 = vpop.f32.mrf.mxu0  ;;  %v303_v34 = vpop.f32.mrf.mxu1 }
  0xeb   :  { %658 = vst [vmem:[%s1549_s5 + $0x20] sm:$0xff] %v189_v31  ;;  %660 = vst [vmem:[%s1549_s5 + $0x30] sm:$0xff] %v302_v32  ;;  %v191_v35 = vadd.f32 %v190_v33, %v1264_v19  ;;  %v304_v36 = vadd.f32 %v303_v34, %v1268_v20  ;;  %v1397_v31 = vrot.slane %v406_v24, %v98_v13 }
  0xec   :  { %v1415_v13 = vrot.slane %v406_v24, %v110_v17 }
  0xed   :  { %659 = vst [vmem:[%s1549_s5 + $0x28] sm:$0xff] %v191_v35  ;;  %661 = vst [vmem:[%s1549_s5 + $0x38] sm:$0xff] %v304_v36 }
  0xee   :  { %v194_v37 = vpop.f32.mrf.mxu0  ;;  %v307_v38 = vpop.f32.mrf.mxu1 }
  0xef   :  { %v195_v39 = vadd.f32 %v194_v37, %v1256_v3  ;;  %v308_v40 = vadd.f32 %v307_v38, %v1260_v18 }
  0xf0   :  { %v196_v41 = vpop.f32.mrf.mxu0  ;;  %v309_v42 = vpop.f32.mrf.mxu1 }
  0xf1   :  { %662 = vst [vmem:[%s1549_s5 + $0x40] sm:$0xff] %v195_v39  ;;  %664 = vst [vmem:[%s1549_s5 + $0x50] sm:$0xff] %v308_v40  ;;  %v197_v43 = vadd.f32 %v196_v41, %v1264_v19  ;;  %v310_v44 = vadd.f32 %v309_v42, %v1268_v20 }
  0xf3   :  { %663 = vst [vmem:[%s1549_s5 + $0x48] sm:$0xff] %v197_v43  ;;  %665 = vst [vmem:[%s1549_s5 + $0x58] sm:$0xff] %v310_v44 }
  0xf4   :  { %v200_v45 = vpop.f32.mrf.mxu0  ;;  %v313_v46 = vpop.f32.mrf.mxu1 }
  0xf5   :  { %v201_v47 = vadd.f32 %v200_v45, %v1256_v3  ;;  %v314_v48 = vadd.f32 %v313_v46, %v1260_v18 }
  0xf6   :  { %v202_v49 = vpop.f32.mrf.mxu0  ;;  %v315_v50 = vpop.f32.mrf.mxu1 }
  0xf7   :  { %666 = vst [vmem:[%s1549_s5 + $0x60] sm:$0xff] %v201_v47  ;;  %668 = vst [vmem:[%s1549_s5 + $0x70] sm:$0xff] %v314_v48  ;;  %v203_v51 = vadd.f32 %v202_v49, %v1264_v19  ;;  %v316_v52 = vadd.f32 %v315_v50, %v1268_v20 }
  0xf9   :  { %667 = vst [vmem:[%s1549_s5 + $0x68] sm:$0xff] %v203_v51  ;;  %669 = vst [vmem:[%s1549_s5 + $0x78] sm:$0xff] %v316_v52 }
  0xfa   :  { %v206_v53 = vpop.f32.mrf.mxu0  ;;  %v319_v54 = vpop.f32.mrf.mxu1 }
  0xfb   :  { %v207_v55 = vadd.f32 %v206_v53, %v1256_v3  ;;  %v320_v56 = vadd.f32 %v319_v54, %v1260_v18 }
  0xfc   :  { %v208_v57 = vpop.f32.mrf.mxu0  ;;  %v321_v58 = vpop.f32.mrf.mxu1 }
  0xfd   :  { %670 = vst [vmem:[%s1549_s5 + $0x80] sm:$0xff] %v207_v55  ;;  %672 = vst [vmem:[%s1549_s5 + $0x90] sm:$0xff] %v320_v56  ;;  %v209_v59 = vadd.f32 %v208_v57, %v1264_v19  ;;  %v322_v60 = vadd.f32 %v321_v58, %v1268_v20 }
  0xff   :  { %671 = vst [vmem:[%s1549_s5 + $0x88] sm:$0xff] %v209_v59  ;;  %673 = vst [vmem:[%s1549_s5 + $0x98] sm:$0xff] %v322_v60 }
 0x100   :  { %v212_v61 = vpop.f32.mrf.mxu0  ;;  %v325_v62 = vpop.f32.mrf.mxu1 }
 0x101   :  { %v213_v63 = vadd.f32 %v212_v61, %v1256_v3  ;;  %v326_v0 = vadd.f32 %v325_v62, %v1260_v18 }
 0x102   :  { %v214_v2 = vpop.f32.mrf.mxu0  ;;  %v327_v4 = vpop.f32.mrf.mxu1 }
 0x103   :  { %674 = vst [vmem:[%s1549_s5 + $0xa0] sm:$0xff] %v213_v63  ;;  %676 = vst [vmem:[%s1549_s5 + $0xb0] sm:$0xff] %v326_v0  ;;  %v215_v5 = vadd.f32 %v214_v2, %v1264_v19  ;;  %v328_v6 = vadd.f32 %v327_v4, %v1268_v20 }
 0x105   :  { %675 = vst [vmem:[%s1549_s5 + $0xa8] sm:$0xff] %v215_v5  ;;  %677 = vst [vmem:[%s1549_s5 + $0xb8] sm:$0xff] %v328_v6 }
 0x106   :  { %v218_v7 = vpop.f32.mrf.mxu0  ;;  %v331_v8 = vpop.f32.mrf.mxu1 }
 0x107   :  { %v219_v9 = vadd.f32 %v218_v7, %v1256_v3  ;;  %v332_v10 = vadd.f32 %v331_v8, %v1260_v18 }
 0x108   :  { %v220_v12 = vpop.f32.mrf.mxu0  ;;  %v333_v1 = vpop.f32.mrf.mxu1 }
 0x109   :  { %678 = vst [vmem:[%s1549_s5 + $0xc0] sm:$0xff] %v219_v9  ;;  %680 = vst [vmem:[%s1549_s5 + $0xd0] sm:$0xff] %v332_v10  ;;  %v221_v15 = vadd.f32 %v220_v12, %v1264_v19  ;;  %v334_v21 = vadd.f32 %v333_v1, %v1268_v20 }
 0x10b   :  { %679 = vst [vmem:[%s1549_s5 + $0xc8] sm:$0xff] %v221_v15  ;;  %681 = vst [vmem:[%s1549_s5 + $0xd8] sm:$0xff] %v334_v21 }
 0x10c   :  { %v224_v22 = vpop.f32.mrf.mxu0  ;;  %v337_v23 = vpop.f32.mrf.mxu1 }
 0x10d   :  { %v225_v25 = vadd.f32 %v224_v22, %v1256_v3  ;;  %v338_v26 = vadd.f32 %v337_v23, %v1260_v18  ;;  %v1401_v3 = vrot.slane %v406_v24, %v106_v14  ;;  %v1411_v18 = vrot.slane %v406_v24, %v102_v16 }
 0x10e   :  { %v226_v27 = vpop.f32.mrf.mxu0  ;;  %v339_v28 = vpop.f32.mrf.mxu1 }
 0x10f   :  { %682 = vst [vmem:[%s1549_s5 + $0xe0] sm:$0xff] %v225_v25  ;;  %684 = vst [vmem:[%s1549_s5 + $0xf0] sm:$0xff] %v338_v26  ;;  %v227_v29 = vadd.f32 %v226_v27, %v1264_v19  ;;  %v340_v30 = vadd.f32 %v339_v28, %v1268_v20 }
 0x111   :  { %683 = vst [vmem:[%s1549_s5 + $0xe8] sm:$0xff] %v227_v29  ;;  %685 = vst [vmem:[%s1549_s5 + $0xf8] sm:$0xff] %v340_v30 }
 0x112   :  { %v494_v19 = vpop.f32.mrf.mxu0  ;;  %v607_v20 = vpop.f32.mrf.mxu1 }
 0x113   :  { %v495_v14 = vadd.f32 %v494_v19, %v1397_v31  ;;  %v608_v32 = vadd.f32 %v607_v20, %v1401_v3 }
 0x114   :  { %v496_v33 = vpop.f32.mrf.mxu0  ;;  %v609_v34 = vpop.f32.mrf.mxu1 }
 0x115   :  { %686 = vst [vmem:[%s1551_s6] sm:$0xff] %v495_v14  ;;  %688 = vst [vmem:[%s1551_s6 + $0x10] sm:$0xff] %v608_v32  ;;  %v497_v11 = vadd.f32 %v496_v33, %v1411_v18  ;;  %v610_v16 = vadd.f32 %v609_v34, %v1415_v13 }
 0x116   :  { %v500_v17 = vpop.f32.mrf.mxu0  ;;  %v613_v35 = vpop.f32.mrf.mxu1 }
 0x117   :  { %687 = vst [vmem:[%s1551_s6 + $0x8] sm:$0xff] %v497_v11  ;;  %689 = vst [vmem:[%s1551_s6 + $0x18] sm:$0xff] %v610_v16  ;;  %v501_v36 = vadd.f32 %v500_v17, %v1397_v31  ;;  %v614_v37 = vadd.f32 %v613_v35, %v1401_v3 }
 0x118   :  { %v502_v38 = vpop.f32.mrf.mxu0  ;;  %v615_v39 = vpop.f32.mrf.mxu1 }
 0x119   :  { %690 = vst [vmem:[%s1551_s6 + $0x20] sm:$0xff] %v501_v36  ;;  %692 = vst [vmem:[%s1551_s6 + $0x30] sm:$0xff] %v614_v37  ;;  %v503_v40 = vadd.f32 %v502_v38, %v1411_v18  ;;  %v616_v41 = vadd.f32 %v615_v39, %v1415_v13 }
 0x11a   :  { %v506_v42 = vpop.f32.mrf.mxu0  ;;  %v619_v43 = vpop.f32.mrf.mxu1 }
 0x11b   :  { %691 = vst [vmem:[%s1551_s6 + $0x28] sm:$0xff] %v503_v40  ;;  %693 = vst [vmem:[%s1551_s6 + $0x38] sm:$0xff] %v616_v41  ;;  %v507_v44 = vadd.f32 %v506_v42, %v1397_v31  ;;  %v620_v45 = vadd.f32 %v619_v43, %v1401_v3 }
 0x11c   :  { %v508_v46 = vpop.f32.mrf.mxu0  ;;  %v621_v47 = vpop.f32.mrf.mxu1 }
 0x11d   :  { %694 = vst [vmem:[%s1551_s6 + $0x40] sm:$0xff] %v507_v44  ;;  %696 = vst [vmem:[%s1551_s6 + $0x50] sm:$0xff] %v620_v45  ;;  %v509_v48 = vadd.f32 %v508_v46, %v1411_v18  ;;  %v622_v49 = vadd.f32 %v621_v47, %v1415_v13 }
 0x11e   :  { %v512_v50 = vpop.f32.mrf.mxu0  ;;  %v625_v51 = vpop.f32.mrf.mxu1 }
 0x11f   :  { %695 = vst [vmem:[%s1551_s6 + $0x48] sm:$0xff] %v509_v48  ;;  %697 = vst [vmem:[%s1551_s6 + $0x58] sm:$0xff] %v622_v49  ;;  %v513_v52 = vadd.f32 %v512_v50, %v1397_v31  ;;  %v626_v53 = vadd.f32 %v625_v51, %v1401_v3 }
 0x120   :  { %v514_v54 = vpop.f32.mrf.mxu0  ;;  %v627_v55 = vpop.f32.mrf.mxu1 }
 0x121   :  { %698 = vst [vmem:[%s1551_s6 + $0x60] sm:$0xff] %v513_v52  ;;  %700 = vst [vmem:[%s1551_s6 + $0x70] sm:$0xff] %v626_v53  ;;  %v515_v56 = vadd.f32 %v514_v54, %v1411_v18  ;;  %v628_v57 = vadd.f32 %v627_v55, %v1415_v13 }
 0x122   :  { %v518_v58 = vpop.f32.mrf.mxu0  ;;  %v631_v59 = vpop.f32.mrf.mxu1 }
 0x123   :  { %699 = vst [vmem:[%s1551_s6 + $0x68] sm:$0xff] %v515_v56  ;;  %701 = vst [vmem:[%s1551_s6 + $0x78] sm:$0xff] %v628_v57  ;;  %v519_v60 = vadd.f32 %v518_v58, %v1397_v31  ;;  %v632_v61 = vadd.f32 %v631_v59, %v1401_v3 }
 0x124   :  { %v520_v62 = vpop.f32.mrf.mxu0  ;;  %v633_v63 = vpop.f32.mrf.mxu1 }
 0x125   :  { %702 = vst [vmem:[%s1551_s6 + $0x80] sm:$0xff] %v519_v60  ;;  %704 = vst [vmem:[%s1551_s6 + $0x90] sm:$0xff] %v632_v61  ;;  %v521_v0 = vadd.f32 %v520_v62, %v1411_v18  ;;  %v634_v2 = vadd.f32 %v633_v63, %v1415_v13 }
 0x126   :  { %v524_v4 = vpop.f32.mrf.mxu0  ;;  %v637_v5 = vpop.f32.mrf.mxu1 }
 0x127   :  { %703 = vst [vmem:[%s1551_s6 + $0x88] sm:$0xff] %v521_v0  ;;  %705 = vst [vmem:[%s1551_s6 + $0x98] sm:$0xff] %v634_v2  ;;  %v525_v6 = vadd.f32 %v524_v4, %v1397_v31  ;;  %v638_v7 = vadd.f32 %v637_v5, %v1401_v3 }
 0x128   :  { %v526_v8 = vpop.f32.mrf.mxu0  ;;  %v639_v9 = vpop.f32.mrf.mxu1 }
 0x129   :  { %706 = vst [vmem:[%s1551_s6 + $0xa0] sm:$0xff] %v525_v6  ;;  %708 = vst [vmem:[%s1551_s6 + $0xb0] sm:$0xff] %v638_v7  ;;  %v527_v10 = vadd.f32 %v526_v8, %v1411_v18  ;;  %v640_v12 = vadd.f32 %v639_v9, %v1415_v13 }
 0x12a   :  { %v530_v1 = vpop.f32.mrf.mxu0  ;;  %v643_v15 = vpop.f32.mrf.mxu1 }
 0x12b   :  { %707 = vst [vmem:[%s1551_s6 + $0xa8] sm:$0xff] %v527_v10  ;;  %709 = vst [vmem:[%s1551_s6 + $0xb8] sm:$0xff] %v640_v12  ;;  %v531_v21 = vadd.f32 %v530_v1, %v1397_v31  ;;  %v644_v22 = vadd.f32 %v643_v15, %v1401_v3 }
 0x12c   :  { %v532_v23 = vpop.f32.mrf.mxu0  ;;  %v645_v24 = vpop.f32.mrf.mxu1 }
 0x12d   :  { %710 = vst [vmem:[%s1551_s6 + $0xc0] sm:$0xff] %v531_v21  ;;  %712 = vst [vmem:[%s1551_s6 + $0xd0] sm:$0xff] %v644_v22  ;;  %v533_v25 = vadd.f32 %v532_v23, %v1411_v18  ;;  %v646_v26 = vadd.f32 %v645_v24, %v1415_v13 }
 0x12e   :  { %v536_v27 = vpop.f32.mrf.mxu0  ;;  %v649_v28 = vpop.f32.mrf.mxu1 }
 0x12f   :  { %711 = vst [vmem:[%s1551_s6 + $0xc8] sm:$0xff] %v533_v25  ;;  %713 = vst [vmem:[%s1551_s6 + $0xd8] sm:$0xff] %v646_v26  ;;  %v537_v29 = vadd.f32 %v536_v27, %v1397_v31  ;;  %v650_v30 = vadd.f32 %v649_v28, %v1401_v3 }
 0x130   :  { %v538_v19 = vpop.f32.mrf.mxu0  ;;  %v651_v20 = vpop.f32.mrf.mxu1 }
 0x131   :  { %714 = vst [vmem:[%s1551_s6 + $0xe0] sm:$0xff] %v537_v29  ;;  %716 = vst [vmem:[%s1551_s6 + $0xf0] sm:$0xff] %v650_v30  ;;  %v539_v14 = vadd.f32 %v538_v19, %v1411_v18  ;;  %v652_v32 = vadd.f32 %v651_v20, %v1415_v13 }
 0x133   :  { %715 = vst [vmem:[%s1551_s6 + $0xe8] sm:$0xff] %v539_v14  ;;  %717 = vst [vmem:[%s1551_s6 + $0xf8] sm:$0xff] %v652_v32 }

// kernel: encoder_decoder_forward.5
= control target key start
LH: loop header
LB: loop body
LE: loop exit
PB: predicated region body
PF: predicated region fallthrough
CT: control target
= control target key end

     0   :  { %v3084_v3 = vmov 0.0   ;;  %s3078_s3 = inlined_call_operand.vmem [shape: f32[128,512], index: 3, kind: input, shape index: {}]   ;;  %s3079_s1 = inlined_call_operand.vmem [shape: f32[8,128], index: 1, kind: input, shape index: {}, may-alias: {1,2}]   ;;  %s3080_s0 = inlined_call_operand.vmem [shape: f32[8,8,512], index: 0, kind: input, shape index: {}]   ;;  %s3081_s2 = inlined_call_operand.vmem [shape: f32[8,128], index: 2, kind: input, shape index: {}, may-alias: {1,2}]   ;;  %s3082_s5 = inlined_call_operand.vmem [shape: f32[8,128], index: 5, kind: output, shape index: {1}]   ;;  %s3083_s4 = inlined_call_operand.vmem [shape: f32[8,128], index: 4, kind: output, shape index: {0}]  }
   0x1   :  { %v1781_v0 = vld [vmem:[%s3078_s3 + $0x1e8] sm:$0xff]  ;;  %v1786_v1 = vld [vmem:[%s3078_s3 + $0x1e0] sm:$0xff]  ;;  %161 = vmatprep.mubr.f32.mxu0 %v3084_v3  ;;  %232 = vmatprep.mubr.f32.mxu1 %v3084_v3  ;;  %v1828_v9 = vld [vmem:[%s3078_s3 + $0x1f8] sm:$0xff] }
   0x2   :  { %3149 = vst [vmem:[#allocation2_spill] sm:$0xff] %v1781_v0  ;;  %v1791_v2 = vld [vmem:[%s3078_s3 + $0x1c8] sm:$0xff]  ;;  %97 = vmatprep.subr.mxu0 %v1781_v0  ;;  %v1799_v4 = vld [vmem:[%s3078_s3 + $0x1c0] sm:$0xff]  ;;  %3150 = vst [vmem:[#allocation3_spill] sm:$0xff] %v1828_v9  ;;  %168 = vmatprep.subr.mxu1 %v1828_v9 }
   0x3   :  { %98 = vmatpush1.msra.mxu0 %v1786_v1  ;;  %v1805_v5 = vld [vmem:[%s3078_s3 + $0x1a8] sm:$0xff]  ;;  %v1811_v6 = vld [vmem:[%s3078_s3 + $0x1a0] sm:$0xff]  ;;  %v1840_v11 = vld [vmem:[%s3078_s3 + $0x1f0] sm:$0xff] }
   0x4   :  { %99 = vmatprep.subr.mxu0 %v1791_v2  ;;  %v1817_v7 = vld [vmem:[%s3078_s3 + $0x188] sm:$0xff]  ;;  %v1823_v8 = vld [vmem:[%s3078_s3 + $0x180] sm:$0xff]  ;;  %169 = vmatpush1.msra.mxu1 %v1840_v11  ;;  %v1852_v13 = vld [vmem:[%s3078_s3 + $0x1d8] sm:$0xff] }
   0x5   :  { %100 = vmatpush1.msra.mxu0 %v1799_v4  ;;  %v1834_v10 = vld [vmem:[%s3078_s3 + $0x168] sm:$0xff]  ;;  %v1846_v12 = vld [vmem:[%s3078_s3 + $0x160] sm:$0xff]  ;;  %v1857_v14 = vld [vmem:[%s3078_s3 + $0x1d0] sm:$0xff]  ;;  %170 = vmatprep.subr.mxu1 %v1852_v13 }
   0x6   :  { %101 = vmatprep.subr.mxu0 %v1805_v5  ;;  %v1863_v15 = vld [vmem:[%s3078_s3 + $0x148] sm:$0xff]  ;;  %v1869_v16 = vld [vmem:[%s3078_s3 + $0x1b8] sm:$0xff]  ;;  %v1875_v17 = vld [vmem:[%s3078_s3 + $0x140] sm:$0xff]  ;;  %171 = vmatpush1.msra.mxu1 %v1857_v14 }
   0x7   :  { %102 = vmatpush1.msra.mxu0 %v1811_v6  ;;  %v1881_v18 = vld [vmem:[%s3078_s3 + $0x1b0] sm:$0xff]  ;;  %v1886_v19 = vld [vmem:[%s3078_s3 + $0x198] sm:$0xff]  ;;  %v1892_v20 = vld [vmem:[%s3078_s3 + $0x128] sm:$0xff]  ;;  %172 = vmatprep.subr.mxu1 %v1869_v16 }
   0x8   :  { %103 = vmatprep.subr.mxu0 %v1817_v7  ;;  %v1898_v21 = vld [vmem:[%s3078_s3 + $0x190] sm:$0xff]  ;;  %v1904_v22 = vld [vmem:[%s3078_s3 + $0x120] sm:$0xff]  ;;  %173 = vmatpush1.msra.mxu1 %v1881_v18  ;;  %v1910_v23 = vld [vmem:[%s3078_s3 + $0x178] sm:$0xff] }
   0x9   :  { %104 = vmatpush1.msra.mxu0 %v1823_v8  ;;  %v1916_v24 = vld [vmem:[%s3078_s3 + $0x108] sm:$0xff]  ;;  %174 = vmatprep.subr.mxu1 %v1886_v19  ;;  %v1922_v25 = vld [vmem:[%s3078_s3 + $0x170] sm:$0xff]  ;;  %v1928_v26 = vld [vmem:[%s3078_s3 + $0x100] sm:$0xff] }
   0xa   :  { %105 = vmatprep.subr.mxu0 %v1834_v10  ;;  %175 = vmatpush1.msra.mxu1 %v1898_v21  ;;  %v1934_v27 = vld [vmem:[%s3078_s3 + $0x158] sm:$0xff]  ;;  %v1940_v28 = vld [vmem:[%s3078_s3 + $0xe8] sm:$0xff]  ;;  %v1946_v29 = vld [vmem:[%s3078_s3 + $0x150] sm:$0xff] }
   0xb   :  { %106 = vmatpush1.msra.mxu0 %v1846_v12  ;;  %176 = vmatprep.subr.mxu1 %v1910_v23  ;;  %v1952_v30 = vld [vmem:[%s3078_s3 + $0xe0] sm:$0xff]  ;;  %v1958_v31 = vld [vmem:[%s3078_s3 + $0x138] sm:$0xff]  ;;  %v1964_v32 = vld [vmem:[%s3078_s3 + $0xc8] sm:$0xff] }
   0xc   :  { %107 = vmatprep.subr.mxu0 %v1863_v15  ;;  %177 = vmatpush1.msra.mxu1 %v1922_v25  ;;  %v1970_v33 = vld [vmem:[%s3078_s3 + $0x130] sm:$0xff]  ;;  %v1976_v34 = vld [vmem:[%s3078_s3 + $0xc0] sm:$0xff]  ;;  %v1982_v35 = vld [vmem:[%s3078_s3 + $0x118] sm:$0xff] }
   0xd   :  { %108 = vmatpush1.msra.mxu0 %v1875_v17  ;;  %178 = vmatprep.subr.mxu1 %v1934_v27  ;;  %v1988_v36 = vld [vmem:[%s3078_s3 + $0xa8] sm:$0xff]  ;;  %v1994_v37 = vld [vmem:[%s3078_s3 + $0x110] sm:$0xff]  ;;  %v2000_v38 = vld [vmem:[%s3078_s3 + $0xa0] sm:$0xff] }
   0xe   :  { %109 = vmatprep.subr.mxu0 %v1892_v20  ;;  %179 = vmatpush1.msra.mxu1 %v1946_v29  ;;  %v2006_v39 = vld [vmem:[%s3078_s3 + $0xf8] sm:$0xff]  ;;  %v2012_v40 = vld [vmem:[%s3078_s3 + $0x88] sm:$0xff]  ;;  %v2018_v41 = vld [vmem:[%s3078_s3 + $0xf0] sm:$0xff] }
   0xf   :  { %110 = vmatpush1.msra.mxu0 %v1904_v22  ;;  %180 = vmatprep.subr.mxu1 %v1958_v31  ;;  %v2024_v42 = vld [vmem:[%s3078_s3 + $0x80] sm:$0xff]  ;;  %v2030_v43 = vld [vmem:[%s3078_s3 + $0xd8] sm:$0xff]  ;;  %v2036_v44 = vld [vmem:[%s3078_s3 + $0x68] sm:$0xff] }
  0x10   :  { %111 = vmatprep.subr.mxu0 %v1916_v24  ;;  %181 = vmatpush1.msra.mxu1 %v1970_v33  ;;  %3151 = vst [vmem:[#allocation4_spill] sm:$0xff] %v2036_v44  ;;  %v2042_v45 = vld [vmem:[%s3078_s3 + $0xd0] sm:$0xff]  ;;  %v2048_v46 = vld [vmem:[%s3078_s3 + $0x60] sm:$0xff]  ;;  %v2054_v47 = vld [vmem:[%s3078_s3 + $0xb8] sm:$0xff] }
  0x11   :  { %112 = vmatpush1.msra.mxu0 %v1928_v26  ;;  %182 = vmatprep.subr.mxu1 %v1982_v35  ;;  %3152 = vst [vmem:[#allocation5_spill] sm:$0xff] %v2048_v46  ;;  %v2060_v48 = vld [vmem:[%s3078_s3 + $0x48] sm:$0xff]  ;;  %v2066_v49 = vld [vmem:[%s3078_s3 + $0xb0] sm:$0xff]  ;;  %v2072_v50 = vld [vmem:[%s3078_s3 + $0x40] sm:$0xff] }
  0x12   :  { %113 = vmatprep.subr.mxu0 %v1940_v28  ;;  %183 = vmatpush1.msra.mxu1 %v1994_v37  ;;  %3153 = vst [vmem:[#allocation6_spill] sm:$0xff] %v2060_v48  ;;  %3154 = vst [vmem:[#allocation7_spill] sm:$0xff] %v2072_v50  ;;  %v2078_v51 = vld [vmem:[%s3078_s3 + $0x98] sm:$0xff]  ;;  %v2084_v52 = vld [vmem:[%s3078_s3 + $0x28] sm:$0xff] }
  0x13   :  { %114 = vmatpush1.msra.mxu0 %v1952_v30  ;;  %184 = vmatprep.subr.mxu1 %v2006_v39  ;;  %3155 = vst [vmem:[#allocation8_spill] sm:$0xff] %v2084_v52  ;;  %v2090_v53 = vld [vmem:[%s3078_s3 + $0x90] sm:$0xff]  ;;  %v2096_v54 = vld [vmem:[%s3078_s3 + $0x20] sm:$0xff]  ;;  %v2102_v55 = vld [vmem:[%s3078_s3 + $0x78] sm:$0xff] }
  0x14   :  { %115 = vmatprep.subr.mxu0 %v1964_v32  ;;  %185 = vmatpush1.msra.mxu1 %v2018_v41  ;;  %3156 = vst [vmem:[#allocation9_spill] sm:$0xff] %v2096_v54  ;;  %3157 = vst [vmem:[#allocation10_spill] sm:$0xff] %v2102_v55  ;;  %v2108_v56 = vld [vmem:[%s3078_s3 + $0x8] sm:$0xff]  ;;  %v2114_v57 = vld [vmem:[%s3078_s3 + $0x70] sm:$0xff] }
  0x15   :  { %116 = vmatpush1.msra.mxu0 %v1976_v34  ;;  %186 = vmatprep.subr.mxu1 %v2030_v43  ;;  %3158 = vst [vmem:[#allocation11_spill] sm:$0xff] %v2108_v56  ;;  %3159 = vst [vmem:[#allocation12_spill] sm:$0xff] %v2114_v57  ;;  %v2120_v58 = vld [vmem:[%s3078_s3] sm:$0xff]  ;;  %v2126_v59 = vld [vmem:[%s3078_s3 + $0x58] sm:$0xff] }
  0x16   :  { %117 = vmatprep.subr.mxu0 %v1988_v36  ;;  %187 = vmatpush1.msra.mxu1 %v2042_v45  ;;  %3160 = vst [vmem:[#allocation13_spill] sm:$0xff] %v2120_v58  ;;  %3161 = vst [vmem:[#allocation14_spill] sm:$0xff] %v2126_v59  ;;  %v23_v60 = vld [vmem:[%s3079_s1] sm:$0xff]  ;;  %v2136_v61 = vld [vmem:[%s3078_s3 + $0x50] sm:$0xff] }
  0x17   :  { %118 = vmatpush1.msra.mxu0 %v2000_v38  ;;  %188 = vmatprep.subr.mxu1 %v2054_v47  ;;  %3162 = vst [vmem:[#allocation15_spill] sm:$0xff] %v2136_v61  ;;  %v2143_v62 = vld [vmem:[%s3078_s3 + $0x38] sm:$0xff]  ;;  %v2150_v63 = vld [vmem:[%s3078_s3 + $0x30] sm:$0xff] }
  0x18   :  { %119 = vmatprep.subr.mxu0 %v2012_v40  ;;  %189 = vmatpush1.msra.mxu1 %v2066_v49  ;;  %3163 = vst [vmem:[#allocation16_spill] sm:$0xff] %v2143_v62  ;;  %3164 = vst [vmem:[#allocation17_spill] sm:$0xff] %v2150_v63  ;;  %v2156_v3 = vld [vmem:[%s3078_s3 + $0x18] sm:$0xff] }
  0x19   :  { %120 = vmatpush1.msra.mxu0 %v2024_v42  ;;  %190 = vmatprep.subr.mxu1 %v2078_v51  ;;  %3165 = vst [vmem:[#allocation18_spill] sm:$0xff] %v2156_v3 }
  0x1a   :  { %121 = vmatprep.subr.mxu0 %v2036_v44  ;;  %191 = vmatpush1.msra.mxu1 %v2090_v53 }
  0x1b   :  { %122 = vmatpush1.msra.mxu0 %v2048_v46  ;;  %192 = vmatprep.subr.mxu1 %v2102_v55 }
  0x1c   :  { %123 = vmatprep.subr.mxu0 %v2060_v48  ;;  %193 = vmatpush1.msra.mxu1 %v2114_v57 }
  0x1d   :  { %124 = vmatpush1.msra.mxu0 %v2072_v50  ;;  %194 = vmatprep.subr.mxu1 %v2126_v59 }
  0x1e   :  { %125 = vmatprep.subr.mxu0 %v2084_v52  ;;  %195 = vmatpush1.msra.mxu1 %v2136_v61 }
  0x1f   :  { %126 = vmatpush1.msra.mxu0 %v2096_v54  ;;  %196 = vmatprep.subr.mxu1 %v2143_v62 }
  0x20   :  { %127 = vmatprep.subr.mxu0 %v2108_v56  ;;  %197 = vmatpush1.msra.mxu1 %v2150_v63 }
  0x21   :  { %128 = vmatpush1.msra.mxu0 %v2120_v58  ;;  %v2162_v58 = vld [vmem:[%s3078_s3 + $0x10] sm:$0xff]  ;;  %198 = vmatprep.subr.mxu1 %v2156_v3 }
  0x22   :  { %162 = vmatmul.mubr.f32.vlgmr.msra.gmra.mxu0 %v23_v60  ;;  %3166 = vst [vmem:[#allocation19_spill] sm:$0xff] %v2162_v58  ;;  %272 = vmatprep.subr.mxu0 %v1781_v0 }
  0x23   :  { %273 = vmatpush1.msra.mxu0 %v1786_v1  ;;  %199 = vmatpush1.msra.mxu1 %v2162_v58 }
  0x24   :  { %274 = vmatprep.subr.mxu0 %v1791_v2  ;;  %233 = vmatmul.mubr.f32.vlgmr.msra.gmra.mxu1 %v23_v60  ;;  %v3167_v60 = vld [vmem:[#allocation13_spill] sm:$0xff] }
  0x25   :  { %275 = vmatpush1.msra.mxu0 %v1799_v4  ;;  %343 = vmatprep.subr.mxu1 %v1828_v9 }
  0x26   :  { %344 = vmatpush1.msra.mxu1 %v1840_v11  ;;  %276 = vmatprep.subr.mxu0 %v1805_v5 }
  0x27   :  { %345 = vmatprep.subr.mxu1 %v1852_v13  ;;  %277 = vmatpush1.msra.mxu0 %v1811_v6 }
  0x28   :  { %346 = vmatpush1.msra.mxu1 %v1857_v14  ;;  %278 = vmatprep.subr.mxu0 %v1817_v7 }
  0x29   :  { %347 = vmatprep.subr.mxu1 %v1869_v16  ;;  %279 = vmatpush1.msra.mxu0 %v1823_v8 }
  0x2a   :  { %348 = vmatpush1.msra.mxu1 %v1881_v18  ;;  %280 = vmatprep.subr.mxu0 %v1834_v10 }
  0x2b   :  { %349 = vmatprep.subr.mxu1 %v1886_v19  ;;  %281 = vmatpush1.msra.mxu0 %v1846_v12 }
  0x2c   :  { %350 = vmatpush1.msra.mxu1 %v1898_v21  ;;  %282 = vmatprep.subr.mxu0 %v1863_v15 }
  0x2d   :  { %351 = vmatprep.subr.mxu1 %v1910_v23  ;;  %283 = vmatpush1.msra.mxu0 %v1875_v17 }
  0x2e   :  { %352 = vmatpush1.msra.mxu1 %v1922_v25  ;;  %284 = vmatprep.subr.mxu0 %v1892_v20 }
  0x2f   :  { %353 = vmatprep.subr.mxu1 %v1934_v27  ;;  %285 = vmatpush1.msra.mxu0 %v1904_v22 }
  0x30   :  { %354 = vmatpush1.msra.mxu1 %v1946_v29  ;;  %286 = vmatprep.subr.mxu0 %v1916_v24 }
  0x31   :  { %355 = vmatprep.subr.mxu1 %v1958_v31  ;;  %287 = vmatpush1.msra.mxu0 %v1928_v26 }
  0x32   :  { %356 = vmatpush1.msra.mxu1 %v1970_v33  ;;  %288 = vmatprep.subr.mxu0 %v1940_v28 }
  0x33   :  { %357 = vmatprep.subr.mxu1 %v1982_v35  ;;  %289 = vmatpush1.msra.mxu0 %v1952_v30 }
  0x34   :  { %358 = vmatpush1.msra.mxu1 %v1994_v37  ;;  %290 = vmatprep.subr.mxu0 %v1964_v32 }
  0x35   :  { %359 = vmatprep.subr.mxu1 %v2006_v39  ;;  %291 = vmatpush1.msra.mxu0 %v1976_v34 }
  0x36   :  { %360 = vmatpush1.msra.mxu1 %v2018_v41  ;;  %292 = vmatprep.subr.mxu0 %v1988_v36 }
  0x37   :  { %361 = vmatprep.subr.mxu1 %v2030_v43  ;;  %293 = vmatpush1.msra.mxu0 %v2000_v38 }
  0x38   :  { %362 = vmatpush1.msra.mxu1 %v2042_v45  ;;  %294 = vmatprep.subr.mxu0 %v2012_v40 }
  0x39   :  { %363 = vmatprep.subr.mxu1 %v2054_v47  ;;  %295 = vmatpush1.msra.mxu0 %v2024_v42 }
  0x3a   :  { %364 = vmatpush1.msra.mxu1 %v2066_v49  ;;  %296 = vmatprep.subr.mxu0 %v2036_v44 }
  0x3b   :  { %365 = vmatprep.subr.mxu1 %v2078_v51  ;;  %297 = vmatpush1.msra.mxu0 %v2048_v46 }
  0x3c   :  { %366 = vmatpush1.msra.mxu1 %v2090_v53  ;;  %298 = vmatprep.subr.mxu0 %v2060_v48  ;;  %v3168_v48 = vmov 0.0  }
  0x3d   :  { %367 = vmatprep.subr.mxu1 %v2102_v55  ;;  %299 = vmatpush1.msra.mxu0 %v2072_v50 }
  0x3e   :  { %368 = vmatpush1.msra.mxu1 %v2114_v57  ;;  %300 = vmatprep.subr.mxu0 %v2084_v52 }
  0x3f   :  { %369 = vmatprep.subr.mxu1 %v2126_v59  ;;  %301 = vmatpush1.msra.mxu0 %v2096_v54 }
  0x40   :  { %370 = vmatpush1.msra.mxu1 %v2136_v61  ;;  %302 = vmatprep.subr.mxu0 %v2108_v56  ;;  %v93_v56 = vld [vmem:[%s3080_s0] sm:$0xff]  ;;  %v96_v61 = vld [vmem:[%s3080_s0 + $0x18] sm:$0xff] }
  0x41   :  { %371 = vmatprep.subr.mxu1 %v2143_v62  ;;  %303 = vmatpush1.msra.mxu0 %v3167_v60  ;;  %v94_v60 = vld [vmem:[%s3080_s0 + $0x8] sm:$0xff] }
  0x42   :  { %372 = vmatpush1.msra.mxu1 %v2150_v63  ;;  %336 = vmatprep.mubr.f32.mxu0 %v3168_v48 }
  0x43   :  { %373 = vmatprep.subr.mxu1 %v2156_v3  ;;  %407 = vmatprep.mubr.f32.mxu1 %v3168_v48 }
  0x44   :  { %374 = vmatpush1.msra.mxu1 %v2162_v58  ;;  %447 = vmatprep.subr.mxu0 %v1781_v0 }
  0x45   :  { %518 = vmatprep.subr.mxu1 %v1828_v9  ;;  %v95_v9 = vld [vmem:[%s3080_s0 + $0x10] sm:$0xff] }
  0xe2   :  { %v163_v54 = vpop.f32.mrf.mxu0 }
  0xe3   :  { %v239_v63 = vadd.f32 %v163_v54, %v93_v56 }
  0xe4   :  { %v165_v62 = vpop.f32.mrf.mxu0  ;;  %v234_v0 = vpop.f32.mrf.mxu1 }
  0xe5   :  { %v1502_v3 = vmul.f32 -1.442695, %v239_v63  ;;  %v240_v52 = vadd.f32 %v165_v62, %v94_v60  ;;  %v241_v58 = vadd.f32 %v234_v0, %v95_v9  ;;  %v25_v0 = vld [vmem:[%s3081_s2] sm:$0xff] }
  0xe6   :  { %v236_v50 = vpop.f32.mrf.mxu1 }
  0xe7   :  { %1555 = vpow2.f32 %v1502_v3  ;;  %v1503_v48 = vmul.f32 -1.442695, %v240_v52  ;;  %v1504_v59 = vmul.f32 -1.442695, %v241_v58  ;;  %v242_v57 = vadd.f32 %v236_v50, %v96_v61 }
  0xe9   :  { %1557 = vpow2.f32 %v1503_v48 }
  0xea   :  { %1559 = vpow2.f32 %v1504_v59 }
  0xeb   :  { %1561 = vtanh.f32 %v242_v57 }
  0xf4   :  { %v1556_v54 = vpop.eup %1555 }
  0xf5   :  { %v252_v56 = vadd.f32 1.0, %v1556_v54  ;;  %v3170_v54 = vld [vmem:[#allocation12_spill] sm:$0xff] }
  0xf6   :  { %v1558_v62 = vpop.eup %1557 }
  0xf7   :  { %1563 = vrcp.f32 %v252_v56  ;;  %v253_v3 = vadd.f32 1.0, %v1558_v62  ;;  %v1560_v48 = vpop.eup %1559  ;;  %v3171_v56 = vld [vmem:[#allocation6_spill] sm:$0xff] }
  0xf8   :  { %v1562_v52 = vpop.eup %1561  ;;  %v254_v60 = vadd.f32 1.0, %v1560_v48  ;;  %v3172_v62 = vld [vmem:[#allocation14_spill] sm:$0xff]  ;;  %v3174_v48 = vld [vmem:[#allocation15_spill] sm:$0xff] }
  0xf9   :  { %1565 = vrcp.f32 %v253_v3  ;;  %v3173_v3 = vld [vmem:[#allocation7_spill] sm:$0xff] }
  0xfa   :  { %1567 = vrcp.f32 %v254_v60  ;;  %v3179_v60 = vld [vmem:[#allocation11_spill] sm:$0xff] }
 0x104   :  { %v1564_v63 = vpop.eup %1563 }
 0x105   :  { %v263_v58 = vmul.f32 %v1564_v63, %v1562_v52  ;;  %v3175_v52 = vld [vmem:[#allocation8_spill] sm:$0xff] }
 0x106   :  { %v1566_v9 = vpop.eup %1565  ;;  %v3176_v63 = vld [vmem:[#allocation16_spill] sm:$0xff] }
 0x107   :  { %v262_v46 = vmul.f32 %v1566_v9, %v25_v0  ;;  %v1568_v57 = vpop.eup %1567  ;;  %v3177_v0 = vld [vmem:[#allocation9_spill] sm:$0xff] }
 0x108   :  { %v3178_v9 = vld [vmem:[#allocation17_spill] sm:$0xff] }
 0x109   :  { %v2250_v50 = vadd.f32 %v263_v58, %v262_v46  ;;  %v3169_v46 = vld [vmem:[#allocation5_spill] sm:$0xff]  ;;  %v3180_v58 = vld [vmem:[#allocation18_spill] sm:$0xff] }
 0x10b   :  { %1569 = vtanh.f32 %v2250_v50 }
 0x118   :  { %v1570_v59 = vpop.eup %1569 }
 0x119   :  { %v266_v61 = vmul.f32 %v1570_v59, %v1568_v57  ;;  %v3181_v57 = vld [vmem:[#allocation13_spill] sm:$0xff]  ;;  %v3182_v59 = vmov 0.0  }
 0x11b   :  { %337 = vmatmul.mubr.f32.vlgmr.msra.gmra.mxu0 %v266_v61  ;;  %408 = vmatmul.mubr.f32.vlgmr.msra.gmra.mxu1 %v266_v61  ;;  %v3183_v61 = vld [vmem:[#allocation19_spill] sm:$0xff] }
 0x11c   :  { %448 = vmatpush1.msra.mxu0 %v1786_v1  ;;  %519 = vmatpush1.msra.mxu1 %v1840_v11 }
 0x11d   :  { %449 = vmatprep.subr.mxu0 %v1791_v2  ;;  %520 = vmatprep.subr.mxu1 %v1852_v13 }
 0x11e   :  { %450 = vmatpush1.msra.mxu0 %v1799_v4  ;;  %521 = vmatpush1.msra.mxu1 %v1857_v14 }
 0x11f   :  { %451 = vmatprep.subr.mxu0 %v1805_v5  ;;  %522 = vmatprep.subr.mxu1 %v1869_v16 }
 0x120   :  { %452 = vmatpush1.msra.mxu0 %v1811_v6  ;;  %523 = vmatpush1.msra.mxu1 %v1881_v18 }
 0x121   :  { %453 = vmatprep.subr.mxu0 %v1817_v7  ;;  %524 = vmatprep.subr.mxu1 %v1886_v19 }
 0x122   :  { %454 = vmatpush1.msra.mxu0 %v1823_v8  ;;  %525 = vmatpush1.msra.mxu1 %v1898_v21 }
 0x123   :  { %455 = vmatprep.subr.mxu0 %v1834_v10  ;;  %526 = vmatprep.subr.mxu1 %v1910_v23 }
 0x124   :  { %456 = vmatpush1.msra.mxu0 %v1846_v12  ;;  %527 = vmatpush1.msra.mxu1 %v1922_v25 }
 0x125   :  { %457 = vmatprep.subr.mxu0 %v1863_v15  ;;  %528 = vmatprep.subr.mxu1 %v1934_v27 }
 0x126   :  { %458 = vmatpush1.msra.mxu0 %v1875_v17  ;;  %529 = vmatpush1.msra.mxu1 %v1946_v29 }
 0x127   :  { %459 = vmatprep.subr.mxu0 %v1892_v20  ;;  %530 = vmatprep.subr.mxu1 %v1958_v31 }
 0x128   :  { %460 = vmatpush1.msra.mxu0 %v1904_v22  ;;  %531 = vmatpush1.msra.mxu1 %v1970_v33 }
 0x129   :  { %461 = vmatprep.subr.mxu0 %v1916_v24  ;;  %532 = vmatprep.subr.mxu1 %v1982_v35 }
 0x12a   :  { %462 = vmatpush1.msra.mxu0 %v1928_v26  ;;  %533 = vmatpush1.msra.mxu1 %v1994_v37 }
 0x12b   :  { %463 = vmatprep.subr.mxu0 %v1940_v28  ;;  %534 = vmatprep.subr.mxu1 %v2006_v39 }
 0x12c   :  { %464 = vmatpush1.msra.mxu0 %v1952_v30  ;;  %535 = vmatpush1.msra.mxu1 %v2018_v41 }
 0x12d   :  { %465 = vmatprep.subr.mxu0 %v1964_v32  ;;  %536 = vmatprep.subr.mxu1 %v2030_v43 }
 0x12e   :  { %466 = vmatpush1.msra.mxu0 %v1976_v34  ;;  %537 = vmatpush1.msra.mxu1 %v2042_v45 }
 0x12f   :  { %467 = vmatprep.subr.mxu0 %v1988_v36  ;;  %538 = vmatprep.subr.mxu1 %v2054_v47 }
 0x130   :  { %468 = vmatpush1.msra.mxu0 %v2000_v38  ;;  %539 = vmatpush1.msra.mxu1 %v2066_v49 }
 0x131   :  { %469 = vmatprep.subr.mxu0 %v2012_v40  ;;  %540 = vmatprep.subr.mxu1 %v2078_v51 }
 0x132   :  { %470 = vmatpush1.msra.mxu0 %v2024_v42  ;;  %541 = vmatpush1.msra.mxu1 %v2090_v53 }
 0x133   :  { %471 = vmatprep.subr.mxu0 %v2036_v44  ;;  %542 = vmatprep.subr.mxu1 %v2102_v55 }
 0x134   :  { %472 = vmatpush1.msra.mxu0 %v3169_v46  ;;  %543 = vmatpush1.msra.mxu1 %v3170_v54 }
 0x135   :  { %473 = vmatprep.subr.mxu0 %v3171_v56  ;;  %544 = vmatprep.subr.mxu1 %v3172_v62  ;;  %v1508_v62 = vld [vmem:[%s3080_s0 + $0x38] sm:$0xff] }
 0x136   :  { %474 = vmatpush1.msra.mxu0 %v3173_v3  ;;  %545 = vmatpush1.msra.mxu1 %v3174_v48  ;;  %v3184_v48 = vld [vmem:[#allocation2_spill] sm:$0xff] }
 0x137   :  { %475 = vmatprep.subr.mxu0 %v3175_v52  ;;  %546 = vmatprep.subr.mxu1 %v3176_v63  ;;  %v3185_v52 = vld [vmem:[#allocation3_spill] sm:$0xff] }
 0x138   :  { %476 = vmatpush1.msra.mxu0 %v3177_v0  ;;  %547 = vmatpush1.msra.mxu1 %v3178_v9  ;;  %v1505_v9 = vld [vmem:[%s3080_s0 + $0x20] sm:$0xff] }
 0x139   :  { %477 = vmatprep.subr.mxu0 %v3179_v60  ;;  %548 = vmatprep.subr.mxu1 %v3180_v58  ;;  %v1506_v58 = vld [vmem:[%s3080_s0 + $0x28] sm:$0xff] }
 0x13a   :  { %478 = vmatpush1.msra.mxu0 %v3181_v57  ;;  %511 = vmatprep.mubr.f32.mxu0 %v3182_v59 }
 0x13b   :  { %549 = vmatpush1.msra.mxu1 %v3183_v61  ;;  %582 = vmatprep.mubr.f32.mxu1 %v3182_v59 }
 0x13c   :  { %622 = vmatprep.subr.mxu0 %v3184_v48  ;;  %693 = vmatprep.subr.mxu1 %v3185_v52  ;;  %v1507_v52 = vld [vmem:[%s3080_s0 + $0x30] sm:$0xff] }
 0x1db   :  { %v338_v0 = vpop.f32.mrf.mxu0  ;;  %v409_v48 = vpop.f32.mrf.mxu1 }
 0x1dc   :  { %v414_v57 = vadd.f32 %v1505_v9, %v338_v0  ;;  %v416_v59 = vadd.f32 %v1507_v52, %v409_v48 }
 0x1dd   :  { %v340_v60 = vpop.f32.mrf.mxu0  ;;  %v411_v56 = vpop.f32.mrf.mxu1 }
 0x1de   :  { %v1509_v63 = vmul.f32 -1.442695, %v414_v57  ;;  %v415_v3 = vadd.f32 %v1506_v58, %v340_v60  ;;  %v1511_v54 = vmul.f32 -1.442695, %v416_v59  ;;  %v417_v0 = vadd.f32 %v1508_v62, %v411_v56  ;;  %v3188_v62 = vld [vmem:[#allocation5_spill] sm:$0xff]  ;;  %v3189_v59 = vld [vmem:[#allocation12_spill] sm:$0xff] }
 0x1e0   :  { %1571 = vpow2.f32 %v1509_v63  ;;  %v1510_v61 = vmul.f32 -1.442695, %v415_v3 }
 0x1e2   :  { %1573 = vpow2.f32 %v1510_v61 }
 0x1e3   :  { %1575 = vpow2.f32 %v1511_v54 }
 0x1ed   :  { %v1572_v46 = vpop.eup %1571 }
 0x1ee   :  { %v427_v9 = vadd.f32 1.0, %v1572_v46 }
 0x1ef   :  { %v1574_v57 = vpop.eup %1573 }
 0x1f0   :  { %1577 = vrcp.f32 %v427_v9  ;;  %v428_v3 = vadd.f32 1.0, %v1574_v57  ;;  %v1576_v63 = vpop.eup %1575  ;;  %v3191_v9 = vld [vmem:[#allocation14_spill] sm:$0xff]  ;;  %v3192_v57 = vld [vmem:[#allocation7_spill] sm:$0xff] }
 0x1f1   :  { %1579 = vtanh.f32 %v417_v0  ;;  %v429_v48 = vadd.f32 1.0, %v1576_v63  ;;  %v3190_v0 = vld [vmem:[#allocation6_spill] sm:$0xff]  ;;  %v3194_v63 = vld [vmem:[#allocation8_spill] sm:$0xff] }
 0x1f2   :  { %1581 = vrcp.f32 %v428_v3  ;;  %v3193_v3 = vld [vmem:[#allocation15_spill] sm:$0xff] }
 0x1f3   :  { %1583 = vrcp.f32 %v429_v48  ;;  %v3198_v48 = vld [vmem:[#allocation11_spill] sm:$0xff] }
 0x1fd   :  { %v1578_v60 = vpop.eup %1577 }
 0x1fe   :  { %v1580_v58 = vpop.eup %1579 }
 0x1ff   :  { %v1582_v61 = vpop.eup %1581  ;;  %v438_v55 = vmul.f32 %v1580_v58, %v1578_v60  ;;  %v3195_v60 = vld [vmem:[#allocation16_spill] sm:$0xff]  ;;  %v3196_v58 = vld [vmem:[#allocation9_spill] sm:$0xff] }
 0x200   :  { %v437_v52 = vmul.f32 %v1582_v61, %v2250_v50  ;;  %v1584_v46 = vpop.eup %1583  ;;  %v3187_v50 = vld [vmem:[#allocation10_spill] sm:$0xff]  ;;  %v3197_v61 = vld [vmem:[#allocation17_spill] sm:$0xff] }
 0x202   :  { %v2332_v44 = vadd.f32 %v438_v55, %v437_v52  ;;  %v3186_v55 = vld [vmem:[#allocation4_spill] sm:$0xff]  ;;  %v3199_v52 = vld [vmem:[#allocation18_spill] sm:$0xff] }
 0x204   :  { %1585 = vtanh.f32 %v2332_v44 }
 0x211   :  { %v1586_v56 = vpop.eup %1585 }
 0x212   :  { %v441_v54 = vmul.f32 %v1586_v56, %v1584_v46  ;;  %v3200_v46 = vld [vmem:[#allocation13_spill] sm:$0xff]  ;;  %v3201_v56 = vmov 0.0  }
 0x214   :  { %512 = vmatmul.mubr.f32.vlgmr.msra.gmra.mxu0 %v441_v54  ;;  %583 = vmatmul.mubr.f32.vlgmr.msra.gmra.mxu1 %v441_v54  ;;  %v3202_v54 = vld [vmem:[#allocation19_spill] sm:$0xff] }
 0x215   :  { %623 = vmatpush1.msra.mxu0 %v1786_v1  ;;  %694 = vmatpush1.msra.mxu1 %v1840_v11 }
 0x216   :  { %624 = vmatprep.subr.mxu0 %v1791_v2  ;;  %695 = vmatprep.subr.mxu1 %v1852_v13 }
 0x217   :  { %625 = vmatpush1.msra.mxu0 %v1799_v4  ;;  %696 = vmatpush1.msra.mxu1 %v1857_v14 }
 0x218   :  { %626 = vmatprep.subr.mxu0 %v1805_v5  ;;  %697 = vmatprep.subr.mxu1 %v1869_v16 }
 0x219   :  { %627 = vmatpush1.msra.mxu0 %v1811_v6  ;;  %698 = vmatpush1.msra.mxu1 %v1881_v18 }
 0x21a   :  { %628 = vmatprep.subr.mxu0 %v1817_v7  ;;  %699 = vmatprep.subr.mxu1 %v1886_v19 }
 0x21b   :  { %629 = vmatpush1.msra.mxu0 %v1823_v8  ;;  %700 = vmatpush1.msra.mxu1 %v1898_v21 }
 0x21c   :  { %630 = vmatprep.subr.mxu0 %v1834_v10  ;;  %701 = vmatprep.subr.mxu1 %v1910_v23 }
 0x21d   :  { %631 = vmatpush1.msra.mxu0 %v1846_v12  ;;  %702 = vmatpush1.msra.mxu1 %v1922_v25 }
 0x21e   :  { %632 = vmatprep.subr.mxu0 %v1863_v15  ;;  %703 = vmatprep.subr.mxu1 %v1934_v27 }
 0x21f   :  { %633 = vmatpush1.msra.mxu0 %v1875_v17  ;;  %704 = vmatpush1.msra.mxu1 %v1946_v29 }
 0x220   :  { %634 = vmatprep.subr.mxu0 %v1892_v20  ;;  %705 = vmatprep.subr.mxu1 %v1958_v31 }
 0x221   :  { %635 = vmatpush1.msra.mxu0 %v1904_v22  ;;  %706 = vmatpush1.msra.mxu1 %v1970_v33 }
 0x222   :  { %636 = vmatprep.subr.mxu0 %v1916_v24  ;;  %707 = vmatprep.subr.mxu1 %v1982_v35 }
 0x223   :  { %637 = vmatpush1.msra.mxu0 %v1928_v26  ;;  %708 = vmatpush1.msra.mxu1 %v1994_v37 }
 0x224   :  { %638 = vmatprep.subr.mxu0 %v1940_v28  ;;  %709 = vmatprep.subr.mxu1 %v2006_v39 }
 0x225   :  { %639 = vmatpush1.msra.mxu0 %v1952_v30  ;;  %710 = vmatpush1.msra.mxu1 %v2018_v41 }
 0x226   :  { %640 = vmatprep.subr.mxu0 %v1964_v32  ;;  %711 = vmatprep.subr.mxu1 %v2030_v43 }
 0x227   :  { %641 = vmatpush1.msra.mxu0 %v1976_v34  ;;  %712 = vmatpush1.msra.mxu1 %v2042_v45 }
 0x228   :  { %642 = vmatprep.subr.mxu0 %v1988_v36  ;;  %713 = vmatprep.subr.mxu1 %v2054_v47 }
 0x229   :  { %643 = vmatpush1.msra.mxu0 %v2000_v38  ;;  %714 = vmatpush1.msra.mxu1 %v2066_v49 }
 0x22a   :  { %644 = vmatprep.subr.mxu0 %v2012_v40  ;;  %715 = vmatprep.subr.mxu1 %v2078_v51 }
 0x22b   :  { %645 = vmatpush1.msra.mxu0 %v2024_v42  ;;  %716 = vmatpush1.msra.mxu1 %v2090_v53 }
 0x22c   :  { %646 = vmatprep.subr.mxu0 %v3186_v55  ;;  %717 = vmatprep.subr.mxu1 %v3187_v50 }
 0x22d   :  { %647 = vmatpush1.msra.mxu0 %v3188_v62  ;;  %718 = vmatpush1.msra.mxu1 %v3189_v59 }
 0x22e   :  { %648 = vmatprep.subr.mxu0 %v3190_v0  ;;  %719 = vmatprep.subr.mxu1 %v3191_v9  ;;  %v1515_v9 = vld [vmem:[%s3080_s0 + $0x58] sm:$0xff] }
 0x22f   :  { %649 = vmatpush1.msra.mxu0 %v3192_v57  ;;  %720 = vmatpush1.msra.mxu1 %v3193_v3  ;;  %v3203_v3 = vld [vmem:[#allocation2_spill] sm:$0xff] }
 0x230   :  { %650 = vmatprep.subr.mxu0 %v3194_v63  ;;  %721 = vmatprep.subr.mxu1 %v3195_v60  ;;  %v3204_v63 = vld [vmem:[#allocation3_spill] sm:$0xff] }
 0x231   :  { %651 = vmatpush1.msra.mxu0 %v3196_v58  ;;  %722 = vmatpush1.msra.mxu1 %v3197_v61  ;;  %v1512_v61 = vld [vmem:[%s3080_s0 + $0x40] sm:$0xff] }
 0x232   :  { %652 = vmatprep.subr.mxu0 %v3198_v48  ;;  %723 = vmatprep.subr.mxu1 %v3199_v52  ;;  %v1513_v52 = vld [vmem:[%s3080_s0 + $0x48] sm:$0xff] }
 0x233   :  { %653 = vmatpush1.msra.mxu0 %v3200_v46  ;;  %686 = vmatprep.mubr.f32.mxu0 %v3201_v56 }
 0x234   :  { %724 = vmatpush1.msra.mxu1 %v3202_v54  ;;  %757 = vmatprep.mubr.f32.mxu1 %v3201_v56 }
 0x235   :  { %797 = vmatprep.subr.mxu0 %v3203_v3  ;;  %868 = vmatprep.subr.mxu1 %v3204_v63  ;;  %v1514_v3 = vld [vmem:[%s3080_s0 + $0x50] sm:$0xff] }
 0x2d4   :  { %v513_v58 = vpop.f32.mrf.mxu0  ;;  %v584_v63 = vpop.f32.mrf.mxu1 }
 0x2d5   :  { %v589_v46 = vadd.f32 %v1512_v61, %v513_v58  ;;  %v591_v56 = vadd.f32 %v1514_v3, %v584_v63 }
 0x2d6   :  { %v515_v48 = vpop.f32.mrf.mxu0  ;;  %v586_v0 = vpop.f32.mrf.mxu1 }
 0x2d7   :  { %v1516_v60 = vmul.f32 -1.442695, %v589_v46  ;;  %v590_v57 = vadd.f32 %v1513_v52, %v515_v48  ;;  %v1518_v59 = vmul.f32 -1.442695, %v591_v56  ;;  %v592_v58 = vadd.f32 %v1515_v9, %v586_v0 }
 0x2d9   :  { %1587 = vpow2.f32 %v1516_v60  ;;  %v1517_v54 = vmul.f32 -1.442695, %v590_v57 }
 0x2db   :  { %1589 = vpow2.f32 %v1517_v54 }
 0x2dc   :  { %1591 = vpow2.f32 %v1518_v59 }
 0x2e6   :  { %v1588_v62 = vpop.eup %1587 }
 0x2e7   :  { %v602_v61 = vadd.f32 1.0, %v1588_v62 }
 0x2e8   :  { %v1590_v46 = vpop.eup %1589 }
 0x2e9   :  { %1593 = vrcp.f32 %v602_v61  ;;  %v603_v57 = vadd.f32 1.0, %v1590_v46  ;;  %v1592_v60 = vpop.eup %1591  ;;  %v2507_v46 = vld [vmem:[%s3078_s3 + $0x1e0] sm:$0xff] }
 0x2ea   :  { %1595 = vtanh.f32 %v592_v58  ;;  %v604_v63 = vadd.f32 1.0, %v1592_v60  ;;  %v2525_v60 = vld [vmem:[%s3078_s3 + $0x1d8] sm:$0xff] }
 0x2eb   :  { %1597 = vrcp.f32 %v603_v57  ;;  %v2519_v57 = vld [vmem:[%s3078_s3 + $0x1c8] sm:$0xff] }
 0x2ec   :  { %1599 = vrcp.f32 %v604_v63  ;;  %v2549_v63 = vld [vmem:[%s3078_s3 + $0x1b8] sm:$0xff] }
 0x2f6   :  { %v1594_v48 = vpop.eup %1593 }
 0x2f7   :  { %v1596_v52 = vpop.eup %1595 }
 0x2f8   :  { %v1598_v54 = vpop.eup %1597  ;;  %v613_v50 = vmul.f32 %v1596_v52, %v1594_v48  ;;  %v2531_v48 = vld [vmem:[%s3078_s3 + $0x1c0] sm:$0xff]  ;;  %v2537_v52 = vld [vmem:[%s3078_s3 + $0x1d0] sm:$0xff] }
 0x2f9   :  { %v612_v3 = vmul.f32 %v1598_v54, %v2332_v44  ;;  %v1600_v62 = vpop.eup %1599  ;;  %v2543_v54 = vld [vmem:[%s3078_s3 + $0x1a8] sm:$0xff] }
 0x2fb   :  { %v2414_v55 = vadd.f32 %v613_v50, %v612_v3  ;;  %v2555_v3 = vld [vmem:[%s3078_s3 + $0x1a0] sm:$0xff] }
 0x2fd   :  { %1601 = vtanh.f32 %v2414_v55 }
 0x30a   :  { %v1602_v0 = vpop.eup %1601 }
 0x30b   :  { %v616_v59 = vmul.f32 %v1602_v0, %v1600_v62  ;;  %v2561_v62 = vld [vmem:[%s3078_s3 + $0x1b0] sm:$0xff]  ;;  %v2567_v0 = vld [vmem:[%s3078_s3 + $0x188] sm:$0xff] }
 0x30d   :  { %687 = vmatmul.mubr.f32.vlgmr.msra.gmra.mxu0 %v616_v59  ;;  %758 = vmatmul.mubr.f32.vlgmr.msra.gmra.mxu1 %v616_v59  ;;  %v2573_v59 = vld [vmem:[%s3078_s3 + $0x198] sm:$0xff] }
 0x30e   :  { %798 = vmatpush1.msra.mxu0 %v1786_v1  ;;  %869 = vmatpush1.msra.mxu1 %v1840_v11  ;;  %v3205_v1 = vld [vmem:[#allocation4_spill] sm:$0xff] }
 0x30f   :  { %799 = vmatprep.subr.mxu0 %v1791_v2  ;;  %870 = vmatprep.subr.mxu1 %v1852_v13  ;;  %v3206_v2 = vld [vmem:[#allocation10_spill] sm:$0xff]  ;;  %v3213_v11 = vld [vmem:[#allocation8_spill] sm:$0xff]  ;;  %v3215_v13 = vld [vmem:[#allocation9_spill] sm:$0xff] }
 0x310   :  { %800 = vmatpush1.msra.mxu0 %v1799_v4  ;;  %871 = vmatpush1.msra.mxu1 %v1857_v14  ;;  %v3207_v4 = vld [vmem:[#allocation5_spill] sm:$0xff] }
 0x311   :  { %801 = vmatprep.subr.mxu0 %v1805_v5  ;;  %872 = vmatprep.subr.mxu1 %v1869_v16  ;;  %v3208_v5 = vld [vmem:[#allocation12_spill] sm:$0xff]  ;;  %v3216_v14 = vld [vmem:[#allocation17_spill] sm:$0xff]  ;;  %v3218_v16 = vld [vmem:[#allocation18_spill] sm:$0xff] }
 0x312   :  { %802 = vmatpush1.msra.mxu0 %v1811_v6  ;;  %873 = vmatpush1.msra.mxu1 %v1881_v18  ;;  %v3209_v6 = vld [vmem:[#allocation6_spill] sm:$0xff]  ;;  %v3220_v18 = vmov 0.0  }
 0x313   :  { %803 = vmatprep.subr.mxu0 %v1817_v7  ;;  %874 = vmatprep.subr.mxu1 %v1886_v19  ;;  %v3210_v7 = vld [vmem:[#allocation14_spill] sm:$0xff]  ;;  %v3221_v19 = vld [vmem:[#allocation19_spill] sm:$0xff] }
 0x314   :  { %804 = vmatpush1.msra.mxu0 %v1823_v8  ;;  %875 = vmatpush1.msra.mxu1 %v1898_v21  ;;  %v3211_v8 = vld [vmem:[#allocation7_spill] sm:$0xff] }
 0x315   :  { %805 = vmatprep.subr.mxu0 %v1834_v10  ;;  %876 = vmatprep.subr.mxu1 %v1910_v23  ;;  %v3212_v10 = vld [vmem:[#allocation15_spill] sm:$0xff] }
 0x316   :  { %806 = vmatpush1.msra.mxu0 %v1846_v12  ;;  %877 = vmatpush1.msra.mxu1 %v1922_v25  ;;  %v3214_v12 = vld [vmem:[#allocation16_spill] sm:$0xff]  ;;  %v3223_v21 = vld [vmem:[#allocation3_spill] sm:$0xff] }
 0x317   :  { %807 = vmatprep.subr.mxu0 %v1863_v15  ;;  %878 = vmatprep.subr.mxu1 %v1934_v27  ;;  %v3217_v15 = vld [vmem:[#allocation11_spill] sm:$0xff] }
 0x318   :  { %808 = vmatpush1.msra.mxu0 %v1875_v17  ;;  %879 = vmatpush1.msra.mxu1 %v1946_v29  ;;  %v3219_v17 = vld [vmem:[#allocation13_spill] sm:$0xff] }
 0x319   :  { %809 = vmatprep.subr.mxu0 %v1892_v20  ;;  %880 = vmatprep.subr.mxu1 %v1958_v31  ;;  %v2484_v20 = vld [vmem:[%s3078_s3 + $0x1e8] sm:$0xff] }
 0x31a   :  { %810 = vmatpush1.msra.mxu0 %v1904_v22  ;;  %881 = vmatpush1.msra.mxu1 %v1970_v33  ;;  %3222 = vst [vmem:[#allocation2_spill] sm:$0xff] %v2484_v20  ;;  %v1519_v22 = vld [vmem:[%s3080_s0 + $0x60] sm:$0xff]  ;;  %v1522_v33 = vld [vmem:[%s3080_s0 + $0x78] sm:$0xff] }
 0x31b   :  { %811 = vmatprep.subr.mxu0 %v1916_v24  ;;  %882 = vmatprep.subr.mxu1 %v1982_v35  ;;  %v1520_v24 = vld [vmem:[%s3080_s0 + $0x68] sm:$0xff] }
 0x31c   :  { %812 = vmatpush1.msra.mxu0 %v1928_v26  ;;  %883 = vmatpush1.msra.mxu1 %v1994_v37 }
 0x31d   :  { %813 = vmatprep.subr.mxu0 %v1940_v28  ;;  %884 = vmatprep.subr.mxu1 %v2006_v39 }
 0x31e   :  { %814 = vmatpush1.msra.mxu0 %v1952_v30  ;;  %885 = vmatpush1.msra.mxu1 %v2018_v41  ;;  %v1521_v30 = vld [vmem:[%s3080_s0 + $0x70] sm:$0xff] }
 0x31f   :  { %815 = vmatprep.subr.mxu0 %v1964_v32  ;;  %886 = vmatprep.subr.mxu1 %v2030_v43 }
 0x320   :  { %816 = vmatpush1.msra.mxu0 %v1976_v34  ;;  %887 = vmatpush1.msra.mxu1 %v2042_v45 }
 0x321   :  { %817 = vmatprep.subr.mxu0 %v1988_v36  ;;  %888 = vmatprep.subr.mxu1 %v2054_v47 }
 0x322   :  { %818 = vmatpush1.msra.mxu0 %v2000_v38  ;;  %889 = vmatpush1.msra.mxu1 %v2066_v49 }
 0x323   :  { %819 = vmatprep.subr.mxu0 %v2012_v40  ;;  %890 = vmatprep.subr.mxu1 %v2078_v51 }
 0x324   :  { %820 = vmatpush1.msra.mxu0 %v2024_v42  ;;  %891 = vmatpush1.msra.mxu1 %v2090_v53 }
 0x325   :  { %821 = vmatprep.subr.mxu0 %v3205_v1  ;;  %892 = vmatprep.subr.mxu1 %v3206_v2  ;;  %v2579_v1 = vld [vmem:[%s3078_s3 + $0x180] sm:$0xff] }
 0x326   :  { %822 = vmatpush1.msra.mxu0 %v3207_v4  ;;  %893 = vmatpush1.msra.mxu1 %v3208_v5  ;;  %v2585_v4 = vld [vmem:[%s3078_s3 + $0x190] sm:$0xff] }
 0x327   :  { %823 = vmatprep.subr.mxu0 %v3209_v6  ;;  %894 = vmatprep.subr.mxu1 %v3210_v7  ;;  %v2591_v6 = vld [vmem:[%s3078_s3 + $0x168] sm:$0xff] }
 0x328   :  { %824 = vmatpush1.msra.mxu0 %v3211_v8  ;;  %895 = vmatpush1.msra.mxu1 %v3212_v10  ;;  %v2597_v8 = vld [vmem:[%s3078_s3 + $0x178] sm:$0xff] }
 0x329   :  { %825 = vmatprep.subr.mxu0 %v3213_v11  ;;  %896 = vmatprep.subr.mxu1 %v3214_v12  ;;  %v2603_v11 = vld [vmem:[%s3078_s3 + $0x160] sm:$0xff] }
 0x32a   :  { %826 = vmatpush1.msra.mxu0 %v3215_v13  ;;  %897 = vmatpush1.msra.mxu1 %v3216_v14  ;;  %v2609_v13 = vld [vmem:[%s3078_s3 + $0x170] sm:$0xff] }
 0x32b   :  { %827 = vmatprep.subr.mxu0 %v3217_v15  ;;  %898 = vmatprep.subr.mxu1 %v3218_v16  ;;  %v2615_v15 = vld [vmem:[%s3078_s3 + $0x148] sm:$0xff] }
 0x32c   :  { %828 = vmatpush1.msra.mxu0 %v3219_v17  ;;  %861 = vmatprep.mubr.f32.mxu0 %v3220_v18 }
 0x32d   :  { %899 = vmatpush1.msra.mxu1 %v3221_v19  ;;  %932 = vmatprep.mubr.f32.mxu1 %v3220_v18 }
 0x32e   :  { %972 = vmatprep.subr.mxu0 %v2484_v20  ;;  %1043 = vmatprep.subr.mxu1 %v3223_v21  ;;  %v2621_v21 = vld [vmem:[%s3078_s3 + $0x158] sm:$0xff] }
 0x3cd   :  { %v688_v23 = vpop.f32.mrf.mxu0  ;;  %v759_v31 = vpop.f32.mrf.mxu1 }
 0x3ce   :  { %v764_v25 = vadd.f32 %v1519_v22, %v688_v23  ;;  %v766_v32 = vadd.f32 %v1521_v30, %v759_v31  ;;  %v2627_v22 = vld [vmem:[%s3078_s3 + $0x140] sm:$0xff]  ;;  %v2633_v23 = vld [vmem:[%s3078_s3 + $0x150] sm:$0xff] }
 0x3cf   :  { %v690_v26 = vpop.f32.mrf.mxu0  ;;  %v761_v34 = vpop.f32.mrf.mxu1  ;;  %v2675_v30 = vld [vmem:[%s3078_s3 + $0x100] sm:$0xff]  ;;  %v2681_v31 = vld [vmem:[%s3078_s3 + $0x110] sm:$0xff] }
 0x3d0   :  { %v1523_v27 = vmul.f32 -1.442695, %v764_v25  ;;  %v765_v28 = vadd.f32 %v1520_v24, %v690_v26  ;;  %v1525_v35 = vmul.f32 -1.442695, %v766_v32  ;;  %v767_v37 = vadd.f32 %v1522_v33, %v761_v34  ;;  %v2639_v24 = vld [vmem:[%s3078_s3 + $0x128] sm:$0xff]  ;;  %v2645_v25 = vld [vmem:[%s3078_s3 + $0x138] sm:$0xff] }
 0x3d1   :  { %v2651_v26 = vld [vmem:[%s3078_s3 + $0x120] sm:$0xff]  ;;  %v2687_v32 = vld [vmem:[%s3078_s3 + $0xe8] sm:$0xff]  ;;  %v2693_v33 = vld [vmem:[%s3078_s3 + $0xf8] sm:$0xff] }
 0x3d2   :  { %1603 = vpow2.f32 %v1523_v27  ;;  %v1524_v29 = vmul.f32 -1.442695, %v765_v28  ;;  %v2657_v27 = vld [vmem:[%s3078_s3 + $0x130] sm:$0xff]  ;;  %v2663_v28 = vld [vmem:[%s3078_s3 + $0x108] sm:$0xff]  ;;  %v2699_v34 = vld [vmem:[%s3078_s3 + $0xe0] sm:$0xff] }
 0x3d4   :  { %1605 = vpow2.f32 %v1524_v29  ;;  %v2669_v29 = vld [vmem:[%s3078_s3 + $0x118] sm:$0xff] }
 0x3d5   :  { %1607 = vpow2.f32 %v1525_v35  ;;  %v2705_v35 = vld [vmem:[%s3078_s3 + $0xf0] sm:$0xff] }
 0x3df   :  { %v1604_v36 = vpop.eup %1603 }
 0x3e0   :  { %v777_v38 = vadd.f32 1.0, %v1604_v36  ;;  %v2711_v36 = vld [vmem:[%s3078_s3 + $0xc8] sm:$0xff] }
 0x3e1   :  { %v1606_v39 = vpop.eup %1605 }
 0x3e2   :  { %1609 = vrcp.f32 %v777_v38  ;;  %v778_v40 = vadd.f32 1.0, %v1606_v39  ;;  %v1608_v41 = vpop.eup %1607  ;;  %v2723_v38 = vld [vmem:[%s3078_s3 + $0xc0] sm:$0xff]  ;;  %v2729_v39 = vld [vmem:[%s3078_s3 + $0xd0] sm:$0xff] }
 0x3e3   :  { %1611 = vtanh.f32 %v767_v37  ;;  %v779_v45 = vadd.f32 1.0, %v1608_v41  ;;  %v2717_v37 = vld [vmem:[%s3078_s3 + $0xd8] sm:$0xff] }
 0x3e4   :  { %1613 = vrcp.f32 %v778_v40  ;;  %v2735_v40 = vld [vmem:[%s3078_s3 + $0xa8] sm:$0xff]  ;;  %v2741_v41 = vld [vmem:[%s3078_s3 + $0xb8] sm:$0xff] }
 0x3e5   :  { %1615 = vrcp.f32 %v779_v45 }
 0x3ef   :  { %v1610_v42 = vpop.eup %1609 }
 0x3f0   :  { %v1612_v43 = vpop.eup %1611 }
 0x3f1   :  { %v1614_v44 = vpop.eup %1613  ;;  %v788_v50 = vmul.f32 %v1612_v43, %v1610_v42  ;;  %v2747_v42 = vld [vmem:[%s3078_s3 + $0xa0] sm:$0xff]  ;;  %v2754_v43 = vld [vmem:[%s3078_s3 + $0x88] sm:$0xff] }
 0x3f2   :  { %v787_v47 = vmul.f32 %v1614_v44, %v2414_v55  ;;  %v1616_v56 = vpop.eup %1615  ;;  %v2513_v55 = vld [vmem:[%s3078_s3 + $0x1f0] sm:$0xff]  ;;  %v2761_v44 = vld [vmem:[%s3078_s3 + $0x80] sm:$0xff] }
 0x3f4   :  { %v2501_v9 = vadd.f32 %v788_v50, %v787_v47 }
 0x3f6   :  { %1617 = vtanh.f32 %v2501_v9 }
 0x403   :  { %v1618_v58 = vpop.eup %1617 }
 0x404   :  { %v791_v61 = vmul.f32 %v1618_v58, %v1616_v56  ;;  %v1528_v58 = vld [vmem:[%s3080_s0 + $0x90] sm:$0xff] }
 0x406   :  { %862 = vmatmul.mubr.f32.vlgmr.msra.gmra.mxu0 %v791_v61  ;;  %933 = vmatmul.mubr.f32.vlgmr.msra.gmra.mxu1 %v791_v61 }
 0x407   :  { %973 = vmatpush1.msra.mxu0 %v2507_v46  ;;  %1044 = vmatpush1.msra.mxu1 %v2513_v55 }
 0x408   :  { %974 = vmatprep.subr.mxu0 %v2519_v57  ;;  %1045 = vmatprep.subr.mxu1 %v2525_v60 }
 0x409   :  { %975 = vmatpush1.msra.mxu0 %v2531_v48  ;;  %1046 = vmatpush1.msra.mxu1 %v2537_v52 }
 0x40a   :  { %976 = vmatprep.subr.mxu0 %v2543_v54  ;;  %1047 = vmatprep.subr.mxu1 %v2549_v63 }
 0x40b   :  { %977 = vmatpush1.msra.mxu0 %v2555_v3  ;;  %1048 = vmatpush1.msra.mxu1 %v2561_v62 }
 0x40c   :  { %978 = vmatprep.subr.mxu0 %v2567_v0  ;;  %1049 = vmatprep.subr.mxu1 %v2573_v59 }
 0x40d   :  { %979 = vmatpush1.msra.mxu0 %v2579_v1  ;;  %1050 = vmatpush1.msra.mxu1 %v2585_v4 }
 0x40e   :  { %980 = vmatprep.subr.mxu0 %v2591_v6  ;;  %1051 = vmatprep.subr.mxu1 %v2597_v8 }
 0x40f   :  { %981 = vmatpush1.msra.mxu0 %v2603_v11  ;;  %1052 = vmatpush1.msra.mxu1 %v2609_v13 }
 0x410   :  { %982 = vmatprep.subr.mxu0 %v2615_v15  ;;  %1053 = vmatprep.subr.mxu1 %v2621_v21 }
 0x411   :  { %983 = vmatpush1.msra.mxu0 %v2627_v22  ;;  %1054 = vmatpush1.msra.mxu1 %v2633_v23 }
 0x412   :  { %984 = vmatprep.subr.mxu0 %v2639_v24  ;;  %1055 = vmatprep.subr.mxu1 %v2645_v25 }
 0x413   :  { %985 = vmatpush1.msra.mxu0 %v2651_v26  ;;  %1056 = vmatpush1.msra.mxu1 %v2657_v27 }
 0x414   :  { %986 = vmatprep.subr.mxu0 %v2663_v28  ;;  %1057 = vmatprep.subr.mxu1 %v2669_v29 }
 0x415   :  { %987 = vmatpush1.msra.mxu0 %v2675_v30  ;;  %1058 = vmatpush1.msra.mxu1 %v2681_v31 }
 0x416   :  { %988 = vmatprep.subr.mxu0 %v2687_v32  ;;  %1059 = vmatprep.subr.mxu1 %v2693_v33 }
 0x417   :  { %989 = vmatpush1.msra.mxu0 %v2699_v34  ;;  %1060 = vmatpush1.msra.mxu1 %v2705_v35 }
 0x418   :  { %990 = vmatprep.subr.mxu0 %v2711_v36  ;;  %1061 = vmatprep.subr.mxu1 %v2717_v37 }
 0x419   :  { %991 = vmatpush1.msra.mxu0 %v2723_v38  ;;  %1062 = vmatpush1.msra.mxu1 %v2729_v39 }
 0x41a   :  { %992 = vmatprep.subr.mxu0 %v2735_v40  ;;  %1063 = vmatprep.subr.mxu1 %v2741_v41 }
 0x41b   :  { %993 = vmatpush1.msra.mxu0 %v2747_v42  ;;  %1064 = vmatpush1.msra.mxu1 %v2066_v49  ;;  %v2768_v49 = vld [vmem:[%s3078_s3 + $0x68] sm:$0xff] }
 0x41c   :  { %994 = vmatprep.subr.mxu0 %v2754_v43  ;;  %1065 = vmatprep.subr.mxu1 %v2078_v51  ;;  %3224 = vst [vmem:[#allocation4_spill] sm:$0xff] %v2768_v49  ;;  %v2775_v51 = vld [vmem:[%s3078_s3 + $0x60] sm:$0xff] }
 0x41d   :  { %995 = vmatpush1.msra.mxu0 %v2761_v44  ;;  %1066 = vmatpush1.msra.mxu1 %v2090_v53  ;;  %3225 = vst [vmem:[#allocation10_spill] sm:$0xff] %v2775_v51  ;;  %v2782_v53 = vld [vmem:[%s3078_s3 + $0x48] sm:$0xff] }
 0x41e   :  { %996 = vmatprep.subr.mxu0 %v2768_v49  ;;  %1067 = vmatprep.subr.mxu1 %v3206_v2  ;;  %3226 = vst [vmem:[#allocation5_spill] sm:$0xff] %v2782_v53  ;;  %v2789_v2 = vld [vmem:[%s3078_s3 + $0x40] sm:$0xff] }
 0x41f   :  { %997 = vmatpush1.msra.mxu0 %v2775_v51  ;;  %1068 = vmatpush1.msra.mxu1 %v3208_v5  ;;  %3227 = vst [vmem:[#allocation12_spill] sm:$0xff] %v2789_v2  ;;  %v2796_v5 = vld [vmem:[%s3078_s3 + $0x28] sm:$0xff] }
 0x420   :  { %998 = vmatprep.subr.mxu0 %v2782_v53  ;;  %1069 = vmatprep.subr.mxu1 %v3210_v7  ;;  %3228 = vst [vmem:[#allocation6_spill] sm:$0xff] %v2796_v5  ;;  %v2803_v7 = vld [vmem:[%s3078_s3 + $0x20] sm:$0xff] }
 0x421   :  { %999 = vmatpush1.msra.mxu0 %v2789_v2  ;;  %1070 = vmatpush1.msra.mxu1 %v3212_v10  ;;  %3229 = vst [vmem:[#allocation14_spill] sm:$0xff] %v2803_v7  ;;  %v2810_v10 = vld [vmem:[%s3078_s3 + $0x8] sm:$0xff] }
 0x422   :  { %1000 = vmatprep.subr.mxu0 %v2796_v5  ;;  %1071 = vmatprep.subr.mxu1 %v3214_v12  ;;  %3230 = vst [vmem:[#allocation7_spill] sm:$0xff] %v2810_v10  ;;  %v2822_v12 = vld [vmem:[%s3078_s3 + $0x1f8] sm:$0xff] }
 0x423   :  { %1001 = vmatpush1.msra.mxu0 %v2803_v7  ;;  %1072 = vmatpush1.msra.mxu1 %v3216_v14  ;;  %3231 = vst [vmem:[#allocation15_spill] sm:$0xff] %v2822_v12  ;;  %v1526_v14 = vld [vmem:[%s3080_s0 + $0x80] sm:$0xff] }
 0x424   :  { %1002 = vmatprep.subr.mxu0 %v2810_v10  ;;  %1073 = vmatprep.subr.mxu1 %v3218_v16 }
 0x425   :  { %1003 = vmatpush1.msra.mxu0 %v3219_v17  ;;  %1036 = vmatprep.mubr.f32.mxu0 %v3220_v18  ;;  %v1527_v17 = vld [vmem:[%s3080_s0 + $0x88] sm:$0xff] }
 0x426   :  { %1074 = vmatpush1.msra.mxu1 %v3221_v19  ;;  %1107 = vmatprep.mubr.f32.mxu1 %v3220_v18 }
 0x427   :  { %1147 = vmatprep.subr.mxu0 %v2484_v20  ;;  %1218 = vmatprep.subr.mxu1 %v2822_v12  ;;  %v1529_v20 = vld [vmem:[%s3080_s0 + $0x98] sm:$0xff] }
 0x4c6   :  { %v863_v16 = vpop.f32.mrf.mxu0  ;;  %v934_v61 = vpop.f32.mrf.mxu1 }
 0x4c7   :  { %v939_v19 = vadd.f32 %v1526_v14, %v863_v16  ;;  %v941_v12 = vadd.f32 %v1528_v58, %v934_v61 }
 0x4c8   :  { %v865_v45 = vpop.f32.mrf.mxu0  ;;  %v936_v18 = vpop.f32.mrf.mxu1 }
 0x4c9   :  { %v1530_v47 = vmul.f32 -1.442695, %v939_v19  ;;  %v940_v50 = vadd.f32 %v1527_v17, %v865_v45  ;;  %v1532_v10 = vmul.f32 -1.442695, %v941_v12  ;;  %v942_v14 = vadd.f32 %v1529_v20, %v936_v18  ;;  %v2906_v12 = vld [vmem:[%s3078_s3 + $0x78] sm:$0xff] }
 0x4ca   :  { %3232 = vst [vmem:[#allocation8_spill] sm:$0xff] %v2906_v12 }
 0x4cb   :  { %1619 = vpow2.f32 %v1530_v47  ;;  %v1531_v56 = vmul.f32 -1.442695, %v940_v50 }
 0x4cd   :  { %1621 = vpow2.f32 %v1531_v56 }
 0x4ce   :  { %1623 = vpow2.f32 %v1532_v10  ;;  %v2899_v10 = vld [vmem:[%s3078_s3 + $0x90] sm:$0xff] }
 0x4d8   :  { %v1620_v7 = vpop.eup %1619 }
 0x4d9   :  { %v952_v16 = vadd.f32 1.0, %v1620_v7 }
 0x4da   :  { %v1622_v19 = vpop.eup %1621 }
 0x4db   :  { %1625 = vrcp.f32 %v952_v16  ;;  %v953_v17 = vadd.f32 1.0, %v1622_v19  ;;  %v1624_v45 = vpop.eup %1623  ;;  %v2920_v16 = vld [vmem:[%s3078_s3 + $0x58] sm:$0xff]  ;;  %v3235_v19 = vld [vmem:[#allocation12_spill] sm:$0xff] }
 0x4dc   :  { %1627 = vtanh.f32 %v942_v14  ;;  %v954_v58 = vadd.f32 1.0, %v1624_v45  ;;  %v2913_v14 = vld [vmem:[%s3078_s3 + $0x70] sm:$0xff]  ;;  %3234 = vst [vmem:[#allocation9_spill] sm:$0xff] %v2920_v16  ;;  %v3237_v45 = vld [vmem:[#allocation6_spill] sm:$0xff] }
 0x4dd   :  { %1629 = vrcp.f32 %v953_v17  ;;  %3233 = vst [vmem:[#allocation16_spill] sm:$0xff] %v2913_v14  ;;  %v2927_v17 = vld [vmem:[%s3078_s3 + $0x50] sm:$0xff] }
 0x4de   :  { %1631 = vrcp.f32 %v954_v58  ;;  %3236 = vst [vmem:[#allocation17_spill] sm:$0xff] %v2927_v17  ;;  %v3241_v58 = vld [vmem:[#allocation7_spill] sm:$0xff] }
 0x4e8   :  { %v1626_v47 = vpop.eup %1625 }
 0x4e9   :  { %v1628_v50 = vpop.eup %1627 }
 0x4ea   :  { %v1630_v56 = vpop.eup %1629  ;;  %v963_v5 = vmul.f32 %v1628_v50, %v1626_v47  ;;  %v2934_v47 = vld [vmem:[%s3078_s3 + $0x38] sm:$0xff]  ;;  %v3239_v50 = vld [vmem:[#allocation14_spill] sm:$0xff] }
 0x4eb   :  { %v962_v61 = vmul.f32 %v1630_v56, %v2501_v9  ;;  %v1632_v18 = vpop.eup %1631  ;;  %v2885_v9 = vld [vmem:[%s3078_s3 + $0xb0] sm:$0xff]  ;;  %3238 = vst [vmem:[#allocation11_spill] sm:$0xff] %v2934_v47 }
 0x4ec   :  { %v2941_v56 = vld [vmem:[%s3078_s3 + $0x30] sm:$0xff] }
 0x4ed   :  { %v2838_v2 = vadd.f32 %v963_v5, %v962_v61  ;;  %v2892_v5 = vld [vmem:[%s3078_s3 + $0x98] sm:$0xff]  ;;  %3240 = vst [vmem:[#allocation18_spill] sm:$0xff] %v2941_v56 }
 0x4ee   :  { %v2948_v61 = vld [vmem:[%s3078_s3 + $0x18] sm:$0xff] }
 0x4ef   :  { %1633 = vtanh.f32 %v2838_v2  ;;  %3242 = vst [vmem:[#allocation13_spill] sm:$0xff] %v2948_v61 }
 0x4fc   :  { %v1634_v20 = vpop.eup %1633 }
 0x4fd   :  { %v966_v7 = vmul.f32 %v1634_v20, %v1632_v18  ;;  %v2954_v18 = vld [vmem:[%s3078_s3] sm:$0xff]  ;;  %v3244_v20 = vmov 0.0  }
 0x4fe   :  { %3243 = vst [vmem:[#allocation19_spill] sm:$0xff] %v2954_v18 }
 0x4ff   :  { %1037 = vmatmul.mubr.f32.vlgmr.msra.gmra.mxu0 %v966_v7  ;;  %1108 = vmatmul.mubr.f32.vlgmr.msra.gmra.mxu1 %v966_v7  ;;  %v2961_v7 = vld [vmem:[%s3078_s3 + $0x10] sm:$0xff] }
 0x500   :  { %1148 = vmatpush1.msra.mxu0 %v2507_v46  ;;  %1219 = vmatpush1.msra.mxu1 %v2513_v55  ;;  %3245 = vst [vmem:[#allocation3_spill] sm:$0xff] %v2961_v7 }
 0x501   :  { %1149 = vmatprep.subr.mxu0 %v2519_v57  ;;  %1220 = vmatprep.subr.mxu1 %v2525_v60 }
 0x502   :  { %1150 = vmatpush1.msra.mxu0 %v2531_v48  ;;  %1221 = vmatpush1.msra.mxu1 %v2537_v52 }
 0x503   :  { %1151 = vmatprep.subr.mxu0 %v2543_v54  ;;  %1222 = vmatprep.subr.mxu1 %v2549_v63 }
 0x504   :  { %1152 = vmatpush1.msra.mxu0 %v2555_v3  ;;  %1223 = vmatpush1.msra.mxu1 %v2561_v62 }
 0x505   :  { %1153 = vmatprep.subr.mxu0 %v2567_v0  ;;  %1224 = vmatprep.subr.mxu1 %v2573_v59 }
 0x506   :  { %1154 = vmatpush1.msra.mxu0 %v2579_v1  ;;  %1225 = vmatpush1.msra.mxu1 %v2585_v4 }
 0x507   :  { %1155 = vmatprep.subr.mxu0 %v2591_v6  ;;  %1226 = vmatprep.subr.mxu1 %v2597_v8 }
 0x508   :  { %1156 = vmatpush1.msra.mxu0 %v2603_v11  ;;  %1227 = vmatpush1.msra.mxu1 %v2609_v13 }
 0x509   :  { %1157 = vmatprep.subr.mxu0 %v2615_v15  ;;  %1228 = vmatprep.subr.mxu1 %v2621_v21 }
 0x50a   :  { %1158 = vmatpush1.msra.mxu0 %v2627_v22  ;;  %1229 = vmatpush1.msra.mxu1 %v2633_v23 }
 0x50b   :  { %1159 = vmatprep.subr.mxu0 %v2639_v24  ;;  %1230 = vmatprep.subr.mxu1 %v2645_v25 }
 0x50c   :  { %1160 = vmatpush1.msra.mxu0 %v2651_v26  ;;  %1231 = vmatpush1.msra.mxu1 %v2657_v27 }
 0x50d   :  { %1161 = vmatprep.subr.mxu0 %v2663_v28  ;;  %1232 = vmatprep.subr.mxu1 %v2669_v29 }
 0x50e   :  { %1162 = vmatpush1.msra.mxu0 %v2675_v30  ;;  %1233 = vmatpush1.msra.mxu1 %v2681_v31 }
 0x50f   :  { %1163 = vmatprep.subr.mxu0 %v2687_v32  ;;  %1234 = vmatprep.subr.mxu1 %v2693_v33 }
 0x510   :  { %1164 = vmatpush1.msra.mxu0 %v2699_v34  ;;  %1235 = vmatpush1.msra.mxu1 %v2705_v35 }
 0x511   :  { %1165 = vmatprep.subr.mxu0 %v2711_v36  ;;  %1236 = vmatprep.subr.mxu1 %v2717_v37 }
 0x512   :  { %1166 = vmatpush1.msra.mxu0 %v2723_v38  ;;  %1237 = vmatpush1.msra.mxu1 %v2729_v39 }
 0x513   :  { %1167 = vmatprep.subr.mxu0 %v2735_v40  ;;  %1238 = vmatprep.subr.mxu1 %v2741_v41 }
 0x514   :  { %1168 = vmatpush1.msra.mxu0 %v2747_v42  ;;  %1239 = vmatpush1.msra.mxu1 %v2885_v9 }
 0x515   :  { %1169 = vmatprep.subr.mxu0 %v2754_v43  ;;  %1240 = vmatprep.subr.mxu1 %v2892_v5 }
 0x516   :  { %1170 = vmatpush1.msra.mxu0 %v2761_v44  ;;  %1241 = vmatpush1.msra.mxu1 %v2899_v10 }
 0x517   :  { %1171 = vmatprep.subr.mxu0 %v2768_v49  ;;  %1242 = vmatprep.subr.mxu1 %v2906_v12 }
 0x518   :  { %1172 = vmatpush1.msra.mxu0 %v2775_v51  ;;  %1243 = vmatpush1.msra.mxu1 %v2913_v14 }
 0x519   :  { %1173 = vmatprep.subr.mxu0 %v2782_v53  ;;  %1244 = vmatprep.subr.mxu1 %v2920_v16  ;;  %v1536_v16 = vld [vmem:[%s3080_s0 + $0xb8] sm:$0xff] }
 0x51a   :  { %1174 = vmatpush1.msra.mxu0 %v3235_v19  ;;  %1245 = vmatpush1.msra.mxu1 %v2927_v17 }
 0x51b   :  { %1175 = vmatprep.subr.mxu0 %v3237_v45  ;;  %1246 = vmatprep.subr.mxu1 %v2934_v47 }
 0x51c   :  { %1176 = vmatpush1.msra.mxu0 %v3239_v50  ;;  %1247 = vmatpush1.msra.mxu1 %v2941_v56  ;;  %v1533_v56 = vld [vmem:[%s3080_s0 + $0xa0] sm:$0xff]  ;;  %v1534_v50 = vld [vmem:[%s3080_s0 + $0xa8] sm:$0xff] }
 0x51d   :  { %1177 = vmatprep.subr.mxu0 %v3241_v58  ;;  %1248 = vmatprep.subr.mxu1 %v2948_v61  ;;  %v3246_v58 = vld [vmem:[#allocation2_spill] sm:$0xff]  ;;  %v3247_v61 = vld [vmem:[#allocation15_spill] sm:$0xff] }
 0x51e   :  { %1178 = vmatpush1.msra.mxu0 %v2954_v18  ;;  %1211 = vmatprep.mubr.f32.mxu0 %v3244_v20 }
 0x51f   :  { %1249 = vmatpush1.msra.mxu1 %v2961_v7  ;;  %1282 = vmatprep.mubr.f32.mxu1 %v3244_v20 }
 0x520   :  { %1322 = vmatprep.subr.mxu0 %v3246_v58  ;;  %1393 = vmatprep.subr.mxu1 %v3247_v61  ;;  %v1535_v58 = vld [vmem:[%s3080_s0 + $0xb0] sm:$0xff] }
 0x5bf   :  { %v1038_v18 = vpop.f32.mrf.mxu0  ;;  %v1109_v61 = vpop.f32.mrf.mxu1 }
 0x5c0   :  { %v1114_v47 = vadd.f32 %v1533_v56, %v1038_v18  ;;  %v1116_v20 = vadd.f32 %v1535_v58, %v1109_v61 }
 0x5c1   :  { %v1040_v45 = vpop.f32.mrf.mxu0  ;;  %v1111_v53 = vpop.f32.mrf.mxu1 }
 0x5c2   :  { %v1537_v17 = vmul.f32 -1.442695, %v1114_v47  ;;  %v1115_v19 = vadd.f32 %v1534_v50, %v1040_v45  ;;  %v1539_v14 = vmul.f32 -1.442695, %v1116_v20  ;;  %v1117_v56 = vadd.f32 %v1536_v16, %v1111_v53  ;;  %v1548_v20 = vld [vmem:[%s3080_s0 + $0xe8] sm:$0xff] }
 0x5c4   :  { %1635 = vpow2.f32 %v1537_v17  ;;  %v1538_v7 = vmul.f32 -1.442695, %v1115_v19 }
 0x5c6   :  { %1637 = vpow2.f32 %v1538_v7 }
 0x5c7   :  { %1639 = vpow2.f32 %v1539_v14 }
 0x5d1   :  { %v1636_v51 = vpop.eup %1635 }
 0x5d2   :  { %v1127_v18 = vadd.f32 1.0, %v1636_v51 }
 0x5d3   :  { %v1638_v47 = vpop.eup %1637 }
 0x5d4   :  { %1641 = vrcp.f32 %v1127_v18  ;;  %v1128_v19 = vadd.f32 1.0, %v1638_v47  ;;  %v1640_v17 = vpop.eup %1639 }
 0x5d5   :  { %1643 = vtanh.f32 %v1117_v56  ;;  %v1129_v58 = vadd.f32 1.0, %v1640_v17  ;;  %v1549_v17 = vld [vmem:[%s3080_s0 + $0xf0] sm:$0xff] }
 0x5d6   :  { %1645 = vrcp.f32 %v1128_v19 }
 0x5d7   :  { %1647 = vrcp.f32 %v1129_v58 }
 0x5e1   :  { %v1642_v45 = vpop.eup %1641 }
 0x5e2   :  { %v1644_v50 = vpop.eup %1643 }
 0x5e3   :  { %v1646_v7 = vpop.eup %1645  ;;  %v1138_v12 = vmul.f32 %v1644_v50, %v1642_v45 }
 0x5e4   :  { %v1137_v61 = vmul.f32 %v1646_v7, %v2838_v2  ;;  %v1648_v51 = vpop.eup %1647  ;;  %v1550_v7 = vld [vmem:[%s3080_s0 + $0xf8] sm:$0xff] }
 0x5e6   :  { %v2980_v49 = vadd.f32 %v1138_v12, %v1137_v61  ;;  %v1547_v12 = vld [vmem:[%s3080_s0 + $0xe0] sm:$0xff] }
 0x5e8   :  { %1649 = vtanh.f32 %v2980_v49 }
 0x5f5   :  { %v1650_v53 = vpop.eup %1649 }
 0x5f6   :  { %v1141_v14 = vmul.f32 %v1650_v53, %v1648_v51 }
 0x5f8   :  { %1212 = vmatmul.mubr.f32.vlgmr.msra.gmra.mxu0 %v1141_v14  ;;  %1283 = vmatmul.mubr.f32.vlgmr.msra.gmra.mxu1 %v1141_v14 }
 0x5f9   :  { %1323 = vmatpush1.msra.mxu0 %v2507_v46  ;;  %1394 = vmatpush1.msra.mxu1 %v2513_v55  ;;  %v3248_v46 = vld [vmem:[#allocation4_spill] sm:$0xff] }
 0x5fa   :  { %1324 = vmatprep.subr.mxu0 %v2519_v57  ;;  %1395 = vmatprep.subr.mxu1 %v2525_v60  ;;  %v3249_v55 = vld [vmem:[#allocation8_spill] sm:$0xff]  ;;  %v3250_v57 = vld [vmem:[#allocation10_spill] sm:$0xff] }
 0x5fb   :  { %1325 = vmatpush1.msra.mxu0 %v2531_v48  ;;  %1396 = vmatpush1.msra.mxu1 %v2537_v52  ;;  %v3251_v60 = vld [vmem:[#allocation16_spill] sm:$0xff]  ;;  %v3252_v48 = vld [vmem:[#allocation5_spill] sm:$0xff] }
 0x5fc   :  { %1326 = vmatprep.subr.mxu0 %v2543_v54  ;;  %1397 = vmatprep.subr.mxu1 %v2549_v63  ;;  %v3253_v52 = vld [vmem:[#allocation9_spill] sm:$0xff]  ;;  %v3254_v54 = vld [vmem:[#allocation12_spill] sm:$0xff] }
 0x5fd   :  { %1327 = vmatpush1.msra.mxu0 %v2555_v3  ;;  %1398 = vmatpush1.msra.mxu1 %v2561_v62  ;;  %v3255_v63 = vld [vmem:[#allocation17_spill] sm:$0xff]  ;;  %v3256_v3 = vld [vmem:[#allocation6_spill] sm:$0xff]  ;;  %v3257_v62 = vld [vmem:[#allocation11_spill] sm:$0xff] }
 0x5fe   :  { %1328 = vmatprep.subr.mxu0 %v2567_v0  ;;  %1399 = vmatprep.subr.mxu1 %v2573_v59  ;;  %v3258_v0 = vld [vmem:[#allocation14_spill] sm:$0xff] }
 0x5ff   :  { %1329 = vmatpush1.msra.mxu0 %v2579_v1  ;;  %1400 = vmatpush1.msra.mxu1 %v2585_v4  ;;  %v3259_v59 = vld [vmem:[#allocation18_spill] sm:$0xff]  ;;  %v3260_v1 = vld [vmem:[#allocation7_spill] sm:$0xff]  ;;  %v3261_v4 = vld [vmem:[#allocation13_spill] sm:$0xff] }
 0x600   :  { %1330 = vmatprep.subr.mxu0 %v2591_v6  ;;  %1401 = vmatprep.subr.mxu1 %v2597_v8  ;;  %v3262_v6 = vld [vmem:[#allocation19_spill] sm:$0xff]  ;;  %v3263_v8 = vmov 0.0  }
 0x601   :  { %1331 = vmatpush1.msra.mxu0 %v2603_v11  ;;  %1402 = vmatpush1.msra.mxu1 %v2609_v13  ;;  %v3264_v11 = vld [vmem:[#allocation3_spill] sm:$0xff]  ;;  %v1540_v13 = vld [vmem:[%s3080_s0 + $0xc0] sm:$0xff] }
 0x602   :  { %1332 = vmatprep.subr.mxu0 %v2615_v15  ;;  %1403 = vmatprep.subr.mxu1 %v2621_v21  ;;  %v1541_v21 = vld [vmem:[%s3080_s0 + $0xc8] sm:$0xff] }
 0x603   :  { %1333 = vmatpush1.msra.mxu0 %v2627_v22  ;;  %1404 = vmatpush1.msra.mxu1 %v2633_v23 }
 0x604   :  { %1334 = vmatprep.subr.mxu0 %v2639_v24  ;;  %1405 = vmatprep.subr.mxu1 %v2645_v25 }
 0x605   :  { %1335 = vmatpush1.msra.mxu0 %v2651_v26  ;;  %1406 = vmatpush1.msra.mxu1 %v2657_v27  ;;  %v1542_v27 = vld [vmem:[%s3080_s0 + $0xd0] sm:$0xff] }
 0x606   :  { %1336 = vmatprep.subr.mxu0 %v2663_v28  ;;  %1407 = vmatprep.subr.mxu1 %v2669_v29 }
 0x607   :  { %1337 = vmatpush1.msra.mxu0 %v2675_v30  ;;  %1408 = vmatpush1.msra.mxu1 %v2681_v31  ;;  %v1543_v30 = vld [vmem:[%s3080_s0 + $0xd8] sm:$0xff] }
 0x608   :  { %1338 = vmatprep.subr.mxu0 %v2687_v32  ;;  %1409 = vmatprep.subr.mxu1 %v2693_v33 }
 0x609   :  { %1339 = vmatpush1.msra.mxu0 %v2699_v34  ;;  %1410 = vmatpush1.msra.mxu1 %v2705_v35 }
 0x60a   :  { %1340 = vmatprep.subr.mxu0 %v2711_v36  ;;  %1411 = vmatprep.subr.mxu1 %v2717_v37 }
 0x60b   :  { %1341 = vmatpush1.msra.mxu0 %v2723_v38  ;;  %1412 = vmatpush1.msra.mxu1 %v2729_v39 }
 0x60c   :  { %1342 = vmatprep.subr.mxu0 %v2735_v40  ;;  %1413 = vmatprep.subr.mxu1 %v2741_v41 }
 0x60d   :  { %1343 = vmatpush1.msra.mxu0 %v2747_v42  ;;  %1414 = vmatpush1.msra.mxu1 %v2885_v9 }
 0x60e   :  { %1344 = vmatprep.subr.mxu0 %v2754_v43  ;;  %1415 = vmatprep.subr.mxu1 %v2892_v5 }
 0x60f   :  { %1345 = vmatpush1.msra.mxu0 %v2761_v44  ;;  %1416 = vmatpush1.msra.mxu1 %v2899_v10 }
 0x610   :  { %1346 = vmatprep.subr.mxu0 %v3248_v46  ;;  %1417 = vmatprep.subr.mxu1 %v3249_v55 }
 0x611   :  { %1347 = vmatpush1.msra.mxu0 %v3250_v57  ;;  %1418 = vmatpush1.msra.mxu1 %v3251_v60 }
 0x612   :  { %1348 = vmatprep.subr.mxu0 %v3252_v48  ;;  %1419 = vmatprep.subr.mxu1 %v3253_v52 }
 0x613   :  { %1349 = vmatpush1.msra.mxu0 %v3254_v54  ;;  %1420 = vmatpush1.msra.mxu1 %v3255_v63 }
 0x614   :  { %1350 = vmatprep.subr.mxu0 %v3256_v3  ;;  %1421 = vmatprep.subr.mxu1 %v3257_v62 }
 0x615   :  { %1351 = vmatpush1.msra.mxu0 %v3258_v0  ;;  %1422 = vmatpush1.msra.mxu1 %v3259_v59 }
 0x616   :  { %1352 = vmatprep.subr.mxu0 %v3260_v1  ;;  %1423 = vmatprep.subr.mxu1 %v3261_v4 }
 0x617   :  { %1353 = vmatpush1.msra.mxu0 %v3262_v6  ;;  %1386 = vmatprep.mubr.f32.mxu0 %v3263_v8 }
 0x618   :  { %1424 = vmatpush1.msra.mxu1 %v3264_v11  ;;  %1457 = vmatprep.mubr.f32.mxu1 %v3263_v8 }
 0x6b8   :  { %v1213_v15 = vpop.f32.mrf.mxu0  ;;  %v1284_v28 = vpop.f32.mrf.mxu1 }
 0x6b9   :  { %v1289_v22 = vadd.f32 %v1540_v13, %v1213_v15  ;;  %v1291_v29 = vadd.f32 %v1542_v27, %v1284_v28 }
 0x6ba   :  { %v1215_v23 = vpop.f32.mrf.mxu0  ;;  %v1286_v31 = vpop.f32.mrf.mxu1 }
 0x6bb   :  { %v1544_v24 = vmul.f32 -1.442695, %v1289_v22  ;;  %v1290_v25 = vadd.f32 %v1541_v21, %v1215_v23  ;;  %v1546_v32 = vmul.f32 -1.442695, %v1291_v29  ;;  %v1292_v34 = vadd.f32 %v1543_v30, %v1286_v31 }
 0x6bd   :  { %1651 = vpow2.f32 %v1544_v24  ;;  %v1545_v26 = vmul.f32 -1.442695, %v1290_v25 }
 0x6bf   :  { %1653 = vpow2.f32 %v1545_v26 }
 0x6c0   :  { %1655 = vpow2.f32 %v1546_v32 }
 0x6ca   :  { %v1652_v33 = vpop.eup %1651 }
 0x6cb   :  { %v1302_v35 = vadd.f32 1.0, %v1652_v33 }
 0x6cc   :  { %v1654_v36 = vpop.eup %1653 }
 0x6cd   :  { %1657 = vrcp.f32 %v1302_v35  ;;  %v1303_v37 = vadd.f32 1.0, %v1654_v36  ;;  %v1656_v38 = vpop.eup %1655 }
 0x6ce   :  { %1659 = vtanh.f32 %v1292_v34  ;;  %v1304_v42 = vadd.f32 1.0, %v1656_v38 }
 0x6cf   :  { %1661 = vrcp.f32 %v1303_v37 }
 0x6d0   :  { %1663 = vrcp.f32 %v1304_v42 }
 0x6da   :  { %v1658_v39 = vpop.eup %1657 }
 0x6db   :  { %v1660_v40 = vpop.eup %1659 }
 0x6dc   :  { %v1662_v41 = vpop.eup %1661  ;;  %v1313_v44 = vmul.f32 %v1660_v40, %v1658_v39 }
 0x6dd   :  { %v1312_v43 = vmul.f32 %v1662_v41, %v2980_v49  ;;  %v1664_v9 = vpop.eup %1663 }
 0x6df   :  { %v1314_v2 = vadd.f32 %v1313_v44, %v1312_v43 }
 0x6e1   :  { %1665 = vtanh.f32 %v1314_v2 }
 0x6ee   :  { %v1666_v5 = vpop.eup %1665 }
 0x6ef   :  { %v1316_v10 = vmul.f32 %v1666_v5, %v1664_v9 }
 0x6f1   :  { %1387 = vmatmul.mubr.f32.vlgmr.msra.gmra.mxu0 %v1316_v10  ;;  %1458 = vmatmul.mubr.f32.vlgmr.msra.gmra.mxu1 %v1316_v10 }
 0x7b1   :  { %v1388_v16 = vpop.f32.mrf.mxu0  ;;  %v1459_v45 = vpop.f32.mrf.mxu1 }
 0x7b2   :  { %v1464_v56 = vadd.f32 %v1547_v12, %v1388_v16  ;;  %v1466_v50 = vadd.f32 %v1549_v17, %v1459_v45 }
 0x7b3   :  { %v1390_v49 = vpop.f32.mrf.mxu0  ;;  %v1461_v58 = vpop.f32.mrf.mxu1 }
 0x7b4   :  { %v1551_v18 = vmul.f32 -1.442695, %v1464_v56  ;;  %v1465_v47 = vadd.f32 %v1548_v20, %v1390_v49  ;;  %v1553_v61 = vmul.f32 -1.442695, %v1466_v50  ;;  %v1467_v53 = vadd.f32 %v1550_v7, %v1461_v58 }
 0x7b6   :  { %1667 = vpow2.f32 %v1551_v18  ;;  %v1552_v19 = vmul.f32 -1.442695, %v1465_v47 }
 0x7b8   :  { %1669 = vpow2.f32 %v1552_v19 }
 0x7b9   :  { %1671 = vpow2.f32 %v1553_v61 }
 0x7c3   :  { %v1668_v51 = vpop.eup %1667 }
 0x7c4   :  { %v1477_v14 = vadd.f32 1.0, %v1668_v51 }
 0x7c5   :  { %v1670_v46 = vpop.eup %1669 }
 0x7c6   :  { %1673 = vrcp.f32 %v1477_v14  ;;  %v1478_v55 = vadd.f32 1.0, %v1670_v46  ;;  %v1672_v57 = vpop.eup %1671 }
 0x7c7   :  { %1675 = vtanh.f32 %v1467_v53  ;;  %v1479_v54 = vadd.f32 1.0, %v1672_v57 }
 0x7c8   :  { %1677 = vrcp.f32 %v1478_v55 }
 0x7c9   :  { %1679 = vrcp.f32 %v1479_v54 }
 0x7d3   :  { %v1674_v60 = vpop.eup %1673 }
 0x7d4   :  { %v1676_v48 = vpop.eup %1675 }
 0x7d5   :  { %v1678_v52 = vpop.eup %1677  ;;  %v1488_v3 = vmul.f32 %v1676_v48, %v1674_v60 }
 0x7d6   :  { %v1487_v63 = vmul.f32 %v1678_v52, %v1314_v2  ;;  %v1680_v0 = vpop.eup %1679 }
 0x7d8   :  { %v1489_v62 = vadd.f32 %v1488_v3, %v1487_v63 }
 0x7da   :  { %1681 = vtanh.f32 %v1489_v62  ;;  %1493 = vst [vmem:[%s3082_s5] sm:$0xff] %v1489_v62 }
 0x7e7   :  { %v1682_v59 = vpop.eup %1681 }
 0x7e8   :  { %v1491_v1 = vmul.f32 %v1682_v59, %v1680_v0 }
 0x7ea   :  { %1492 = vst [vmem:[%s3083_s4] sm:$0xff] %v1491_v1 }

// kernel: encoder_decoder_forward.7
= control target key start
LH: loop header
LB: loop body
LE: loop exit
PB: predicated region body
PF: predicated region fallthrough
CT: control target
= control target key end

     0   :  { %v816_v24 = vmov 1966171168   ;;  %v155_v26 = vlaneseq  ;;  %s1164_s1 = inlined_call_operand.vmem [shape: f32[128,128], index: 1, kind: input, shape index: {}]   ;;  %s1165_s0 = inlined_call_operand.vmem [shape: f32[8,8,128], index: 0, kind: input, shape index: {}]   ;;  %s1166_s2 = inlined_call_operand.vmem [shape: f32[1,128], index: 2, kind: input, shape index: {}]   ;;  %s1167_s3 = inlined_call_operand.vmem [shape: f32[8,8,128], index: 3, kind: output, shape index: {}]  }
   0x1   :  { %v37_v0 = vld [vmem:[%s1164_s1 + $0x78] sm:$0xff]  ;;  %v36_v1 = vld [vmem:[%s1164_s1 + $0x70] sm:$0xff]  ;;  %v35_v2 = vld [vmem:[%s1164_s1 + $0x68] sm:$0xff]  ;;  %v153_v25 = vunpack.c.l.s4 %v816_v24 }
   0x2   :  { %739 = vmatprep.subr.mxu0 %v37_v0  ;;  %783 = vmatprep.subr.mxu1 %v37_v0  ;;  %v34_v3 = vld [vmem:[%s1164_s1 + $0x60] sm:$0xff]  ;;  %v33_v4 = vld [vmem:[%s1164_s1 + $0x58] sm:$0xff]  ;;  %v32_v5 = vld [vmem:[%s1164_s1 + $0x50] sm:$0xff]  ;;  %v156_v28 = vshrl.u32 %v155_v26, 7 }
   0x3   :  { %740 = vmatpush3.msra.mxu0 %v37_v0  ;;  %799 = vmatpush3.msra.mxu1 %v37_v0  ;;  %v31_v6 = vld [vmem:[%s1164_s1 + $0x48] sm:$0xff]  ;;  %v30_v7 = vld [vmem:[%s1164_s1 + $0x40] sm:$0xff]  ;;  %v29_v8 = vld [vmem:[%s1164_s1 + $0x38] sm:$0xff]  ;;  %v154_v27 = vunpack.c.0.s8 %v153_v25 }
   0x4   :  { %741 = vmatprep.subr.mxu0 %v36_v1  ;;  %784 = vmatprep.subr.mxu1 %v36_v1  ;;  %v28_v9 = vld [vmem:[%s1164_s1 + $0x30] sm:$0xff]  ;;  %v27_v10 = vld [vmem:[%s1164_s1 + $0x28] sm:$0xff]  ;;  %v26_v11 = vld [vmem:[%s1164_s1 + $0x20] sm:$0xff] }
   0x5   :  { %742 = vmatpush3.msra.mxu0 %v36_v1  ;;  %800 = vmatpush3.msra.mxu1 %v36_v1  ;;  %v25_v12 = vld [vmem:[%s1164_s1 + $0x18] sm:$0xff]  ;;  %v24_v13 = vld [vmem:[%s1164_s1 + $0x10] sm:$0xff]  ;;  %v23_v14 = vld [vmem:[%s1164_s1 + $0x8] sm:$0xff]  ;;  %v914_v30 = vsub.s32 %v154_v27, %v156_v28 }
   0x6   :  { %743 = vmatprep.subr.mxu0 %v35_v2  ;;  %785 = vmatprep.subr.mxu1 %v35_v2  ;;  %v22_v15 = vld [vmem:[%s1164_s1] sm:$0xff]  ;;  %v15_v18 = vld [vmem:[%s1165_s0 + $0x8] sm:$0xff]  ;;  %v16_v20 = vld [vmem:[%s1165_s0 + $0x10] sm:$0xff] }
   0x7   :  { %744 = vmatpush3.msra.mxu0 %v35_v2  ;;  %801 = vmatpush3.msra.mxu1 %v35_v2  ;;  %v14_v16 = vld [vmem:[%s1165_s0] sm:$0xff]  ;;  %v19_v19 = vld [vmem:[%s1165_s0 + $0x28] sm:$0xff]  ;;  %v20_v21 = vld [vmem:[%s1165_s0 + $0x30] sm:$0xff] }
   0x8   :  { %745 = vmatprep.subr.mxu0 %v34_v3  ;;  %786 = vmatprep.subr.mxu1 %v34_v3  ;;  %v18_v17 = vld [vmem:[%s1165_s0 + $0x20] sm:$0xff]  ;;  %v17_v22 = vld [vmem:[%s1165_s0 + $0x18] sm:$0xff] }
   0x9   :  { %746 = vmatpush3.msra.mxu0 %v34_v3  ;;  %802 = vmatpush3.msra.mxu1 %v34_v3  ;;  %v21_v23 = vld [vmem:[%s1165_s0 + $0x38] sm:$0xff]  ;;  %v912_v29 = vld [vmem:[%s1166_s2] ss:$0 sm:$0xff] }
   0xa   :  { %747 = vmatprep.subr.mxu0 %v33_v4  ;;  %787 = vmatprep.subr.mxu1 %v33_v4 }
   0xb   :  { %748 = vmatpush3.msra.mxu0 %v33_v4  ;;  %803 = vmatpush3.msra.mxu1 %v33_v4 }
   0xc   :  { %749 = vmatprep.subr.mxu0 %v32_v5  ;;  %788 = vmatprep.subr.mxu1 %v32_v5 }
   0xd   :  { %750 = vmatpush3.msra.mxu0 %v32_v5  ;;  %804 = vmatpush3.msra.mxu1 %v32_v5 }
   0xe   :  { %751 = vmatprep.subr.mxu0 %v31_v6  ;;  %789 = vmatprep.subr.mxu1 %v31_v6 }
   0xf   :  { %752 = vmatpush3.msra.mxu0 %v31_v6  ;;  %805 = vmatpush3.msra.mxu1 %v31_v6 }
  0x10   :  { %753 = vmatprep.subr.mxu0 %v30_v7  ;;  %790 = vmatprep.subr.mxu1 %v30_v7 }
  0x11   :  { %754 = vmatpush3.msra.mxu0 %v30_v7  ;;  %806 = vmatpush3.msra.mxu1 %v30_v7 }
  0x12   :  { %755 = vmatprep.subr.mxu0 %v29_v8  ;;  %791 = vmatprep.subr.mxu1 %v29_v8 }
  0x13   :  { %756 = vmatpush3.msra.mxu0 %v29_v8  ;;  %807 = vmatpush3.msra.mxu1 %v29_v8 }
  0x14   :  { %757 = vmatprep.subr.mxu0 %v28_v9  ;;  %792 = vmatprep.subr.mxu1 %v28_v9 }
  0x15   :  { %758 = vmatpush3.msra.mxu0 %v28_v9  ;;  %808 = vmatpush3.msra.mxu1 %v28_v9 }
  0x16   :  { %759 = vmatprep.subr.mxu0 %v27_v10  ;;  %793 = vmatprep.subr.mxu1 %v27_v10 }
  0x17   :  { %760 = vmatpush3.msra.mxu0 %v27_v10  ;;  %809 = vmatpush3.msra.mxu1 %v27_v10 }
  0x18   :  { %761 = vmatprep.subr.mxu0 %v26_v11  ;;  %794 = vmatprep.subr.mxu1 %v26_v11 }
  0x19   :  { %762 = vmatpush3.msra.mxu0 %v26_v11  ;;  %810 = vmatpush3.msra.mxu1 %v26_v11 }
  0x1a   :  { %763 = vmatprep.subr.mxu0 %v25_v12  ;;  %795 = vmatprep.subr.mxu1 %v25_v12 }
  0x1b   :  { %764 = vmatpush3.msra.mxu0 %v25_v12  ;;  %811 = vmatpush3.msra.mxu1 %v25_v12 }
  0x1c   :  { %765 = vmatprep.subr.mxu0 %v24_v13  ;;  %796 = vmatprep.subr.mxu1 %v24_v13 }
  0x1d   :  { %766 = vmatpush3.msra.mxu0 %v24_v13  ;;  %812 = vmatpush3.msra.mxu1 %v24_v13 }
  0x1e   :  { %767 = vmatprep.subr.mxu0 %v23_v14  ;;  %797 = vmatprep.subr.mxu1 %v23_v14 }
  0x1f   :  { %768 = vmatpush3.msra.mxu0 %v23_v14  ;;  %813 = vmatpush3.msra.mxu1 %v23_v14 }
  0x20   :  { %769 = vmatprep.subr.mxu0 %v22_v15  ;;  %798 = vmatprep.subr.mxu1 %v22_v15 }
  0x21   :  { %770 = vmatpush3.msra.mxu0 %v22_v15  ;;  %814 = vmatpush3.msra.mxu1 %v22_v15 }
  0x22   :  { %771 = vmatprep.mubr.f32.mxu0 %v14_v16  ;;  %777 = vmatprep.mubr.f32.mxu1 %v18_v17 }
  0x23   :  { %772 = vmatmul.mubr.f32.vlgmr.msra.gmra.mxu0 %v15_v18  ;;  %778 = vmatmul.mubr.f32.vlgmr.msra.gmra.mxu1 %v19_v19 }
  0x24   :  { %774 = vmatprep.mubr.f32.mxu0 %v16_v20  ;;  %780 = vmatprep.mubr.f32.mxu1 %v20_v21 }
  0x27   :  { %775 = vmatmul.mubr.f32.gmra.mxu0 %v17_v22  ;;  %781 = vmatmul.mubr.f32.gmra.mxu1 %v21_v23 }
  0xe3   :  { %v773_v31 = vpop.f32.mrf.mxu0  ;;  %v779_v32 = vpop.f32.mrf.mxu1 }
  0xe4   :  { %v117_v33 = vadd.f32 %v773_v31, %v912_v29  ;;  %v137_v34 = vadd.f32 %v779_v32, %v912_v29 }
  0xe5   :  { %v111_v35 = vpop.f32.mrf.mxu0  ;;  %v131_v36 = vpop.f32.mrf.mxu1 }
  0xe6   :  { %v217_v37 = vcombine.high %v117_v33, %v117_v33  ;;  %v224_v38 = vrot.slane %v117_v33, %v914_v30  ;;  %v481_v39 = vcombine.high %v137_v34, %v137_v34  ;;  %v488_v40 = vrot.slane %v137_v34, %v914_v30 }
  0xe7   :  { %v112_v41 = vadd.f32 %v912_v29, %v111_v35  ;;  %v132_v42 = vadd.f32 %v912_v29, %v131_v36  ;;  %v776_v3 = vpop.f32.mrf.mxu0  ;;  %v782_v12 = vpop.f32.mrf.mxu1 }
  0xe8   :  { %v231_v43 = vrot.slane %v217_v37, %v914_v30  ;;  %v232_v44 = vcombine.high %v224_v38, %v224_v38  ;;  %v240_v45 = vrot.slane %v224_v38, %v914_v30  ;;  %687 = vst.sshfl [vmem:[%s1167_s3 + $0x1] sm:$0x1 pattern:$0x73625140] %v224_v38  ;;  %v495_v46 = vrot.slane %v481_v39, %v914_v30 }
  0xe9   :  { %703 = vst.sshfl [vmem:[%s1167_s3 + $0x5] sm:$0x1 pattern:$0x73625140] %v488_v40  ;;  %v496_v47 = vcombine.high %v488_v40, %v488_v40  ;;  %v504_v48 = vrot.slane %v488_v40, %v914_v30  ;;  %v151_v49 = vcombine.high %v112_v41, %v112_v41  ;;  %v158_v50 = vrot.slane %v112_v41, %v914_v30  ;;  %v121_v39 = vpop.f32.mrf.mxu0 }
  0xea   :  { %v233_v51 = vcombine.high %v231_v43, %v231_v43  ;;  %v247_v52 = vrot.slane %v231_v43, %v914_v30  ;;  %v254_v53 = vrot.slane %v232_v44, %v914_v30  ;;  %v262_v54 = vcombine.high %v240_v45, %v240_v45  ;;  %688 = vst.sshfl [vmem:[%s1167_s3 + $0x9] sm:$0x1 pattern:$0x73625140] %v232_v44 }
  0xeb   :  { %689 = vst.sshfl [vmem:[%s1167_s3 + $0x21] sm:$0x1 pattern:$0x73625140] %v231_v43  ;;  %v497_v55 = vcombine.high %v495_v46, %v495_v46  ;;  %v511_v56 = vrot.slane %v495_v46, %v914_v30  ;;  %v518_v57 = vrot.slane %v496_v47, %v914_v30  ;;  %v526_v58 = vcombine.high %v504_v48, %v504_v48  ;;  %v141_v48 = vpop.f32.mrf.mxu1 }
  0xec   :  { %705 = vst.sshfl [vmem:[%s1167_s3 + $0x25] sm:$0x1 pattern:$0x73625140] %v495_v46  ;;  %v261_v59 = vrot.slane %v233_v51, %v914_v30  ;;  %v263_v60 = vcombine.high %v247_v52, %v247_v52  ;;  %v264_v61 = vcombine.high %v254_v53, %v254_v53  ;;  %276 = vst [vmem:[%s1167_s3 + $0x11] sm:$0x1] %v262_v54 }
  0xed   :  { %704 = vst.sshfl [vmem:[%s1167_s3 + $0xd] sm:$0x1 pattern:$0x73625140] %v496_v47  ;;  %v165_v62 = vrot.slane %v151_v49, %v914_v30  ;;  %v525_v63 = vrot.slane %v497_v55, %v914_v30  ;;  %v527_v0 = vcombine.high %v511_v56, %v511_v56  ;;  %v528_v1 = vcombine.high %v518_v57, %v518_v57 }
  0xee   :  { %683 = vst.sshfl [vmem:[%s1167_s3] sm:$0x1 pattern:$0x73625140] %v158_v50  ;;  %540 = vst [vmem:[%s1167_s3 + $0x15] sm:$0x1] %v526_v58  ;;  %v166_v2 = vcombine.high %v158_v50, %v158_v50  ;;  %v265_v4 = vcombine.high %v261_v59, %v261_v59  ;;  %v174_v6 = vrot.slane %v158_v50, %v914_v30 }
  0xef   :  { %690 = vst.sshfl [vmem:[%s1167_s3 + $0x29] sm:$0x1 pattern:$0x73625140] %v233_v51  ;;  %277 = vst [vmem:[%s1167_s3 + $0x19] sm:$0x1] %v264_v61  ;;  %v167_v5 = vcombine.high %v165_v62, %v165_v62  ;;  %v181_v7 = vrot.slane %v165_v62, %v914_v30  ;;  %v529_v8 = vcombine.high %v525_v63, %v525_v63 }
  0xf0   :  { %706 = vst.sshfl [vmem:[%s1167_s3 + $0x2d] sm:$0x1 pattern:$0x73625140] %v497_v55  ;;  %280 = vst [vmem:[%s1167_s3 + $0x31] sm:$0x1] %v263_v60  ;;  %v188_v9 = vrot.slane %v166_v2, %v914_v30  ;;  %v415_v10 = vcombine.high %v132_v42, %v132_v42  ;;  %v422_v11 = vrot.slane %v132_v42, %v914_v30 }
  0xf1   :  { %685 = vst.sshfl [vmem:[%s1167_s3 + $0x20] sm:$0x1 pattern:$0x73625140] %v165_v62  ;;  %541 = vst [vmem:[%s1167_s3 + $0x1d] sm:$0x1] %v528_v1  ;;  %v195_v13 = vrot.slane %v167_v5, %v914_v30  ;;  %v196_v14 = vcombine.high %v174_v6, %v174_v6  ;;  %v197_v15 = vcombine.high %v181_v7, %v181_v7 }
  0xf2   :  { %544 = vst [vmem:[%s1167_s3 + $0x35] sm:$0x1] %v527_v0  ;;  %684 = vst.sshfl [vmem:[%s1167_s3 + $0x8] sm:$0x1 pattern:$0x73625140] %v166_v2  ;;  %v127_v16 = vadd.f32 %v776_v3, %v912_v29  ;;  %v198_v17 = vcombine.high %v188_v9, %v188_v9  ;;  %v429_v18 = vrot.slane %v415_v10, %v914_v30 }
  0xf3   :  { %281 = vst [vmem:[%s1167_s3 + $0x39] sm:$0x1] %v265_v4  ;;  %686 = vst.sshfl [vmem:[%s1167_s3 + $0x28] sm:$0x1 pattern:$0x73625140] %v167_v5  ;;  %v430_v19 = vcombine.high %v422_v11, %v422_v11  ;;  %v438_v20 = vrot.slane %v422_v11, %v914_v30  ;;  %v199_v21 = vcombine.high %v195_v13, %v195_v13 }
  0xf4   :  { %545 = vst [vmem:[%s1167_s3 + $0x3d] sm:$0x1] %v529_v8  ;;  %699 = vst.sshfl [vmem:[%s1167_s3 + $0x4] sm:$0x1 pattern:$0x73625140] %v422_v11  ;;  %v349_v22 = vcombine.high %v127_v16, %v127_v16  ;;  %v356_v23 = vrot.slane %v127_v16, %v914_v30  ;;  %v147_v24 = vadd.f32 %v782_v12, %v912_v29 }
  0xf5   :  { %210 = vst [vmem:[%s1167_s3 + $0x10] sm:$0x1] %v196_v14  ;;  %214 = vst [vmem:[%s1167_s3 + $0x30] sm:$0x1] %v197_v15  ;;  %v431_v25 = vcombine.high %v429_v18, %v429_v18  ;;  %v445_v26 = vrot.slane %v429_v18, %v914_v30  ;;  %v452_v27 = vrot.slane %v430_v19, %v914_v30 }
  0xf6   :  { %211 = vst [vmem:[%s1167_s3 + $0x18] sm:$0x1] %v198_v17  ;;  %v460_v28 = vcombine.high %v438_v20, %v438_v20  ;;  %700 = vst.sshfl [vmem:[%s1167_s3 + $0xc] sm:$0x1 pattern:$0x73625140] %v430_v19  ;;  %v363_v31 = vrot.slane %v349_v22, %v914_v30  ;;  %v364_v32 = vcombine.high %v356_v23, %v356_v23 }
  0xf7   :  { %701 = vst.sshfl [vmem:[%s1167_s3 + $0x24] sm:$0x1 pattern:$0x73625140] %v429_v18  ;;  %215 = vst [vmem:[%s1167_s3 + $0x38] sm:$0x1] %v199_v21  ;;  %v372_v33 = vrot.slane %v356_v23, %v914_v30  ;;  %v613_v34 = vcombine.high %v147_v24, %v147_v24  ;;  %v459_v35 = vrot.slane %v431_v25, %v914_v30 }
  0xf8   :  { %695 = vst.sshfl [vmem:[%s1167_s3 + $0x3] sm:$0x1 pattern:$0x73625140] %v356_v23  ;;  %v461_v36 = vcombine.high %v445_v26, %v445_v26  ;;  %v462_v37 = vcombine.high %v452_v27, %v452_v27  ;;  %474 = vst [vmem:[%s1167_s3 + $0x14] sm:$0x1] %v460_v28  ;;  %v620_v38 = vrot.slane %v147_v24, %v914_v30 }
  0xf9   :  { %702 = vst.sshfl [vmem:[%s1167_s3 + $0x2c] sm:$0x1 pattern:$0x73625140] %v431_v25  ;;  %v365_v40 = vcombine.high %v363_v31, %v363_v31  ;;  %v379_v41 = vrot.slane %v363_v31, %v914_v30  ;;  %v386_v42 = vrot.slane %v364_v32, %v914_v30  ;;  %v394_v43 = vcombine.high %v372_v33, %v372_v33 }
  0xfa   :  { %696 = vst.sshfl [vmem:[%s1167_s3 + $0xb] sm:$0x1 pattern:$0x73625140] %v364_v32  ;;  %v463_v44 = vcombine.high %v459_v35, %v459_v35  ;;  %475 = vst [vmem:[%s1167_s3 + $0x1c] sm:$0x1] %v462_v37  ;;  %v627_v45 = vrot.slane %v613_v34, %v914_v30  ;;  %v628_v46 = vcombine.high %v620_v38, %v620_v38 }
  0xfb   :  { %697 = vst.sshfl [vmem:[%s1167_s3 + $0x23] sm:$0x1 pattern:$0x73625140] %v363_v31  ;;  %478 = vst [vmem:[%s1167_s3 + $0x34] sm:$0x1] %v461_v36  ;;  %v636_v47 = vrot.slane %v620_v38, %v914_v30  ;;  %v393_v49 = vrot.slane %v365_v40, %v914_v30  ;;  %v395_v50 = vcombine.high %v379_v41, %v379_v41 }
  0xfc   :  { %711 = vst.sshfl [vmem:[%s1167_s3 + $0x7] sm:$0x1 pattern:$0x73625140] %v620_v38  ;;  %v396_v51 = vcombine.high %v386_v42, %v386_v42  ;;  %408 = vst [vmem:[%s1167_s3 + $0x13] sm:$0x1] %v394_v43  ;;  %v122_v52 = vadd.f32 %v912_v29, %v121_v39  ;;  %v629_v53 = vcombine.high %v627_v45, %v627_v45 }
  0xfd   :  { %698 = vst.sshfl [vmem:[%s1167_s3 + $0x2b] sm:$0x1 pattern:$0x73625140] %v365_v40  ;;  %479 = vst [vmem:[%s1167_s3 + $0x3c] sm:$0x1] %v463_v44  ;;  %v643_v54 = vrot.slane %v627_v45, %v914_v30  ;;  %v650_v55 = vrot.slane %v628_v46, %v914_v30  ;;  %v658_v56 = vcombine.high %v636_v47, %v636_v47 }
  0xfe   :  { %712 = vst.sshfl [vmem:[%s1167_s3 + $0xf] sm:$0x1 pattern:$0x73625140] %v628_v46  ;;  %v397_v57 = vcombine.high %v393_v49, %v393_v49  ;;  %409 = vst [vmem:[%s1167_s3 + $0x1b] sm:$0x1] %v396_v51  ;;  %v283_v58 = vcombine.high %v122_v52, %v122_v52  ;;  %v290_v59 = vrot.slane %v122_v52, %v914_v30 }
  0xff   :  { %713 = vst.sshfl [vmem:[%s1167_s3 + $0x27] sm:$0x1 pattern:$0x73625140] %v627_v45  ;;  %412 = vst [vmem:[%s1167_s3 + $0x33] sm:$0x1] %v395_v50  ;;  %v142_v60 = vadd.f32 %v912_v29, %v141_v48  ;;  %v657_v61 = vrot.slane %v629_v53, %v914_v30  ;;  %v659_v62 = vcombine.high %v643_v54, %v643_v54 }
 0x100   :  { %v660_v63 = vcombine.high %v650_v55, %v650_v55  ;;  %672 = vst [vmem:[%s1167_s3 + $0x17] sm:$0x1] %v658_v56  ;;  %714 = vst.sshfl [vmem:[%s1167_s3 + $0x2f] sm:$0x1 pattern:$0x73625140] %v629_v53  ;;  %v297_v0 = vrot.slane %v283_v58, %v914_v30  ;;  %v298_v1 = vcombine.high %v290_v59, %v290_v59 }
 0x101   :  { %413 = vst [vmem:[%s1167_s3 + $0x3b] sm:$0x1] %v397_v57  ;;  %v306_v29 = vrot.slane %v290_v59, %v914_v30  ;;  %691 = vst.sshfl [vmem:[%s1167_s3 + $0x2] sm:$0x1 pattern:$0x73625140] %v290_v59  ;;  %v547_v2 = vcombine.high %v142_v60, %v142_v60  ;;  %v661_v3 = vcombine.high %v657_v61, %v657_v61 }
 0x102   :  { %673 = vst [vmem:[%s1167_s3 + $0x1f] sm:$0x1] %v660_v63  ;;  %676 = vst [vmem:[%s1167_s3 + $0x37] sm:$0x1] %v659_v62  ;;  %v554_v4 = vrot.slane %v142_v60, %v914_v30  ;;  %v299_v5 = vcombine.high %v297_v0, %v297_v0  ;;  %v313_v6 = vrot.slane %v297_v0, %v914_v30 }
 0x103   :  { %v320_v7 = vrot.slane %v298_v1, %v914_v30  ;;  %v328_v8 = vcombine.high %v306_v29, %v306_v29  ;;  %692 = vst.sshfl [vmem:[%s1167_s3 + $0xa] sm:$0x1 pattern:$0x73625140] %v298_v1  ;;  %677 = vst [vmem:[%s1167_s3 + $0x3f] sm:$0x1] %v661_v3  ;;  %v561_v9 = vrot.slane %v547_v2, %v914_v30 }
 0x104   :  { %693 = vst.sshfl [vmem:[%s1167_s3 + $0x22] sm:$0x1 pattern:$0x73625140] %v297_v0  ;;  %v562_v10 = vcombine.high %v554_v4, %v554_v4  ;;  %v570_v11 = vrot.slane %v554_v4, %v914_v30  ;;  %v327_v12 = vrot.slane %v299_v5, %v914_v30  ;;  %v329_v13 = vcombine.high %v313_v6, %v313_v6 }
 0x105   :  { %707 = vst.sshfl [vmem:[%s1167_s3 + $0x6] sm:$0x1 pattern:$0x73625140] %v554_v4  ;;  %v330_v14 = vcombine.high %v320_v7, %v320_v7  ;;  %342 = vst [vmem:[%s1167_s3 + $0x12] sm:$0x1] %v328_v8  ;;  %v563_v15 = vcombine.high %v561_v9, %v561_v9  ;;  %v577_v16 = vrot.slane %v561_v9, %v914_v30 }
 0x106   :  { %694 = vst.sshfl [vmem:[%s1167_s3 + $0x2a] sm:$0x1 pattern:$0x73625140] %v299_v5  ;;  %v584_v17 = vrot.slane %v562_v10, %v914_v30  ;;  %v592_v18 = vcombine.high %v570_v11, %v570_v11  ;;  %v331_v19 = vcombine.high %v327_v12, %v327_v12  ;;  %346 = vst [vmem:[%s1167_s3 + $0x32] sm:$0x1] %v329_v13 }
 0x107   :  { %708 = vst.sshfl [vmem:[%s1167_s3 + $0xe] sm:$0x1 pattern:$0x73625140] %v562_v10  ;;  %343 = vst [vmem:[%s1167_s3 + $0x1a] sm:$0x1] %v330_v14  ;;  %v591_v20 = vrot.slane %v563_v15, %v914_v30  ;;  %v593_v21 = vcombine.high %v577_v16, %v577_v16 }
 0x108   :  { %709 = vst.sshfl [vmem:[%s1167_s3 + $0x26] sm:$0x1 pattern:$0x73625140] %v561_v9  ;;  %v594_v22 = vcombine.high %v584_v17, %v584_v17  ;;  %606 = vst [vmem:[%s1167_s3 + $0x16] sm:$0x1] %v592_v18 }
 0x109   :  { %710 = vst.sshfl [vmem:[%s1167_s3 + $0x2e] sm:$0x1 pattern:$0x73625140] %v563_v15  ;;  %347 = vst [vmem:[%s1167_s3 + $0x3a] sm:$0x1] %v331_v19  ;;  %v595_v23 = vcombine.high %v591_v20, %v591_v20 }
 0x10a   :  { %607 = vst [vmem:[%s1167_s3 + $0x1e] sm:$0x1] %v594_v22  ;;  %610 = vst [vmem:[%s1167_s3 + $0x36] sm:$0x1] %v593_v21 }
 0x10b   :  { %611 = vst [vmem:[%s1167_s3 + $0x3e] sm:$0x1] %v595_v23 }

// kernel: encoder_decoder_forward.6
= control target key start
LH: loop header
LB: loop body
LE: loop exit
PB: predicated region body
PF: predicated region fallthrough
CT: control target
= control target key end

     0   :  { %v3141_v3 = vmov 0.0   ;;  %s3134_s3 = inlined_call_operand.vmem [shape: f32[128,512], index: 3, kind: input, shape index: {}]   ;;  %s3135_s1 = inlined_call_operand.vmem [shape: f32[8,128], index: 1, kind: input, shape index: {}]   ;;  %s3136_s0 = inlined_call_operand.vmem [shape: f32[8,8,512], index: 0, kind: input, shape index: {}]   ;;  %s3137_s2 = inlined_call_operand.vmem [shape: f32[8,128], index: 2, kind: input, shape index: {}]   ;;  %s3138_s4 = inlined_call_operand.vmem [shape: f32[8,8,128], index: 4, kind: output, shape index: {0}]   ;;  %s3139_s6 = inlined_call_operand.vmem [shape: f32[8,128], index: 6, kind: output, shape index: {2}]   ;;  %s3140_s5 = inlined_call_operand.vmem [shape: f32[8,128], index: 5, kind: output, shape index: {1}]  }
   0x1   :  { %v1813_v0 = vld [vmem:[%s3134_s3 + $0x1e8] sm:$0xff]  ;;  %v1818_v1 = vld [vmem:[%s3134_s3 + $0x1e0] sm:$0xff]  ;;  %162 = vmatprep.mubr.f32.mxu0 %v3141_v3  ;;  %233 = vmatprep.mubr.f32.mxu1 %v3141_v3  ;;  %v1860_v9 = vld [vmem:[%s3134_s3 + $0x1f8] sm:$0xff] }
   0x2   :  { %3210 = vst [vmem:[#allocation2_spill] sm:$0xff] %v1813_v0  ;;  %v1823_v2 = vld [vmem:[%s3134_s3 + $0x1c8] sm:$0xff]  ;;  %98 = vmatprep.subr.mxu0 %v1813_v0  ;;  %v1831_v4 = vld [vmem:[%s3134_s3 + $0x1c0] sm:$0xff]  ;;  %3211 = vst [vmem:[#allocation3_spill] sm:$0xff] %v1860_v9  ;;  %169 = vmatprep.subr.mxu1 %v1860_v9 }
   0x3   :  { %99 = vmatpush1.msra.mxu0 %v1818_v1  ;;  %v1837_v5 = vld [vmem:[%s3134_s3 + $0x1a8] sm:$0xff]  ;;  %v1843_v6 = vld [vmem:[%s3134_s3 + $0x1a0] sm:$0xff]  ;;  %v1872_v11 = vld [vmem:[%s3134_s3 + $0x1f0] sm:$0xff] }
   0x4   :  { %100 = vmatprep.subr.mxu0 %v1823_v2  ;;  %v1849_v7 = vld [vmem:[%s3134_s3 + $0x188] sm:$0xff]  ;;  %v1855_v8 = vld [vmem:[%s3134_s3 + $0x180] sm:$0xff]  ;;  %170 = vmatpush1.msra.mxu1 %v1872_v11  ;;  %v1884_v13 = vld [vmem:[%s3134_s3 + $0x1d8] sm:$0xff] }
   0x5   :  { %101 = vmatpush1.msra.mxu0 %v1831_v4  ;;  %v1866_v10 = vld [vmem:[%s3134_s3 + $0x168] sm:$0xff]  ;;  %v1878_v12 = vld [vmem:[%s3134_s3 + $0x160] sm:$0xff]  ;;  %v1889_v14 = vld [vmem:[%s3134_s3 + $0x1d0] sm:$0xff]  ;;  %171 = vmatprep.subr.mxu1 %v1884_v13 }
   0x6   :  { %102 = vmatprep.subr.mxu0 %v1837_v5  ;;  %v1895_v15 = vld [vmem:[%s3134_s3 + $0x148] sm:$0xff]  ;;  %v1901_v16 = vld [vmem:[%s3134_s3 + $0x1b8] sm:$0xff]  ;;  %v1907_v17 = vld [vmem:[%s3134_s3 + $0x140] sm:$0xff]  ;;  %172 = vmatpush1.msra.mxu1 %v1889_v14 }
   0x7   :  { %103 = vmatpush1.msra.mxu0 %v1843_v6  ;;  %v1913_v18 = vld [vmem:[%s3134_s3 + $0x1b0] sm:$0xff]  ;;  %v1918_v19 = vld [vmem:[%s3134_s3 + $0x198] sm:$0xff]  ;;  %v1924_v20 = vld [vmem:[%s3134_s3 + $0x128] sm:$0xff]  ;;  %173 = vmatprep.subr.mxu1 %v1901_v16 }
   0x8   :  { %104 = vmatprep.subr.mxu0 %v1849_v7  ;;  %v1930_v21 = vld [vmem:[%s3134_s3 + $0x190] sm:$0xff]  ;;  %v1936_v22 = vld [vmem:[%s3134_s3 + $0x120] sm:$0xff]  ;;  %174 = vmatpush1.msra.mxu1 %v1913_v18  ;;  %v1942_v23 = vld [vmem:[%s3134_s3 + $0x178] sm:$0xff] }
   0x9   :  { %105 = vmatpush1.msra.mxu0 %v1855_v8  ;;  %v1948_v24 = vld [vmem:[%s3134_s3 + $0x108] sm:$0xff]  ;;  %175 = vmatprep.subr.mxu1 %v1918_v19  ;;  %v1954_v25 = vld [vmem:[%s3134_s3 + $0x170] sm:$0xff]  ;;  %v1960_v26 = vld [vmem:[%s3134_s3 + $0x100] sm:$0xff] }
   0xa   :  { %106 = vmatprep.subr.mxu0 %v1866_v10  ;;  %176 = vmatpush1.msra.mxu1 %v1930_v21  ;;  %v1966_v27 = vld [vmem:[%s3134_s3 + $0x158] sm:$0xff]  ;;  %v1972_v28 = vld [vmem:[%s3134_s3 + $0xe8] sm:$0xff]  ;;  %v1978_v29 = vld [vmem:[%s3134_s3 + $0x150] sm:$0xff] }
   0xb   :  { %107 = vmatpush1.msra.mxu0 %v1878_v12  ;;  %177 = vmatprep.subr.mxu1 %v1942_v23  ;;  %v1984_v30 = vld [vmem:[%s3134_s3 + $0xe0] sm:$0xff]  ;;  %v1990_v31 = vld [vmem:[%s3134_s3 + $0x138] sm:$0xff]  ;;  %v1996_v32 = vld [vmem:[%s3134_s3 + $0xc8] sm:$0xff] }
   0xc   :  { %108 = vmatprep.subr.mxu0 %v1895_v15  ;;  %178 = vmatpush1.msra.mxu1 %v1954_v25  ;;  %v2002_v33 = vld [vmem:[%s3134_s3 + $0x130] sm:$0xff]  ;;  %v2008_v34 = vld [vmem:[%s3134_s3 + $0xc0] sm:$0xff]  ;;  %v2014_v35 = vld [vmem:[%s3134_s3 + $0x118] sm:$0xff] }
   0xd   :  { %109 = vmatpush1.msra.mxu0 %v1907_v17  ;;  %179 = vmatprep.subr.mxu1 %v1966_v27  ;;  %v2020_v36 = vld [vmem:[%s3134_s3 + $0xa8] sm:$0xff]  ;;  %v2026_v37 = vld [vmem:[%s3134_s3 + $0x110] sm:$0xff]  ;;  %v2032_v38 = vld [vmem:[%s3134_s3 + $0xa0] sm:$0xff] }
   0xe   :  { %110 = vmatprep.subr.mxu0 %v1924_v20  ;;  %180 = vmatpush1.msra.mxu1 %v1978_v29  ;;  %v2038_v39 = vld [vmem:[%s3134_s3 + $0xf8] sm:$0xff]  ;;  %v2044_v40 = vld [vmem:[%s3134_s3 + $0x88] sm:$0xff]  ;;  %v2050_v41 = vld [vmem:[%s3134_s3 + $0xf0] sm:$0xff] }
   0xf   :  { %111 = vmatpush1.msra.mxu0 %v1936_v22  ;;  %181 = vmatprep.subr.mxu1 %v1990_v31  ;;  %v2056_v42 = vld [vmem:[%s3134_s3 + $0x80] sm:$0xff]  ;;  %v2062_v43 = vld [vmem:[%s3134_s3 + $0xd8] sm:$0xff]  ;;  %v2068_v44 = vld [vmem:[%s3134_s3 + $0x68] sm:$0xff] }
  0x10   :  { %112 = vmatprep.subr.mxu0 %v1948_v24  ;;  %182 = vmatpush1.msra.mxu1 %v2002_v33  ;;  %3212 = vst [vmem:[#allocation4_spill] sm:$0xff] %v2068_v44  ;;  %v2074_v45 = vld [vmem:[%s3134_s3 + $0xd0] sm:$0xff]  ;;  %v2080_v46 = vld [vmem:[%s3134_s3 + $0x60] sm:$0xff]  ;;  %v2086_v47 = vld [vmem:[%s3134_s3 + $0xb8] sm:$0xff] }
  0x11   :  { %113 = vmatpush1.msra.mxu0 %v1960_v26  ;;  %183 = vmatprep.subr.mxu1 %v2014_v35  ;;  %3213 = vst [vmem:[#allocation5_spill] sm:$0xff] %v2080_v46  ;;  %v2092_v48 = vld [vmem:[%s3134_s3 + $0x48] sm:$0xff]  ;;  %v2098_v49 = vld [vmem:[%s3134_s3 + $0xb0] sm:$0xff]  ;;  %v2104_v50 = vld [vmem:[%s3134_s3 + $0x40] sm:$0xff] }
  0x12   :  { %114 = vmatprep.subr.mxu0 %v1972_v28  ;;  %184 = vmatpush1.msra.mxu1 %v2026_v37  ;;  %3214 = vst [vmem:[#allocation6_spill] sm:$0xff] %v2092_v48  ;;  %3215 = vst [vmem:[#allocation7_spill] sm:$0xff] %v2104_v50  ;;  %v2110_v51 = vld [vmem:[%s3134_s3 + $0x98] sm:$0xff]  ;;  %v2116_v52 = vld [vmem:[%s3134_s3 + $0x28] sm:$0xff] }
  0x13   :  { %115 = vmatpush1.msra.mxu0 %v1984_v30  ;;  %185 = vmatprep.subr.mxu1 %v2038_v39  ;;  %3216 = vst [vmem:[#allocation8_spill] sm:$0xff] %v2116_v52  ;;  %v2122_v53 = vld [vmem:[%s3134_s3 + $0x90] sm:$0xff]  ;;  %v2128_v54 = vld [vmem:[%s3134_s3 + $0x20] sm:$0xff]  ;;  %v2134_v55 = vld [vmem:[%s3134_s3 + $0x78] sm:$0xff] }
  0x14   :  { %116 = vmatprep.subr.mxu0 %v1996_v32  ;;  %186 = vmatpush1.msra.mxu1 %v2050_v41  ;;  %3217 = vst [vmem:[#allocation9_spill] sm:$0xff] %v2128_v54  ;;  %3218 = vst [vmem:[#allocation10_spill] sm:$0xff] %v2134_v55  ;;  %v2140_v56 = vld [vmem:[%s3134_s3 + $0x8] sm:$0xff]  ;;  %v2146_v57 = vld [vmem:[%s3134_s3 + $0x70] sm:$0xff] }
  0x15   :  { %117 = vmatpush1.msra.mxu0 %v2008_v34  ;;  %187 = vmatprep.subr.mxu1 %v2062_v43  ;;  %3219 = vst [vmem:[#allocation11_spill] sm:$0xff] %v2140_v56  ;;  %3220 = vst [vmem:[#allocation12_spill] sm:$0xff] %v2146_v57  ;;  %v2152_v58 = vld [vmem:[%s3134_s3] sm:$0xff]  ;;  %v2158_v59 = vld [vmem:[%s3134_s3 + $0x58] sm:$0xff] }
  0x16   :  { %118 = vmatprep.subr.mxu0 %v2020_v36  ;;  %188 = vmatpush1.msra.mxu1 %v2074_v45  ;;  %3221 = vst [vmem:[#allocation13_spill] sm:$0xff] %v2152_v58  ;;  %3222 = vst [vmem:[#allocation14_spill] sm:$0xff] %v2158_v59  ;;  %v24_v60 = vld [vmem:[%s3135_s1] sm:$0xff]  ;;  %v2168_v61 = vld [vmem:[%s3134_s3 + $0x50] sm:$0xff] }
  0x17   :  { %119 = vmatpush1.msra.mxu0 %v2032_v38  ;;  %189 = vmatprep.subr.mxu1 %v2086_v47  ;;  %3223 = vst [vmem:[#allocation15_spill] sm:$0xff] %v2168_v61  ;;  %v2175_v62 = vld [vmem:[%s3134_s3 + $0x38] sm:$0xff]  ;;  %v2182_v63 = vld [vmem:[%s3134_s3 + $0x30] sm:$0xff] }
  0x18   :  { %120 = vmatprep.subr.mxu0 %v2044_v40  ;;  %190 = vmatpush1.msra.mxu1 %v2098_v49  ;;  %3224 = vst [vmem:[#allocation16_spill] sm:$0xff] %v2175_v62  ;;  %3225 = vst [vmem:[#allocation17_spill] sm:$0xff] %v2182_v63  ;;  %v2188_v3 = vld [vmem:[%s3134_s3 + $0x18] sm:$0xff] }
  0x19   :  { %121 = vmatpush1.msra.mxu0 %v2056_v42  ;;  %191 = vmatprep.subr.mxu1 %v2110_v51  ;;  %3226 = vst [vmem:[#allocation18_spill] sm:$0xff] %v2188_v3 }
  0x1a   :  { %122 = vmatprep.subr.mxu0 %v2068_v44  ;;  %192 = vmatpush1.msra.mxu1 %v2122_v53 }
  0x1b   :  { %123 = vmatpush1.msra.mxu0 %v2080_v46  ;;  %193 = vmatprep.subr.mxu1 %v2134_v55 }
  0x1c   :  { %124 = vmatprep.subr.mxu0 %v2092_v48  ;;  %194 = vmatpush1.msra.mxu1 %v2146_v57 }
  0x1d   :  { %125 = vmatpush1.msra.mxu0 %v2104_v50  ;;  %195 = vmatprep.subr.mxu1 %v2158_v59 }
  0x1e   :  { %126 = vmatprep.subr.mxu0 %v2116_v52  ;;  %196 = vmatpush1.msra.mxu1 %v2168_v61 }
  0x1f   :  { %127 = vmatpush1.msra.mxu0 %v2128_v54  ;;  %197 = vmatprep.subr.mxu1 %v2175_v62 }
  0x20   :  { %128 = vmatprep.subr.mxu0 %v2140_v56  ;;  %198 = vmatpush1.msra.mxu1 %v2182_v63 }
  0x21   :  { %129 = vmatpush1.msra.mxu0 %v2152_v58  ;;  %v2194_v58 = vld [vmem:[%s3134_s3 + $0x10] sm:$0xff]  ;;  %199 = vmatprep.subr.mxu1 %v2188_v3 }
  0x22   :  { %163 = vmatmul.mubr.f32.vlgmr.msra.gmra.mxu0 %v24_v60  ;;  %3227 = vst [vmem:[#allocation19_spill] sm:$0xff] %v2194_v58  ;;  %274 = vmatprep.subr.mxu0 %v1813_v0 }
  0x23   :  { %275 = vmatpush1.msra.mxu0 %v1818_v1  ;;  %200 = vmatpush1.msra.mxu1 %v2194_v58 }
  0x24   :  { %276 = vmatprep.subr.mxu0 %v1823_v2  ;;  %234 = vmatmul.mubr.f32.vlgmr.msra.gmra.mxu1 %v24_v60  ;;  %v3228_v60 = vld [vmem:[#allocation13_spill] sm:$0xff] }
  0x25   :  { %277 = vmatpush1.msra.mxu0 %v1831_v4  ;;  %345 = vmatprep.subr.mxu1 %v1860_v9 }
  0x26   :  { %346 = vmatpush1.msra.mxu1 %v1872_v11  ;;  %278 = vmatprep.subr.mxu0 %v1837_v5 }
  0x27   :  { %347 = vmatprep.subr.mxu1 %v1884_v13  ;;  %279 = vmatpush1.msra.mxu0 %v1843_v6 }
  0x28   :  { %348 = vmatpush1.msra.mxu1 %v1889_v14  ;;  %280 = vmatprep.subr.mxu0 %v1849_v7 }
  0x29   :  { %349 = vmatprep.subr.mxu1 %v1901_v16  ;;  %281 = vmatpush1.msra.mxu0 %v1855_v8 }
  0x2a   :  { %350 = vmatpush1.msra.mxu1 %v1913_v18  ;;  %282 = vmatprep.subr.mxu0 %v1866_v10 }
  0x2b   :  { %351 = vmatprep.subr.mxu1 %v1918_v19  ;;  %283 = vmatpush1.msra.mxu0 %v1878_v12 }
  0x2c   :  { %352 = vmatpush1.msra.mxu1 %v1930_v21  ;;  %284 = vmatprep.subr.mxu0 %v1895_v15 }
  0x2d   :  { %353 = vmatprep.subr.mxu1 %v1942_v23  ;;  %285 = vmatpush1.msra.mxu0 %v1907_v17 }
  0x2e   :  { %354 = vmatpush1.msra.mxu1 %v1954_v25  ;;  %286 = vmatprep.subr.mxu0 %v1924_v20 }
  0x2f   :  { %355 = vmatprep.subr.mxu1 %v1966_v27  ;;  %287 = vmatpush1.msra.mxu0 %v1936_v22 }
  0x30   :  { %356 = vmatpush1.msra.mxu1 %v1978_v29  ;;  %288 = vmatprep.subr.mxu0 %v1948_v24 }
  0x31   :  { %357 = vmatprep.subr.mxu1 %v1990_v31  ;;  %289 = vmatpush1.msra.mxu0 %v1960_v26 }
  0x32   :  { %358 = vmatpush1.msra.mxu1 %v2002_v33  ;;  %290 = vmatprep.subr.mxu0 %v1972_v28 }
  0x33   :  { %359 = vmatprep.subr.mxu1 %v2014_v35  ;;  %291 = vmatpush1.msra.mxu0 %v1984_v30 }
  0x34   :  { %360 = vmatpush1.msra.mxu1 %v2026_v37  ;;  %292 = vmatprep.subr.mxu0 %v1996_v32 }
  0x35   :  { %361 = vmatprep.subr.mxu1 %v2038_v39  ;;  %293 = vmatpush1.msra.mxu0 %v2008_v34 }
  0x36   :  { %362 = vmatpush1.msra.mxu1 %v2050_v41  ;;  %294 = vmatprep.subr.mxu0 %v2020_v36 }
  0x37   :  { %363 = vmatprep.subr.mxu1 %v2062_v43  ;;  %295 = vmatpush1.msra.mxu0 %v2032_v38 }
  0x38   :  { %364 = vmatpush1.msra.mxu1 %v2074_v45  ;;  %296 = vmatprep.subr.mxu0 %v2044_v40 }
  0x39   :  { %365 = vmatprep.subr.mxu1 %v2086_v47  ;;  %297 = vmatpush1.msra.mxu0 %v2056_v42 }
  0x3a   :  { %366 = vmatpush1.msra.mxu1 %v2098_v49  ;;  %298 = vmatprep.subr.mxu0 %v2068_v44 }
  0x3b   :  { %367 = vmatprep.subr.mxu1 %v2110_v51  ;;  %299 = vmatpush1.msra.mxu0 %v2080_v46 }
  0x3c   :  { %368 = vmatpush1.msra.mxu1 %v2122_v53  ;;  %300 = vmatprep.subr.mxu0 %v2092_v48  ;;  %v3229_v48 = vmov 0.0  }
  0x3d   :  { %369 = vmatprep.subr.mxu1 %v2134_v55  ;;  %301 = vmatpush1.msra.mxu0 %v2104_v50 }
  0x3e   :  { %370 = vmatpush1.msra.mxu1 %v2146_v57  ;;  %302 = vmatprep.subr.mxu0 %v2116_v52 }
  0x3f   :  { %371 = vmatprep.subr.mxu1 %v2158_v59  ;;  %303 = vmatpush1.msra.mxu0 %v2128_v54 }
  0x40   :  { %372 = vmatpush1.msra.mxu1 %v2168_v61  ;;  %304 = vmatprep.subr.mxu0 %v2140_v56  ;;  %v94_v56 = vld [vmem:[%s3136_s0] sm:$0xff]  ;;  %v97_v61 = vld [vmem:[%s3136_s0 + $0x18] sm:$0xff] }
  0x41   :  { %373 = vmatprep.subr.mxu1 %v2175_v62  ;;  %305 = vmatpush1.msra.mxu0 %v3228_v60  ;;  %v95_v60 = vld [vmem:[%s3136_s0 + $0x8] sm:$0xff] }
  0x42   :  { %374 = vmatpush1.msra.mxu1 %v2182_v63  ;;  %338 = vmatprep.mubr.f32.mxu0 %v3229_v48 }
  0x43   :  { %375 = vmatprep.subr.mxu1 %v2188_v3  ;;  %409 = vmatprep.mubr.f32.mxu1 %v3229_v48 }
  0x44   :  { %376 = vmatpush1.msra.mxu1 %v2194_v58  ;;  %451 = vmatprep.subr.mxu0 %v1813_v0 }
  0x45   :  { %522 = vmatprep.subr.mxu1 %v1860_v9  ;;  %v96_v9 = vld [vmem:[%s3136_s0 + $0x10] sm:$0xff] }
  0xe2   :  { %v164_v54 = vpop.f32.mrf.mxu0 }
  0xe3   :  { %v240_v63 = vadd.f32 %v164_v54, %v94_v56 }
  0xe4   :  { %v166_v62 = vpop.f32.mrf.mxu0  ;;  %v235_v0 = vpop.f32.mrf.mxu1 }
  0xe5   :  { %v1522_v3 = vmul.f32 -1.442695, %v240_v63  ;;  %v241_v52 = vadd.f32 %v166_v62, %v95_v60  ;;  %v242_v58 = vadd.f32 %v235_v0, %v96_v9  ;;  %v26_v0 = vld [vmem:[%s3137_s2] sm:$0xff] }
  0xe6   :  { %v237_v50 = vpop.f32.mrf.mxu1 }
  0xe7   :  { %1582 = vpow2.f32 %v1522_v3  ;;  %v1523_v48 = vmul.f32 -1.442695, %v241_v52  ;;  %v1524_v59 = vmul.f32 -1.442695, %v242_v58  ;;  %v243_v57 = vadd.f32 %v237_v50, %v97_v61 }
  0xe9   :  { %1584 = vpow2.f32 %v1523_v48 }
  0xea   :  { %1586 = vpow2.f32 %v1524_v59 }
  0xeb   :  { %1588 = vtanh.f32 %v243_v57 }
  0xf4   :  { %v1583_v54 = vpop.eup %1582 }
  0xf5   :  { %v253_v56 = vadd.f32 1.0, %v1583_v54  ;;  %v3231_v54 = vld [vmem:[#allocation12_spill] sm:$0xff] }
  0xf6   :  { %v1585_v62 = vpop.eup %1584 }
  0xf7   :  { %1590 = vrcp.f32 %v253_v56  ;;  %v254_v3 = vadd.f32 1.0, %v1585_v62  ;;  %v1587_v48 = vpop.eup %1586  ;;  %v3232_v56 = vld [vmem:[#allocation6_spill] sm:$0xff] }
  0xf8   :  { %v1589_v52 = vpop.eup %1588  ;;  %v255_v60 = vadd.f32 1.0, %v1587_v48  ;;  %v3233_v62 = vld [vmem:[#allocation14_spill] sm:$0xff]  ;;  %v3235_v48 = vld [vmem:[#allocation15_spill] sm:$0xff] }
  0xf9   :  { %1592 = vrcp.f32 %v254_v3  ;;  %v3234_v3 = vld [vmem:[#allocation7_spill] sm:$0xff] }
  0xfa   :  { %1594 = vrcp.f32 %v255_v60  ;;  %v3240_v60 = vld [vmem:[#allocation11_spill] sm:$0xff] }
 0x104   :  { %v1591_v63 = vpop.eup %1590 }
 0x105   :  { %v264_v58 = vmul.f32 %v1591_v63, %v1589_v52  ;;  %v3236_v52 = vld [vmem:[#allocation8_spill] sm:$0xff] }
 0x106   :  { %v1593_v9 = vpop.eup %1592  ;;  %v3237_v63 = vld [vmem:[#allocation16_spill] sm:$0xff] }
 0x107   :  { %v263_v46 = vmul.f32 %v1593_v9, %v26_v0  ;;  %v1595_v57 = vpop.eup %1594  ;;  %v3238_v0 = vld [vmem:[#allocation9_spill] sm:$0xff] }
 0x108   :  { %v3239_v9 = vld [vmem:[#allocation17_spill] sm:$0xff] }
 0x109   :  { %v2282_v50 = vadd.f32 %v264_v58, %v263_v46  ;;  %v3230_v46 = vld [vmem:[#allocation5_spill] sm:$0xff]  ;;  %v3241_v58 = vld [vmem:[#allocation18_spill] sm:$0xff] }
 0x10b   :  { %1596 = vtanh.f32 %v2282_v50 }
 0x118   :  { %v1597_v59 = vpop.eup %1596 }
 0x119   :  { %v267_v61 = vmul.f32 %v1597_v59, %v1595_v57  ;;  %v3242_v57 = vld [vmem:[#allocation13_spill] sm:$0xff]  ;;  %v3243_v59 = vmov 0.0  }
 0x11b   :  { %268 = vst [vmem:[%s3138_s4] sm:$0xff] %v267_v61  ;;  %339 = vmatmul.mubr.f32.vlgmr.msra.gmra.mxu0 %v267_v61  ;;  %410 = vmatmul.mubr.f32.vlgmr.msra.gmra.mxu1 %v267_v61  ;;  %v3244_v61 = vld [vmem:[#allocation19_spill] sm:$0xff] }
 0x11c   :  { %452 = vmatpush1.msra.mxu0 %v1818_v1  ;;  %523 = vmatpush1.msra.mxu1 %v1872_v11 }
 0x11d   :  { %453 = vmatprep.subr.mxu0 %v1823_v2  ;;  %524 = vmatprep.subr.mxu1 %v1884_v13 }
 0x11e   :  { %454 = vmatpush1.msra.mxu0 %v1831_v4  ;;  %525 = vmatpush1.msra.mxu1 %v1889_v14 }
 0x11f   :  { %455 = vmatprep.subr.mxu0 %v1837_v5  ;;  %526 = vmatprep.subr.mxu1 %v1901_v16 }
 0x120   :  { %456 = vmatpush1.msra.mxu0 %v1843_v6  ;;  %527 = vmatpush1.msra.mxu1 %v1913_v18 }
 0x121   :  { %457 = vmatprep.subr.mxu0 %v1849_v7  ;;  %528 = vmatprep.subr.mxu1 %v1918_v19 }
 0x122   :  { %458 = vmatpush1.msra.mxu0 %v1855_v8  ;;  %529 = vmatpush1.msra.mxu1 %v1930_v21 }
 0x123   :  { %459 = vmatprep.subr.mxu0 %v1866_v10  ;;  %530 = vmatprep.subr.mxu1 %v1942_v23 }
 0x124   :  { %460 = vmatpush1.msra.mxu0 %v1878_v12  ;;  %531 = vmatpush1.msra.mxu1 %v1954_v25 }
 0x125   :  { %461 = vmatprep.subr.mxu0 %v1895_v15  ;;  %532 = vmatprep.subr.mxu1 %v1966_v27 }
 0x126   :  { %462 = vmatpush1.msra.mxu0 %v1907_v17  ;;  %533 = vmatpush1.msra.mxu1 %v1978_v29 }
 0x127   :  { %463 = vmatprep.subr.mxu0 %v1924_v20  ;;  %534 = vmatprep.subr.mxu1 %v1990_v31 }
 0x128   :  { %464 = vmatpush1.msra.mxu0 %v1936_v22  ;;  %535 = vmatpush1.msra.mxu1 %v2002_v33 }
 0x129   :  { %465 = vmatprep.subr.mxu0 %v1948_v24  ;;  %536 = vmatprep.subr.mxu1 %v2014_v35 }
 0x12a   :  { %466 = vmatpush1.msra.mxu0 %v1960_v26  ;;  %537 = vmatpush1.msra.mxu1 %v2026_v37 }
 0x12b   :  { %467 = vmatprep.subr.mxu0 %v1972_v28  ;;  %538 = vmatprep.subr.mxu1 %v2038_v39 }
 0x12c   :  { %468 = vmatpush1.msra.mxu0 %v1984_v30  ;;  %539 = vmatpush1.msra.mxu1 %v2050_v41 }
 0x12d   :  { %469 = vmatprep.subr.mxu0 %v1996_v32  ;;  %540 = vmatprep.subr.mxu1 %v2062_v43 }
 0x12e   :  { %470 = vmatpush1.msra.mxu0 %v2008_v34  ;;  %541 = vmatpush1.msra.mxu1 %v2074_v45 }
 0x12f   :  { %471 = vmatprep.subr.mxu0 %v2020_v36  ;;  %542 = vmatprep.subr.mxu1 %v2086_v47 }
 0x130   :  { %472 = vmatpush1.msra.mxu0 %v2032_v38  ;;  %543 = vmatpush1.msra.mxu1 %v2098_v49 }
 0x131   :  { %473 = vmatprep.subr.mxu0 %v2044_v40  ;;  %544 = vmatprep.subr.mxu1 %v2110_v51 }
 0x132   :  { %474 = vmatpush1.msra.mxu0 %v2056_v42  ;;  %545 = vmatpush1.msra.mxu1 %v2122_v53 }
 0x133   :  { %475 = vmatprep.subr.mxu0 %v2068_v44  ;;  %546 = vmatprep.subr.mxu1 %v2134_v55 }
 0x134   :  { %476 = vmatpush1.msra.mxu0 %v3230_v46  ;;  %547 = vmatpush1.msra.mxu1 %v3231_v54 }
 0x135   :  { %477 = vmatprep.subr.mxu0 %v3232_v56  ;;  %548 = vmatprep.subr.mxu1 %v3233_v62  ;;  %v1528_v62 = vld [vmem:[%s3136_s0 + $0x38] sm:$0xff] }
 0x136   :  { %478 = vmatpush1.msra.mxu0 %v3234_v3  ;;  %549 = vmatpush1.msra.mxu1 %v3235_v48  ;;  %v3245_v48 = vld [vmem:[#allocation2_spill] sm:$0xff] }
 0x137   :  { %479 = vmatprep.subr.mxu0 %v3236_v52  ;;  %550 = vmatprep.subr.mxu1 %v3237_v63  ;;  %v3246_v52 = vld [vmem:[#allocation3_spill] sm:$0xff] }
 0x138   :  { %480 = vmatpush1.msra.mxu0 %v3238_v0  ;;  %551 = vmatpush1.msra.mxu1 %v3239_v9  ;;  %v1525_v9 = vld [vmem:[%s3136_s0 + $0x20] sm:$0xff] }
 0x139   :  { %481 = vmatprep.subr.mxu0 %v3240_v60  ;;  %552 = vmatprep.subr.mxu1 %v3241_v58  ;;  %v1526_v58 = vld [vmem:[%s3136_s0 + $0x28] sm:$0xff] }
 0x13a   :  { %482 = vmatpush1.msra.mxu0 %v3242_v57  ;;  %515 = vmatprep.mubr.f32.mxu0 %v3243_v59 }
 0x13b   :  { %553 = vmatpush1.msra.mxu1 %v3244_v61  ;;  %586 = vmatprep.mubr.f32.mxu1 %v3243_v59 }
 0x13c   :  { %628 = vmatprep.subr.mxu0 %v3245_v48  ;;  %699 = vmatprep.subr.mxu1 %v3246_v52  ;;  %v1527_v52 = vld [vmem:[%s3136_s0 + $0x30] sm:$0xff] }
 0x1db   :  { %v340_v0 = vpop.f32.mrf.mxu0  ;;  %v411_v48 = vpop.f32.mrf.mxu1 }
 0x1dc   :  { %v416_v57 = vadd.f32 %v1525_v9, %v340_v0  ;;  %v418_v59 = vadd.f32 %v1527_v52, %v411_v48 }
 0x1dd   :  { %v342_v60 = vpop.f32.mrf.mxu0  ;;  %v413_v56 = vpop.f32.mrf.mxu1 }
 0x1de   :  { %v1529_v63 = vmul.f32 -1.442695, %v416_v57  ;;  %v417_v3 = vadd.f32 %v1526_v58, %v342_v60  ;;  %v1531_v54 = vmul.f32 -1.442695, %v418_v59  ;;  %v419_v0 = vadd.f32 %v1528_v62, %v413_v56  ;;  %v3249_v62 = vld [vmem:[#allocation5_spill] sm:$0xff]  ;;  %v3250_v59 = vld [vmem:[#allocation12_spill] sm:$0xff] }
 0x1e0   :  { %1598 = vpow2.f32 %v1529_v63  ;;  %v1530_v61 = vmul.f32 -1.442695, %v417_v3 }
 0x1e2   :  { %1600 = vpow2.f32 %v1530_v61 }
 0x1e3   :  { %1602 = vpow2.f32 %v1531_v54 }
 0x1ed   :  { %v1599_v46 = vpop.eup %1598 }
 0x1ee   :  { %v429_v9 = vadd.f32 1.0, %v1599_v46 }
 0x1ef   :  { %v1601_v57 = vpop.eup %1600 }
 0x1f0   :  { %1604 = vrcp.f32 %v429_v9  ;;  %v430_v3 = vadd.f32 1.0, %v1601_v57  ;;  %v1603_v63 = vpop.eup %1602  ;;  %v3252_v9 = vld [vmem:[#allocation14_spill] sm:$0xff]  ;;  %v3253_v57 = vld [vmem:[#allocation7_spill] sm:$0xff] }
 0x1f1   :  { %1606 = vtanh.f32 %v419_v0  ;;  %v431_v48 = vadd.f32 1.0, %v1603_v63  ;;  %v3251_v0 = vld [vmem:[#allocation6_spill] sm:$0xff]  ;;  %v3255_v63 = vld [vmem:[#allocation8_spill] sm:$0xff] }
 0x1f2   :  { %1608 = vrcp.f32 %v430_v3  ;;  %v3254_v3 = vld [vmem:[#allocation15_spill] sm:$0xff] }
 0x1f3   :  { %1610 = vrcp.f32 %v431_v48  ;;  %v3259_v48 = vld [vmem:[#allocation11_spill] sm:$0xff] }
 0x1fd   :  { %v1605_v60 = vpop.eup %1604 }
 0x1fe   :  { %v1607_v58 = vpop.eup %1606 }
 0x1ff   :  { %v1609_v61 = vpop.eup %1608  ;;  %v440_v55 = vmul.f32 %v1607_v58, %v1605_v60  ;;  %v3256_v60 = vld [vmem:[#allocation16_spill] sm:$0xff]  ;;  %v3257_v58 = vld [vmem:[#allocation9_spill] sm:$0xff] }
 0x200   :  { %v439_v52 = vmul.f32 %v1609_v61, %v2282_v50  ;;  %v1611_v46 = vpop.eup %1610  ;;  %v3248_v50 = vld [vmem:[#allocation10_spill] sm:$0xff]  ;;  %v3258_v61 = vld [vmem:[#allocation17_spill] sm:$0xff] }
 0x202   :  { %v2367_v44 = vadd.f32 %v440_v55, %v439_v52  ;;  %v3247_v55 = vld [vmem:[#allocation4_spill] sm:$0xff]  ;;  %v3260_v52 = vld [vmem:[#allocation18_spill] sm:$0xff] }
 0x204   :  { %1612 = vtanh.f32 %v2367_v44 }
 0x211   :  { %v1613_v56 = vpop.eup %1612 }
 0x212   :  { %v443_v54 = vmul.f32 %v1613_v56, %v1611_v46  ;;  %v3261_v46 = vld [vmem:[#allocation13_spill] sm:$0xff]  ;;  %v3262_v56 = vmov 0.0  }
 0x214   :  { %1532 = vst [vmem:[%s3138_s4 + $0x8] sm:$0xff] %v443_v54  ;;  %516 = vmatmul.mubr.f32.vlgmr.msra.gmra.mxu0 %v443_v54  ;;  %587 = vmatmul.mubr.f32.vlgmr.msra.gmra.mxu1 %v443_v54  ;;  %v3263_v54 = vld [vmem:[#allocation19_spill] sm:$0xff] }
 0x215   :  { %629 = vmatpush1.msra.mxu0 %v1818_v1  ;;  %700 = vmatpush1.msra.mxu1 %v1872_v11 }
 0x216   :  { %630 = vmatprep.subr.mxu0 %v1823_v2  ;;  %701 = vmatprep.subr.mxu1 %v1884_v13 }
 0x217   :  { %631 = vmatpush1.msra.mxu0 %v1831_v4  ;;  %702 = vmatpush1.msra.mxu1 %v1889_v14 }
 0x218   :  { %632 = vmatprep.subr.mxu0 %v1837_v5  ;;  %703 = vmatprep.subr.mxu1 %v1901_v16 }
 0x219   :  { %633 = vmatpush1.msra.mxu0 %v1843_v6  ;;  %704 = vmatpush1.msra.mxu1 %v1913_v18 }
 0x21a   :  { %634 = vmatprep.subr.mxu0 %v1849_v7  ;;  %705 = vmatprep.subr.mxu1 %v1918_v19 }
 0x21b   :  { %635 = vmatpush1.msra.mxu0 %v1855_v8  ;;  %706 = vmatpush1.msra.mxu1 %v1930_v21 }
 0x21c   :  { %636 = vmatprep.subr.mxu0 %v1866_v10  ;;  %707 = vmatprep.subr.mxu1 %v1942_v23 }
 0x21d   :  { %637 = vmatpush1.msra.mxu0 %v1878_v12  ;;  %708 = vmatpush1.msra.mxu1 %v1954_v25 }
 0x21e   :  { %638 = vmatprep.subr.mxu0 %v1895_v15  ;;  %709 = vmatprep.subr.mxu1 %v1966_v27 }
 0x21f   :  { %639 = vmatpush1.msra.mxu0 %v1907_v17  ;;  %710 = vmatpush1.msra.mxu1 %v1978_v29 }
 0x220   :  { %640 = vmatprep.subr.mxu0 %v1924_v20  ;;  %711 = vmatprep.subr.mxu1 %v1990_v31 }
 0x221   :  { %641 = vmatpush1.msra.mxu0 %v1936_v22  ;;  %712 = vmatpush1.msra.mxu1 %v2002_v33 }
 0x222   :  { %642 = vmatprep.subr.mxu0 %v1948_v24  ;;  %713 = vmatprep.subr.mxu1 %v2014_v35 }
 0x223   :  { %643 = vmatpush1.msra.mxu0 %v1960_v26  ;;  %714 = vmatpush1.msra.mxu1 %v2026_v37 }
 0x224   :  { %644 = vmatprep.subr.mxu0 %v1972_v28  ;;  %715 = vmatprep.subr.mxu1 %v2038_v39 }
 0x225   :  { %645 = vmatpush1.msra.mxu0 %v1984_v30  ;;  %716 = vmatpush1.msra.mxu1 %v2050_v41 }
 0x226   :  { %646 = vmatprep.subr.mxu0 %v1996_v32  ;;  %717 = vmatprep.subr.mxu1 %v2062_v43 }
 0x227   :  { %647 = vmatpush1.msra.mxu0 %v2008_v34  ;;  %718 = vmatpush1.msra.mxu1 %v2074_v45 }
 0x228   :  { %648 = vmatprep.subr.mxu0 %v2020_v36  ;;  %719 = vmatprep.subr.mxu1 %v2086_v47 }
 0x229   :  { %649 = vmatpush1.msra.mxu0 %v2032_v38  ;;  %720 = vmatpush1.msra.mxu1 %v2098_v49 }
 0x22a   :  { %650 = vmatprep.subr.mxu0 %v2044_v40  ;;  %721 = vmatprep.subr.mxu1 %v2110_v51 }
 0x22b   :  { %651 = vmatpush1.msra.mxu0 %v2056_v42  ;;  %722 = vmatpush1.msra.mxu1 %v2122_v53 }
 0x22c   :  { %652 = vmatprep.subr.mxu0 %v3247_v55  ;;  %723 = vmatprep.subr.mxu1 %v3248_v50 }
 0x22d   :  { %653 = vmatpush1.msra.mxu0 %v3249_v62  ;;  %724 = vmatpush1.msra.mxu1 %v3250_v59 }
 0x22e   :  { %654 = vmatprep.subr.mxu0 %v3251_v0  ;;  %725 = vmatprep.subr.mxu1 %v3252_v9  ;;  %v1536_v9 = vld [vmem:[%s3136_s0 + $0x58] sm:$0xff] }
 0x22f   :  { %655 = vmatpush1.msra.mxu0 %v3253_v57  ;;  %726 = vmatpush1.msra.mxu1 %v3254_v3  ;;  %v3264_v3 = vld [vmem:[#allocation2_spill] sm:$0xff] }
 0x230   :  { %656 = vmatprep.subr.mxu0 %v3255_v63  ;;  %727 = vmatprep.subr.mxu1 %v3256_v60  ;;  %v3265_v63 = vld [vmem:[#allocation3_spill] sm:$0xff] }
 0x231   :  { %657 = vmatpush1.msra.mxu0 %v3257_v58  ;;  %728 = vmatpush1.msra.mxu1 %v3258_v61  ;;  %v1533_v61 = vld [vmem:[%s3136_s0 + $0x40] sm:$0xff] }
 0x232   :  { %658 = vmatprep.subr.mxu0 %v3259_v48  ;;  %729 = vmatprep.subr.mxu1 %v3260_v52  ;;  %v1534_v52 = vld [vmem:[%s3136_s0 + $0x48] sm:$0xff] }
 0x233   :  { %659 = vmatpush1.msra.mxu0 %v3261_v46  ;;  %692 = vmatprep.mubr.f32.mxu0 %v3262_v56 }
 0x234   :  { %730 = vmatpush1.msra.mxu1 %v3263_v54  ;;  %763 = vmatprep.mubr.f32.mxu1 %v3262_v56 }
 0x235   :  { %805 = vmatprep.subr.mxu0 %v3264_v3  ;;  %876 = vmatprep.subr.mxu1 %v3265_v63  ;;  %v1535_v3 = vld [vmem:[%s3136_s0 + $0x50] sm:$0xff] }
 0x2d4   :  { %v517_v58 = vpop.f32.mrf.mxu0  ;;  %v588_v63 = vpop.f32.mrf.mxu1 }
 0x2d5   :  { %v593_v46 = vadd.f32 %v1533_v61, %v517_v58  ;;  %v595_v56 = vadd.f32 %v1535_v3, %v588_v63 }
 0x2d6   :  { %v519_v48 = vpop.f32.mrf.mxu0  ;;  %v590_v0 = vpop.f32.mrf.mxu1 }
 0x2d7   :  { %v1537_v60 = vmul.f32 -1.442695, %v593_v46  ;;  %v594_v57 = vadd.f32 %v1534_v52, %v519_v48  ;;  %v1539_v59 = vmul.f32 -1.442695, %v595_v56  ;;  %v596_v58 = vadd.f32 %v1536_v9, %v590_v0  ;;  %v2551_v56 = vld [vmem:[%s3134_s3 + $0x1e0] sm:$0xff] }
 0x2d9   :  { %1614 = vpow2.f32 %v1537_v60  ;;  %v1538_v54 = vmul.f32 -1.442695, %v594_v57 }
 0x2db   :  { %1616 = vpow2.f32 %v1538_v54 }
 0x2dc   :  { %1618 = vpow2.f32 %v1539_v59 }
 0x2e6   :  { %v1615_v62 = vpop.eup %1614 }
 0x2e7   :  { %v606_v61 = vadd.f32 1.0, %v1615_v62 }
 0x2e8   :  { %v1617_v46 = vpop.eup %1616 }
 0x2e9   :  { %1620 = vrcp.f32 %v606_v61  ;;  %v607_v57 = vadd.f32 1.0, %v1617_v46  ;;  %v1619_v60 = vpop.eup %1618  ;;  %v2569_v61 = vld [vmem:[%s3134_s3 + $0x1d8] sm:$0xff]  ;;  %v2575_v46 = vld [vmem:[%s3134_s3 + $0x1c0] sm:$0xff] }
 0x2ea   :  { %1622 = vtanh.f32 %v596_v58  ;;  %v608_v63 = vadd.f32 1.0, %v1619_v60  ;;  %v2563_v58 = vld [vmem:[%s3134_s3 + $0x1c8] sm:$0xff] }
 0x2eb   :  { %1624 = vrcp.f32 %v607_v57  ;;  %v2581_v57 = vld [vmem:[%s3134_s3 + $0x1d0] sm:$0xff]  ;;  %v2587_v60 = vld [vmem:[%s3134_s3 + $0x1a8] sm:$0xff] }
 0x2ec   :  { %1626 = vrcp.f32 %v608_v63  ;;  %v2611_v63 = vld [vmem:[%s3134_s3 + $0x188] sm:$0xff] }
 0x2f6   :  { %v1621_v48 = vpop.eup %1620 }
 0x2f7   :  { %v1623_v52 = vpop.eup %1622 }
 0x2f8   :  { %v1625_v54 = vpop.eup %1624  ;;  %v617_v50 = vmul.f32 %v1623_v52, %v1621_v48  ;;  %v2593_v48 = vld [vmem:[%s3134_s3 + $0x1b8] sm:$0xff]  ;;  %v2599_v52 = vld [vmem:[%s3134_s3 + $0x1a0] sm:$0xff] }
 0x2f9   :  { %v616_v3 = vmul.f32 %v1625_v54, %v2367_v44  ;;  %v1627_v62 = vpop.eup %1626  ;;  %v2605_v54 = vld [vmem:[%s3134_s3 + $0x1b0] sm:$0xff] }
 0x2fb   :  { %v2452_v55 = vadd.f32 %v617_v50, %v616_v3  ;;  %v2617_v3 = vld [vmem:[%s3134_s3 + $0x198] sm:$0xff] }
 0x2fd   :  { %1628 = vtanh.f32 %v2452_v55 }
 0x30a   :  { %v1629_v0 = vpop.eup %1628 }
 0x30b   :  { %v620_v59 = vmul.f32 %v1629_v0, %v1627_v62  ;;  %v2623_v62 = vld [vmem:[%s3134_s3 + $0x180] sm:$0xff]  ;;  %v2629_v0 = vld [vmem:[%s3134_s3 + $0x190] sm:$0xff] }
 0x30d   :  { %1540 = vst [vmem:[%s3138_s4 + $0x10] sm:$0xff] %v620_v59  ;;  %693 = vmatmul.mubr.f32.vlgmr.msra.gmra.mxu0 %v620_v59  ;;  %764 = vmatmul.mubr.f32.vlgmr.msra.gmra.mxu1 %v620_v59  ;;  %v2635_v59 = vld [vmem:[%s3134_s3 + $0x168] sm:$0xff] }
 0x30e   :  { %806 = vmatpush1.msra.mxu0 %v1818_v1  ;;  %877 = vmatpush1.msra.mxu1 %v1872_v11  ;;  %v3266_v1 = vld [vmem:[#allocation4_spill] sm:$0xff] }
 0x30f   :  { %807 = vmatprep.subr.mxu0 %v1823_v2  ;;  %878 = vmatprep.subr.mxu1 %v1884_v13  ;;  %v3267_v2 = vld [vmem:[#allocation10_spill] sm:$0xff]  ;;  %v3274_v11 = vld [vmem:[#allocation8_spill] sm:$0xff]  ;;  %v3276_v13 = vld [vmem:[#allocation9_spill] sm:$0xff] }
 0x310   :  { %808 = vmatpush1.msra.mxu0 %v1831_v4  ;;  %879 = vmatpush1.msra.mxu1 %v1889_v14  ;;  %v3268_v4 = vld [vmem:[#allocation5_spill] sm:$0xff] }
 0x311   :  { %809 = vmatprep.subr.mxu0 %v1837_v5  ;;  %880 = vmatprep.subr.mxu1 %v1901_v16  ;;  %v3269_v5 = vld [vmem:[#allocation12_spill] sm:$0xff]  ;;  %v3277_v14 = vld [vmem:[#allocation17_spill] sm:$0xff]  ;;  %v3279_v16 = vld [vmem:[#allocation18_spill] sm:$0xff] }
 0x312   :  { %810 = vmatpush1.msra.mxu0 %v1843_v6  ;;  %881 = vmatpush1.msra.mxu1 %v1913_v18  ;;  %v3270_v6 = vld [vmem:[#allocation6_spill] sm:$0xff]  ;;  %v3281_v18 = vmov 0.0  }
 0x313   :  { %811 = vmatprep.subr.mxu0 %v1849_v7  ;;  %882 = vmatprep.subr.mxu1 %v1918_v19  ;;  %v3271_v7 = vld [vmem:[#allocation14_spill] sm:$0xff]  ;;  %v3282_v19 = vld [vmem:[#allocation19_spill] sm:$0xff] }
 0x314   :  { %812 = vmatpush1.msra.mxu0 %v1855_v8  ;;  %883 = vmatpush1.msra.mxu1 %v1930_v21  ;;  %v3272_v8 = vld [vmem:[#allocation7_spill] sm:$0xff] }
 0x315   :  { %813 = vmatprep.subr.mxu0 %v1866_v10  ;;  %884 = vmatprep.subr.mxu1 %v1942_v23  ;;  %v3273_v10 = vld [vmem:[#allocation15_spill] sm:$0xff] }
 0x316   :  { %814 = vmatpush1.msra.mxu0 %v1878_v12  ;;  %885 = vmatpush1.msra.mxu1 %v1954_v25  ;;  %v3275_v12 = vld [vmem:[#allocation16_spill] sm:$0xff]  ;;  %v3284_v21 = vld [vmem:[#allocation3_spill] sm:$0xff] }
 0x317   :  { %815 = vmatprep.subr.mxu0 %v1895_v15  ;;  %886 = vmatprep.subr.mxu1 %v1966_v27  ;;  %v3278_v15 = vld [vmem:[#allocation11_spill] sm:$0xff] }
 0x318   :  { %816 = vmatpush1.msra.mxu0 %v1907_v17  ;;  %887 = vmatpush1.msra.mxu1 %v1978_v29  ;;  %v3280_v17 = vld [vmem:[#allocation13_spill] sm:$0xff] }
 0x319   :  { %817 = vmatprep.subr.mxu0 %v1924_v20  ;;  %888 = vmatprep.subr.mxu1 %v1990_v31  ;;  %v2525_v20 = vld [vmem:[%s3134_s3 + $0x1e8] sm:$0xff] }
 0x31a   :  { %818 = vmatpush1.msra.mxu0 %v1936_v22  ;;  %889 = vmatpush1.msra.mxu1 %v2002_v33  ;;  %3283 = vst [vmem:[#allocation2_spill] sm:$0xff] %v2525_v20  ;;  %v1541_v22 = vld [vmem:[%s3136_s0 + $0x60] sm:$0xff]  ;;  %v1544_v33 = vld [vmem:[%s3136_s0 + $0x78] sm:$0xff] }
 0x31b   :  { %819 = vmatprep.subr.mxu0 %v1948_v24  ;;  %890 = vmatprep.subr.mxu1 %v2014_v35  ;;  %v1542_v24 = vld [vmem:[%s3136_s0 + $0x68] sm:$0xff] }
 0x31c   :  { %820 = vmatpush1.msra.mxu0 %v1960_v26  ;;  %891 = vmatpush1.msra.mxu1 %v2026_v37 }
 0x31d   :  { %821 = vmatprep.subr.mxu0 %v1972_v28  ;;  %892 = vmatprep.subr.mxu1 %v2038_v39 }
 0x31e   :  { %822 = vmatpush1.msra.mxu0 %v1984_v30  ;;  %893 = vmatpush1.msra.mxu1 %v2050_v41  ;;  %v1543_v30 = vld [vmem:[%s3136_s0 + $0x70] sm:$0xff] }
 0x31f   :  { %823 = vmatprep.subr.mxu0 %v1996_v32  ;;  %894 = vmatprep.subr.mxu1 %v2062_v43 }
 0x320   :  { %824 = vmatpush1.msra.mxu0 %v2008_v34  ;;  %895 = vmatpush1.msra.mxu1 %v2074_v45 }
 0x321   :  { %825 = vmatprep.subr.mxu0 %v2020_v36  ;;  %896 = vmatprep.subr.mxu1 %v2086_v47 }
 0x322   :  { %826 = vmatpush1.msra.mxu0 %v2032_v38  ;;  %897 = vmatpush1.msra.mxu1 %v2098_v49 }
 0x323   :  { %827 = vmatprep.subr.mxu0 %v2044_v40  ;;  %898 = vmatprep.subr.mxu1 %v2110_v51 }
 0x324   :  { %828 = vmatpush1.msra.mxu0 %v2056_v42  ;;  %899 = vmatpush1.msra.mxu1 %v2122_v53 }
 0x325   :  { %829 = vmatprep.subr.mxu0 %v3266_v1  ;;  %900 = vmatprep.subr.mxu1 %v3267_v2  ;;  %v2641_v1 = vld [vmem:[%s3134_s3 + $0x178] sm:$0xff] }
 0x326   :  { %830 = vmatpush1.msra.mxu0 %v3268_v4  ;;  %901 = vmatpush1.msra.mxu1 %v3269_v5  ;;  %v2647_v4 = vld [vmem:[%s3134_s3 + $0x160] sm:$0xff] }
 0x327   :  { %831 = vmatprep.subr.mxu0 %v3270_v6  ;;  %902 = vmatprep.subr.mxu1 %v3271_v7  ;;  %v2653_v6 = vld [vmem:[%s3134_s3 + $0x170] sm:$0xff] }
 0x328   :  { %832 = vmatpush1.msra.mxu0 %v3272_v8  ;;  %903 = vmatpush1.msra.mxu1 %v3273_v10  ;;  %v2659_v8 = vld [vmem:[%s3134_s3 + $0x148] sm:$0xff] }
 0x329   :  { %833 = vmatprep.subr.mxu0 %v3274_v11  ;;  %904 = vmatprep.subr.mxu1 %v3275_v12  ;;  %v2665_v11 = vld [vmem:[%s3134_s3 + $0x158] sm:$0xff] }
 0x32a   :  { %834 = vmatpush1.msra.mxu0 %v3276_v13  ;;  %905 = vmatpush1.msra.mxu1 %v3277_v14  ;;  %v2671_v13 = vld [vmem:[%s3134_s3 + $0x140] sm:$0xff] }
 0x32b   :  { %835 = vmatprep.subr.mxu0 %v3278_v15  ;;  %906 = vmatprep.subr.mxu1 %v3279_v16  ;;  %v2677_v15 = vld [vmem:[%s3134_s3 + $0x150] sm:$0xff] }
 0x32c   :  { %836 = vmatpush1.msra.mxu0 %v3280_v17  ;;  %869 = vmatprep.mubr.f32.mxu0 %v3281_v18  ;;  %v2683_v17 = vld [vmem:[%s3134_s3 + $0x128] sm:$0xff] }
 0x32d   :  { %907 = vmatpush1.msra.mxu1 %v3282_v19  ;;  %940 = vmatprep.mubr.f32.mxu1 %v3281_v18 }
 0x32e   :  { %982 = vmatprep.subr.mxu0 %v2525_v20  ;;  %1053 = vmatprep.subr.mxu1 %v3284_v21  ;;  %v2689_v21 = vld [vmem:[%s3134_s3 + $0x138] sm:$0xff] }
 0x3cd   :  { %v694_v23 = vpop.f32.mrf.mxu0  ;;  %v765_v31 = vpop.f32.mrf.mxu1 }
 0x3ce   :  { %v770_v25 = vadd.f32 %v1541_v22, %v694_v23  ;;  %v772_v32 = vadd.f32 %v1543_v30, %v765_v31  ;;  %v2695_v22 = vld [vmem:[%s3134_s3 + $0x120] sm:$0xff]  ;;  %v2701_v23 = vld [vmem:[%s3134_s3 + $0x130] sm:$0xff] }
 0x3cf   :  { %v696_v26 = vpop.f32.mrf.mxu0  ;;  %v767_v34 = vpop.f32.mrf.mxu1  ;;  %v2743_v30 = vld [vmem:[%s3134_s3 + $0xe0] sm:$0xff]  ;;  %v2749_v31 = vld [vmem:[%s3134_s3 + $0xf0] sm:$0xff] }
 0x3d0   :  { %v1545_v27 = vmul.f32 -1.442695, %v770_v25  ;;  %v771_v28 = vadd.f32 %v1542_v24, %v696_v26  ;;  %v1547_v35 = vmul.f32 -1.442695, %v772_v32  ;;  %v773_v37 = vadd.f32 %v1544_v33, %v767_v34  ;;  %v2707_v24 = vld [vmem:[%s3134_s3 + $0x108] sm:$0xff]  ;;  %v2713_v25 = vld [vmem:[%s3134_s3 + $0x118] sm:$0xff] }
 0x3d1   :  { %v2719_v26 = vld [vmem:[%s3134_s3 + $0x100] sm:$0xff]  ;;  %v2755_v32 = vld [vmem:[%s3134_s3 + $0xc8] sm:$0xff]  ;;  %v2761_v33 = vld [vmem:[%s3134_s3 + $0xd8] sm:$0xff] }
 0x3d2   :  { %1630 = vpow2.f32 %v1545_v27  ;;  %v1546_v29 = vmul.f32 -1.442695, %v771_v28  ;;  %v2725_v27 = vld [vmem:[%s3134_s3 + $0x110] sm:$0xff]  ;;  %v2731_v28 = vld [vmem:[%s3134_s3 + $0xe8] sm:$0xff]  ;;  %v2767_v34 = vld [vmem:[%s3134_s3 + $0xc0] sm:$0xff] }
 0x3d4   :  { %1632 = vpow2.f32 %v1546_v29  ;;  %v2737_v29 = vld [vmem:[%s3134_s3 + $0xf8] sm:$0xff] }
 0x3d5   :  { %1634 = vpow2.f32 %v1547_v35  ;;  %v2773_v35 = vld [vmem:[%s3134_s3 + $0xd0] sm:$0xff] }
 0x3df   :  { %v1631_v36 = vpop.eup %1630 }
 0x3e0   :  { %v783_v38 = vadd.f32 1.0, %v1631_v36  ;;  %v2779_v36 = vld [vmem:[%s3134_s3 + $0xa8] sm:$0xff] }
 0x3e1   :  { %v1633_v39 = vpop.eup %1632 }
 0x3e2   :  { %1636 = vrcp.f32 %v783_v38  ;;  %v784_v40 = vadd.f32 1.0, %v1633_v39  ;;  %v1635_v41 = vpop.eup %1634  ;;  %v2791_v38 = vld [vmem:[%s3134_s3 + $0xa0] sm:$0xff]  ;;  %v2797_v39 = vld [vmem:[%s3134_s3 + $0xb0] sm:$0xff] }
 0x3e3   :  { %1638 = vtanh.f32 %v773_v37  ;;  %v785_v45 = vadd.f32 1.0, %v1635_v41  ;;  %v2785_v37 = vld [vmem:[%s3134_s3 + $0xb8] sm:$0xff] }
 0x3e4   :  { %1640 = vrcp.f32 %v784_v40  ;;  %v2803_v40 = vld [vmem:[%s3134_s3 + $0x88] sm:$0xff]  ;;  %v2809_v41 = vld [vmem:[%s3134_s3 + $0x98] sm:$0xff] }
 0x3e5   :  { %1642 = vrcp.f32 %v785_v45  ;;  %v2834_v45 = vld [vmem:[%s3134_s3 + $0x60] sm:$0xff] }
 0x3e6   :  { %3286 = vst [vmem:[#allocation10_spill] sm:$0xff] %v2834_v45 }
 0x3ef   :  { %v1637_v42 = vpop.eup %1636 }
 0x3f0   :  { %v1639_v43 = vpop.eup %1638 }
 0x3f1   :  { %v1641_v44 = vpop.eup %1640  ;;  %v794_v49 = vmul.f32 %v1639_v43, %v1637_v42  ;;  %v2815_v42 = vld [vmem:[%s3134_s3 + $0x80] sm:$0xff]  ;;  %v2821_v43 = vld [vmem:[%s3134_s3 + $0x90] sm:$0xff] }
 0x3f2   :  { %v793_v47 = vmul.f32 %v1641_v44, %v2452_v55  ;;  %v1643_v53 = vpop.eup %1642  ;;  %v2557_v55 = vld [vmem:[%s3134_s3 + $0x1f0] sm:$0xff]  ;;  %v2827_v44 = vld [vmem:[%s3134_s3 + $0x68] sm:$0xff] }
 0x3f3   :  { %3285 = vst [vmem:[#allocation4_spill] sm:$0xff] %v2827_v44 }
 0x3f4   :  { %v2542_v51 = vadd.f32 %v794_v49, %v793_v47  ;;  %v2841_v47 = vld [vmem:[%s3134_s3 + $0x48] sm:$0xff] }
 0x3f5   :  { %3287 = vst [vmem:[#allocation5_spill] sm:$0xff] %v2841_v47 }
 0x3f6   :  { %1644 = vtanh.f32 %v2542_v51 }
 0x403   :  { %v1645_v50 = vpop.eup %1644 }
 0x404   :  { %v797_v9 = vmul.f32 %v1645_v50, %v1643_v53 }
 0x406   :  { %1548 = vst [vmem:[%s3138_s4 + $0x18] sm:$0xff] %v797_v9  ;;  %870 = vmatmul.mubr.f32.vlgmr.msra.gmra.mxu0 %v797_v9  ;;  %941 = vmatmul.mubr.f32.vlgmr.msra.gmra.mxu1 %v797_v9 }
 0x407   :  { %983 = vmatpush1.msra.mxu0 %v2551_v56  ;;  %1054 = vmatpush1.msra.mxu1 %v2557_v55 }
 0x408   :  { %984 = vmatprep.subr.mxu0 %v2563_v58  ;;  %1055 = vmatprep.subr.mxu1 %v2569_v61 }
 0x409   :  { %985 = vmatpush1.msra.mxu0 %v2575_v46  ;;  %1056 = vmatpush1.msra.mxu1 %v2581_v57 }
 0x40a   :  { %986 = vmatprep.subr.mxu0 %v2587_v60  ;;  %1057 = vmatprep.subr.mxu1 %v2593_v48 }
 0x40b   :  { %987 = vmatpush1.msra.mxu0 %v2599_v52  ;;  %1058 = vmatpush1.msra.mxu1 %v2605_v54 }
 0x40c   :  { %988 = vmatprep.subr.mxu0 %v2611_v63  ;;  %1059 = vmatprep.subr.mxu1 %v2617_v3 }
 0x40d   :  { %989 = vmatpush1.msra.mxu0 %v2623_v62  ;;  %1060 = vmatpush1.msra.mxu1 %v2629_v0 }
 0x40e   :  { %990 = vmatprep.subr.mxu0 %v2635_v59  ;;  %1061 = vmatprep.subr.mxu1 %v2641_v1 }
 0x40f   :  { %991 = vmatpush1.msra.mxu0 %v2647_v4  ;;  %1062 = vmatpush1.msra.mxu1 %v2653_v6 }
 0x410   :  { %992 = vmatprep.subr.mxu0 %v2659_v8  ;;  %1063 = vmatprep.subr.mxu1 %v2665_v11 }
 0x411   :  { %993 = vmatpush1.msra.mxu0 %v2671_v13  ;;  %1064 = vmatpush1.msra.mxu1 %v2677_v15 }
 0x412   :  { %994 = vmatprep.subr.mxu0 %v2683_v17  ;;  %1065 = vmatprep.subr.mxu1 %v2689_v21 }
 0x413   :  { %995 = vmatpush1.msra.mxu0 %v2695_v22  ;;  %1066 = vmatpush1.msra.mxu1 %v2701_v23 }
 0x414   :  { %996 = vmatprep.subr.mxu0 %v2707_v24  ;;  %1067 = vmatprep.subr.mxu1 %v2713_v25 }
 0x415   :  { %997 = vmatpush1.msra.mxu0 %v2719_v26  ;;  %1068 = vmatpush1.msra.mxu1 %v2725_v27 }
 0x416   :  { %998 = vmatprep.subr.mxu0 %v2731_v28  ;;  %1069 = vmatprep.subr.mxu1 %v2737_v29 }
 0x417   :  { %999 = vmatpush1.msra.mxu0 %v2743_v30  ;;  %1070 = vmatpush1.msra.mxu1 %v2749_v31 }
 0x418   :  { %1000 = vmatprep.subr.mxu0 %v2755_v32  ;;  %1071 = vmatprep.subr.mxu1 %v2761_v33 }
 0x419   :  { %1001 = vmatpush1.msra.mxu0 %v2767_v34  ;;  %1072 = vmatpush1.msra.mxu1 %v2773_v35 }
 0x41a   :  { %1002 = vmatprep.subr.mxu0 %v2779_v36  ;;  %1073 = vmatprep.subr.mxu1 %v2785_v37 }
 0x41b   :  { %1003 = vmatpush1.msra.mxu0 %v2791_v38  ;;  %1074 = vmatpush1.msra.mxu1 %v2797_v39 }
 0x41c   :  { %1004 = vmatprep.subr.mxu0 %v2803_v40  ;;  %1075 = vmatprep.subr.mxu1 %v2809_v41 }
 0x41d   :  { %1005 = vmatpush1.msra.mxu0 %v2815_v42  ;;  %1076 = vmatpush1.msra.mxu1 %v2821_v43 }
 0x41e   :  { %1006 = vmatprep.subr.mxu0 %v2827_v44  ;;  %1077 = vmatprep.subr.mxu1 %v3267_v2  ;;  %v2848_v2 = vld [vmem:[%s3134_s3 + $0x40] sm:$0xff] }
 0x41f   :  { %1007 = vmatpush1.msra.mxu0 %v2834_v45  ;;  %1078 = vmatpush1.msra.mxu1 %v3269_v5  ;;  %3288 = vst [vmem:[#allocation12_spill] sm:$0xff] %v2848_v2  ;;  %v2855_v5 = vld [vmem:[%s3134_s3 + $0x28] sm:$0xff] }
 0x420   :  { %1008 = vmatprep.subr.mxu0 %v2841_v47  ;;  %1079 = vmatprep.subr.mxu1 %v3271_v7  ;;  %3289 = vst [vmem:[#allocation6_spill] sm:$0xff] %v2855_v5  ;;  %v2862_v7 = vld [vmem:[%s3134_s3 + $0x20] sm:$0xff] }
 0x421   :  { %1009 = vmatpush1.msra.mxu0 %v2848_v2  ;;  %1080 = vmatpush1.msra.mxu1 %v3273_v10  ;;  %3290 = vst [vmem:[#allocation14_spill] sm:$0xff] %v2862_v7  ;;  %v2869_v10 = vld [vmem:[%s3134_s3 + $0x8] sm:$0xff] }
 0x422   :  { %1010 = vmatprep.subr.mxu0 %v2855_v5  ;;  %1081 = vmatprep.subr.mxu1 %v3275_v12  ;;  %3291 = vst [vmem:[#allocation7_spill] sm:$0xff] %v2869_v10  ;;  %v2876_v12 = vld [vmem:[%s3134_s3] sm:$0xff] }
 0x423   :  { %1011 = vmatpush1.msra.mxu0 %v2862_v7  ;;  %1082 = vmatpush1.msra.mxu1 %v3277_v14  ;;  %3292 = vst [vmem:[#allocation15_spill] sm:$0xff] %v2876_v12  ;;  %v2886_v14 = vld [vmem:[%s3134_s3 + $0x1f8] sm:$0xff] }
 0x424   :  { %1012 = vmatprep.subr.mxu0 %v2869_v10  ;;  %1083 = vmatprep.subr.mxu1 %v3279_v16  ;;  %3293 = vst [vmem:[#allocation8_spill] sm:$0xff] %v2886_v14  ;;  %v1549_v16 = vld [vmem:[%s3136_s0 + $0x80] sm:$0xff]  ;;  %v1552_v7 = vld [vmem:[%s3136_s0 + $0x98] sm:$0xff] }
 0x425   :  { %1013 = vmatpush1.msra.mxu0 %v2876_v12  ;;  %1046 = vmatprep.mubr.f32.mxu0 %v3281_v18 }
 0x426   :  { %1084 = vmatpush1.msra.mxu1 %v3282_v19  ;;  %1117 = vmatprep.mubr.f32.mxu1 %v3281_v18  ;;  %v1550_v19 = vld [vmem:[%s3136_s0 + $0x88] sm:$0xff] }
 0x427   :  { %1159 = vmatprep.subr.mxu0 %v2525_v20  ;;  %1230 = vmatprep.subr.mxu1 %v2886_v14  ;;  %v1551_v14 = vld [vmem:[%s3136_s0 + $0x90] sm:$0xff] }
 0x4c6   :  { %v871_v49 = vpop.f32.mrf.mxu0  ;;  %v942_v12 = vpop.f32.mrf.mxu1 }
 0x4c7   :  { %v947_v53 = vadd.f32 %v1549_v16, %v871_v49  ;;  %v949_v10 = vadd.f32 %v1551_v14, %v942_v12 }
 0x4c8   :  { %v873_v50 = vpop.f32.mrf.mxu0  ;;  %v944_v5 = vpop.f32.mrf.mxu1 }
 0x4c9   :  { %v1553_v9 = vmul.f32 -1.442695, %v947_v53  ;;  %v948_v20 = vadd.f32 %v1550_v19, %v873_v50  ;;  %v1555_v2 = vmul.f32 -1.442695, %v949_v10  ;;  %v950_v16 = vadd.f32 %v1552_v7, %v944_v5  ;;  %v3296_v7 = vld [vmem:[#allocation10_spill] sm:$0xff]  ;;  %v2965_v10 = vld [vmem:[%s3134_s3 + $0x70] sm:$0xff] }
 0x4ca   :  { %3297 = vst [vmem:[#allocation9_spill] sm:$0xff] %v2965_v10 }
 0x4cb   :  { %1646 = vpow2.f32 %v1553_v9  ;;  %v1554_v18 = vmul.f32 -1.442695, %v948_v20 }
 0x4cd   :  { %1648 = vpow2.f32 %v1554_v18 }
 0x4ce   :  { %1650 = vpow2.f32 %v1555_v2 }
 0x4d8   :  { %v1647_v47 = vpop.eup %1646 }
 0x4d9   :  { %v960_v49 = vadd.f32 1.0, %v1647_v47 }
 0x4da   :  { %v1649_v53 = vpop.eup %1648 }
 0x4db   :  { %1652 = vrcp.f32 %v960_v49  ;;  %v961_v20 = vadd.f32 1.0, %v1649_v53  ;;  %v1651_v18 = vpop.eup %1650  ;;  %v2972_v49 = vld [vmem:[%s3134_s3 + $0x58] sm:$0xff]  ;;  %v3300_v53 = vld [vmem:[#allocation12_spill] sm:$0xff] }
 0x4dc   :  { %1654 = vtanh.f32 %v950_v16  ;;  %v962_v12 = vadd.f32 1.0, %v1651_v18  ;;  %v3298_v16 = vld [vmem:[#allocation5_spill] sm:$0xff]  ;;  %3299 = vst [vmem:[#allocation17_spill] sm:$0xff] %v2972_v49  ;;  %v3302_v18 = vld [vmem:[#allocation6_spill] sm:$0xff] }
 0x4dd   :  { %1656 = vrcp.f32 %v961_v20  ;;  %v2979_v20 = vld [vmem:[%s3134_s3 + $0x50] sm:$0xff] }
 0x4de   :  { %1658 = vrcp.f32 %v962_v12  ;;  %3301 = vst [vmem:[#allocation11_spill] sm:$0xff] %v2979_v20  ;;  %v3306_v12 = vld [vmem:[#allocation7_spill] sm:$0xff] }
 0x4e8   :  { %v1653_v19 = vpop.eup %1652 }
 0x4e9   :  { %v1655_v50 = vpop.eup %1654 }
 0x4ea   :  { %v1657_v9 = vpop.eup %1656  ;;  %v971_v45 = vmul.f32 %v1655_v50, %v1653_v19  ;;  %v2986_v19 = vld [vmem:[%s3134_s3 + $0x38] sm:$0xff]  ;;  %v3304_v50 = vld [vmem:[#allocation14_spill] sm:$0xff] }
 0x4eb   :  { %v970_v14 = vmul.f32 %v1657_v9, %v2542_v51  ;;  %v1659_v47 = vpop.eup %1658  ;;  %v3294_v51 = vld [vmem:[#allocation4_spill] sm:$0xff]  ;;  %3303 = vst [vmem:[#allocation18_spill] sm:$0xff] %v2986_v19 }
 0x4ec   :  { %v2993_v9 = vld [vmem:[%s3134_s3 + $0x30] sm:$0xff] }
 0x4ed   :  { %v2902_v44 = vadd.f32 %v971_v45, %v970_v14  ;;  %v2958_v45 = vld [vmem:[%s3134_s3 + $0x78] sm:$0xff]  ;;  %3305 = vst [vmem:[#allocation13_spill] sm:$0xff] %v2993_v9 }
 0x4ee   :  { %3295 = vst [vmem:[#allocation16_spill] sm:$0xff] %v2958_v45  ;;  %v3000_v14 = vld [vmem:[%s3134_s3 + $0x18] sm:$0xff] }
 0x4ef   :  { %1660 = vtanh.f32 %v2902_v44  ;;  %3307 = vst [vmem:[#allocation19_spill] sm:$0xff] %v3000_v14 }
 0x4fc   :  { %v1661_v5 = vpop.eup %1660 }
 0x4fd   :  { %v974_v2 = vmul.f32 %v1661_v5, %v1659_v47  ;;  %v3308_v47 = vld [vmem:[#allocation15_spill] sm:$0xff]  ;;  %v3309_v5 = vmov 0.0  }
 0x4ff   :  { %1556 = vst [vmem:[%s3138_s4 + $0x20] sm:$0xff] %v974_v2  ;;  %1047 = vmatmul.mubr.f32.vlgmr.msra.gmra.mxu0 %v974_v2  ;;  %1118 = vmatmul.mubr.f32.vlgmr.msra.gmra.mxu1 %v974_v2  ;;  %v3008_v2 = vld [vmem:[%s3134_s3 + $0x10] sm:$0xff] }
 0x500   :  { %1160 = vmatpush1.msra.mxu0 %v2551_v56  ;;  %1231 = vmatpush1.msra.mxu1 %v2557_v55  ;;  %3310 = vst [vmem:[#allocation3_spill] sm:$0xff] %v3008_v2 }
 0x501   :  { %1161 = vmatprep.subr.mxu0 %v2563_v58  ;;  %1232 = vmatprep.subr.mxu1 %v2569_v61 }
 0x502   :  { %1162 = vmatpush1.msra.mxu0 %v2575_v46  ;;  %1233 = vmatpush1.msra.mxu1 %v2581_v57 }
 0x503   :  { %1163 = vmatprep.subr.mxu0 %v2587_v60  ;;  %1234 = vmatprep.subr.mxu1 %v2593_v48 }
 0x504   :  { %1164 = vmatpush1.msra.mxu0 %v2599_v52  ;;  %1235 = vmatpush1.msra.mxu1 %v2605_v54 }
 0x505   :  { %1165 = vmatprep.subr.mxu0 %v2611_v63  ;;  %1236 = vmatprep.subr.mxu1 %v2617_v3 }
 0x506   :  { %1166 = vmatpush1.msra.mxu0 %v2623_v62  ;;  %1237 = vmatpush1.msra.mxu1 %v2629_v0 }
 0x507   :  { %1167 = vmatprep.subr.mxu0 %v2635_v59  ;;  %1238 = vmatprep.subr.mxu1 %v2641_v1 }
 0x508   :  { %1168 = vmatpush1.msra.mxu0 %v2647_v4  ;;  %1239 = vmatpush1.msra.mxu1 %v2653_v6 }
 0x509   :  { %1169 = vmatprep.subr.mxu0 %v2659_v8  ;;  %1240 = vmatprep.subr.mxu1 %v2665_v11 }
 0x50a   :  { %1170 = vmatpush1.msra.mxu0 %v2671_v13  ;;  %1241 = vmatpush1.msra.mxu1 %v2677_v15 }
 0x50b   :  { %1171 = vmatprep.subr.mxu0 %v2683_v17  ;;  %1242 = vmatprep.subr.mxu1 %v2689_v21 }
 0x50c   :  { %1172 = vmatpush1.msra.mxu0 %v2695_v22  ;;  %1243 = vmatpush1.msra.mxu1 %v2701_v23 }
 0x50d   :  { %1173 = vmatprep.subr.mxu0 %v2707_v24  ;;  %1244 = vmatprep.subr.mxu1 %v2713_v25 }
 0x50e   :  { %1174 = vmatpush1.msra.mxu0 %v2719_v26  ;;  %1245 = vmatpush1.msra.mxu1 %v2725_v27 }
 0x50f   :  { %1175 = vmatprep.subr.mxu0 %v2731_v28  ;;  %1246 = vmatprep.subr.mxu1 %v2737_v29 }
 0x510   :  { %1176 = vmatpush1.msra.mxu0 %v2743_v30  ;;  %1247 = vmatpush1.msra.mxu1 %v2749_v31 }
 0x511   :  { %1177 = vmatprep.subr.mxu0 %v2755_v32  ;;  %1248 = vmatprep.subr.mxu1 %v2761_v33 }
 0x512   :  { %1178 = vmatpush1.msra.mxu0 %v2767_v34  ;;  %1249 = vmatpush1.msra.mxu1 %v2773_v35 }
 0x513   :  { %1179 = vmatprep.subr.mxu0 %v2779_v36  ;;  %1250 = vmatprep.subr.mxu1 %v2785_v37 }
 0x514   :  { %1180 = vmatpush1.msra.mxu0 %v2791_v38  ;;  %1251 = vmatpush1.msra.mxu1 %v2797_v39 }
 0x515   :  { %1181 = vmatprep.subr.mxu0 %v2803_v40  ;;  %1252 = vmatprep.subr.mxu1 %v2809_v41 }
 0x516   :  { %1182 = vmatpush1.msra.mxu0 %v2815_v42  ;;  %1253 = vmatpush1.msra.mxu1 %v2821_v43 }
 0x517   :  { %1183 = vmatprep.subr.mxu0 %v3294_v51  ;;  %1254 = vmatprep.subr.mxu1 %v2958_v45 }
 0x518   :  { %1184 = vmatpush1.msra.mxu0 %v3296_v7  ;;  %1255 = vmatpush1.msra.mxu1 %v2965_v10 }
 0x519   :  { %1185 = vmatprep.subr.mxu0 %v3298_v16  ;;  %1256 = vmatprep.subr.mxu1 %v2972_v49  ;;  %v1560_v49 = vld [vmem:[%s3136_s0 + $0xb8] sm:$0xff] }
 0x51a   :  { %1186 = vmatpush1.msra.mxu0 %v3300_v53  ;;  %1257 = vmatpush1.msra.mxu1 %v2979_v20 }
 0x51b   :  { %1187 = vmatprep.subr.mxu0 %v3302_v18  ;;  %1258 = vmatprep.subr.mxu1 %v2986_v19 }
 0x51c   :  { %1188 = vmatpush1.msra.mxu0 %v3304_v50  ;;  %1259 = vmatpush1.msra.mxu1 %v2993_v9  ;;  %v3312_v9 = vld [vmem:[#allocation8_spill] sm:$0xff]  ;;  %v1558_v50 = vld [vmem:[%s3136_s0 + $0xa8] sm:$0xff] }
 0x51d   :  { %1189 = vmatprep.subr.mxu0 %v3306_v12  ;;  %1260 = vmatprep.subr.mxu1 %v3000_v14  ;;  %v3311_v12 = vld [vmem:[#allocation2_spill] sm:$0xff] }
 0x51e   :  { %1190 = vmatpush1.msra.mxu0 %v3308_v47  ;;  %1223 = vmatprep.mubr.f32.mxu0 %v3309_v5  ;;  %v1557_v14 = vld [vmem:[%s3136_s0 + $0xa0] sm:$0xff] }
 0x51f   :  { %1261 = vmatpush1.msra.mxu1 %v3008_v2  ;;  %1294 = vmatprep.mubr.f32.mxu1 %v3309_v5 }
 0x520   :  { %1336 = vmatprep.subr.mxu0 %v3311_v12  ;;  %1407 = vmatprep.subr.mxu1 %v3312_v9  ;;  %v1559_v9 = vld [vmem:[%s3136_s0 + $0xb0] sm:$0xff] }
 0x5bf   :  { %v1048_v47 = vpop.f32.mrf.mxu0  ;;  %v1119_v12 = vpop.f32.mrf.mxu1 }
 0x5c0   :  { %v1124_v19 = vadd.f32 %v1557_v14, %v1048_v47  ;;  %v1126_v5 = vadd.f32 %v1559_v9, %v1119_v12 }
 0x5c1   :  { %v1050_v18 = vpop.f32.mrf.mxu0  ;;  %v1121_v16 = vpop.f32.mrf.mxu1 }
 0x5c2   :  { %v1561_v20 = vmul.f32 -1.442695, %v1124_v19  ;;  %v1125_v53 = vadd.f32 %v1558_v50, %v1050_v18  ;;  %v1563_v10 = vmul.f32 -1.442695, %v1126_v5  ;;  %v1127_v14 = vadd.f32 %v1560_v49, %v1121_v16 }
 0x5c4   :  { %1662 = vpow2.f32 %v1561_v20  ;;  %v1562_v2 = vmul.f32 -1.442695, %v1125_v53 }
 0x5c6   :  { %1664 = vpow2.f32 %v1562_v2 }
 0x5c7   :  { %1666 = vpow2.f32 %v1563_v10 }
 0x5d1   :  { %v1663_v7 = vpop.eup %1662 }
 0x5d2   :  { %v1137_v47 = vadd.f32 1.0, %v1663_v7 }
 0x5d3   :  { %v1665_v19 = vpop.eup %1664 }
 0x5d4   :  { %1668 = vrcp.f32 %v1137_v47  ;;  %v1138_v53 = vadd.f32 1.0, %v1665_v19  ;;  %v1667_v20 = vpop.eup %1666 }
 0x5d5   :  { %1670 = vtanh.f32 %v1127_v14  ;;  %v1139_v9 = vadd.f32 1.0, %v1667_v20  ;;  %v1575_v20 = vld [vmem:[%s3136_s0 + $0xf0] sm:$0xff] }
 0x5d6   :  { %1672 = vrcp.f32 %v1138_v53 }
 0x5d7   :  { %1674 = vrcp.f32 %v1139_v9 }
 0x5e1   :  { %v1669_v18 = vpop.eup %1668 }
 0x5e2   :  { %v1671_v50 = vpop.eup %1670 }
 0x5e3   :  { %v1673_v2 = vpop.eup %1672  ;;  %v1148_v45 = vmul.f32 %v1671_v50, %v1669_v18 }
 0x5e4   :  { %v1147_v12 = vmul.f32 %v1673_v2, %v2902_v44  ;;  %v1675_v7 = vpop.eup %1674  ;;  %v1576_v2 = vld [vmem:[%s3136_s0 + $0xf8] sm:$0xff] }
 0x5e6   :  { %v3027_v51 = vadd.f32 %v1148_v45, %v1147_v12  ;;  %v1573_v45 = vld [vmem:[%s3136_s0 + $0xe0] sm:$0xff] }
 0x5e8   :  { %1676 = vtanh.f32 %v3027_v51 }
 0x5f5   :  { %v1677_v16 = vpop.eup %1676 }
 0x5f6   :  { %v1151_v10 = vmul.f32 %v1677_v16, %v1675_v7 }
 0x5f8   :  { %1564 = vst [vmem:[%s3138_s4 + $0x28] sm:$0xff] %v1151_v10  ;;  %1224 = vmatmul.mubr.f32.vlgmr.msra.gmra.mxu0 %v1151_v10  ;;  %1295 = vmatmul.mubr.f32.vlgmr.msra.gmra.mxu1 %v1151_v10 }
 0x5f9   :  { %1337 = vmatpush1.msra.mxu0 %v2551_v56  ;;  %1408 = vmatpush1.msra.mxu1 %v2557_v55  ;;  %v3313_v56 = vld [vmem:[#allocation4_spill] sm:$0xff] }
 0x5fa   :  { %1338 = vmatprep.subr.mxu0 %v2563_v58  ;;  %1409 = vmatprep.subr.mxu1 %v2569_v61  ;;  %v3314_v55 = vld [vmem:[#allocation16_spill] sm:$0xff]  ;;  %v3315_v58 = vld [vmem:[#allocation10_spill] sm:$0xff]  ;;  %v3316_v61 = vld [vmem:[#allocation9_spill] sm:$0xff] }
 0x5fb   :  { %1339 = vmatpush1.msra.mxu0 %v2575_v46  ;;  %1410 = vmatpush1.msra.mxu1 %v2581_v57  ;;  %v3317_v46 = vld [vmem:[#allocation5_spill] sm:$0xff] }
 0x5fc   :  { %1340 = vmatprep.subr.mxu0 %v2587_v60  ;;  %1411 = vmatprep.subr.mxu1 %v2593_v48  ;;  %v3318_v57 = vld [vmem:[#allocation17_spill] sm:$0xff]  ;;  %v3319_v60 = vld [vmem:[#allocation12_spill] sm:$0xff]  ;;  %v3320_v48 = vld [vmem:[#allocation11_spill] sm:$0xff] }
 0x5fd   :  { %1341 = vmatpush1.msra.mxu0 %v2599_v52  ;;  %1412 = vmatpush1.msra.mxu1 %v2605_v54  ;;  %v3321_v52 = vld [vmem:[#allocation6_spill] sm:$0xff] }
 0x5fe   :  { %1342 = vmatprep.subr.mxu0 %v2611_v63  ;;  %1413 = vmatprep.subr.mxu1 %v2617_v3  ;;  %v3322_v54 = vld [vmem:[#allocation18_spill] sm:$0xff]  ;;  %v3324_v3 = vld [vmem:[#allocation13_spill] sm:$0xff] }
 0x5ff   :  { %1343 = vmatpush1.msra.mxu0 %v2623_v62  ;;  %1414 = vmatpush1.msra.mxu1 %v2629_v0  ;;  %v3323_v63 = vld [vmem:[#allocation14_spill] sm:$0xff]  ;;  %v3325_v62 = vld [vmem:[#allocation7_spill] sm:$0xff] }
 0x600   :  { %1344 = vmatprep.subr.mxu0 %v2635_v59  ;;  %1415 = vmatprep.subr.mxu1 %v2641_v1  ;;  %v3326_v0 = vld [vmem:[#allocation19_spill] sm:$0xff]  ;;  %v3328_v1 = vmov 0.0  }
 0x601   :  { %1345 = vmatpush1.msra.mxu0 %v2647_v4  ;;  %1416 = vmatpush1.msra.mxu1 %v2653_v6  ;;  %v3327_v59 = vld [vmem:[#allocation15_spill] sm:$0xff]  ;;  %v1565_v6 = vld [vmem:[%s3136_s0 + $0xc0] sm:$0xff] }
 0x602   :  { %1346 = vmatprep.subr.mxu0 %v2659_v8  ;;  %1417 = vmatprep.subr.mxu1 %v2665_v11  ;;  %v3329_v4 = vld [vmem:[#allocation3_spill] sm:$0xff] }
 0x603   :  { %1347 = vmatpush1.msra.mxu0 %v2671_v13  ;;  %1418 = vmatpush1.msra.mxu1 %v2677_v15  ;;  %v1566_v11 = vld [vmem:[%s3136_s0 + $0xc8] sm:$0xff] }
 0x604   :  { %1348 = vmatprep.subr.mxu0 %v2683_v17  ;;  %1419 = vmatprep.subr.mxu1 %v2689_v21 }
 0x605   :  { %1349 = vmatpush1.msra.mxu0 %v2695_v22  ;;  %1420 = vmatpush1.msra.mxu1 %v2701_v23  ;;  %v1567_v23 = vld [vmem:[%s3136_s0 + $0xd0] sm:$0xff] }
 0x606   :  { %1350 = vmatprep.subr.mxu0 %v2707_v24  ;;  %1421 = vmatprep.subr.mxu1 %v2713_v25 }
 0x607   :  { %1351 = vmatpush1.msra.mxu0 %v2719_v26  ;;  %1422 = vmatpush1.msra.mxu1 %v2725_v27  ;;  %v1568_v26 = vld [vmem:[%s3136_s0 + $0xd8] sm:$0xff] }
 0x608   :  { %1352 = vmatprep.subr.mxu0 %v2731_v28  ;;  %1423 = vmatprep.subr.mxu1 %v2737_v29 }
 0x609   :  { %1353 = vmatpush1.msra.mxu0 %v2743_v30  ;;  %1424 = vmatpush1.msra.mxu1 %v2749_v31 }
 0x60a   :  { %1354 = vmatprep.subr.mxu0 %v2755_v32  ;;  %1425 = vmatprep.subr.mxu1 %v2761_v33 }
 0x60b   :  { %1355 = vmatpush1.msra.mxu0 %v2767_v34  ;;  %1426 = vmatpush1.msra.mxu1 %v2773_v35 }
 0x60c   :  { %1356 = vmatprep.subr.mxu0 %v2779_v36  ;;  %1427 = vmatprep.subr.mxu1 %v2785_v37 }
 0x60d   :  { %1357 = vmatpush1.msra.mxu0 %v2791_v38  ;;  %1428 = vmatpush1.msra.mxu1 %v2797_v39 }
 0x60e   :  { %1358 = vmatprep.subr.mxu0 %v2803_v40  ;;  %1429 = vmatprep.subr.mxu1 %v2809_v41 }
 0x60f   :  { %1359 = vmatpush1.msra.mxu0 %v2815_v42  ;;  %1430 = vmatpush1.msra.mxu1 %v2821_v43 }
 0x610   :  { %1360 = vmatprep.subr.mxu0 %v3313_v56  ;;  %1431 = vmatprep.subr.mxu1 %v3314_v55 }
 0x611   :  { %1361 = vmatpush1.msra.mxu0 %v3315_v58  ;;  %1432 = vmatpush1.msra.mxu1 %v3316_v61 }
 0x612   :  { %1362 = vmatprep.subr.mxu0 %v3317_v46  ;;  %1433 = vmatprep.subr.mxu1 %v3318_v57 }
 0x613   :  { %1363 = vmatpush1.msra.mxu0 %v3319_v60  ;;  %1434 = vmatpush1.msra.mxu1 %v3320_v48 }
 0x614   :  { %1364 = vmatprep.subr.mxu0 %v3321_v52  ;;  %1435 = vmatprep.subr.mxu1 %v3322_v54 }
 0x615   :  { %1365 = vmatpush1.msra.mxu0 %v3323_v63  ;;  %1436 = vmatpush1.msra.mxu1 %v3324_v3 }
 0x616   :  { %1366 = vmatprep.subr.mxu0 %v3325_v62  ;;  %1437 = vmatprep.subr.mxu1 %v3326_v0 }
 0x617   :  { %1367 = vmatpush1.msra.mxu0 %v3327_v59  ;;  %1400 = vmatprep.mubr.f32.mxu0 %v3328_v1 }
 0x618   :  { %1438 = vmatpush1.msra.mxu1 %v3329_v4  ;;  %1471 = vmatprep.mubr.f32.mxu1 %v3328_v1 }
 0x6b8   :  { %v1225_v8 = vpop.f32.mrf.mxu0  ;;  %v1296_v24 = vpop.f32.mrf.mxu1 }
 0x6b9   :  { %v1301_v13 = vadd.f32 %v1565_v6, %v1225_v8  ;;  %v1303_v25 = vadd.f32 %v1567_v23, %v1296_v24 }
 0x6ba   :  { %v1227_v15 = vpop.f32.mrf.mxu0  ;;  %v1298_v27 = vpop.f32.mrf.mxu1 }
 0x6bb   :  { %v1569_v17 = vmul.f32 -1.442695, %v1301_v13  ;;  %v1302_v21 = vadd.f32 %v1566_v11, %v1227_v15  ;;  %v1571_v28 = vmul.f32 -1.442695, %v1303_v25  ;;  %v1304_v30 = vadd.f32 %v1568_v26, %v1298_v27 }
 0x6bd   :  { %1678 = vpow2.f32 %v1569_v17  ;;  %v1570_v22 = vmul.f32 -1.442695, %v1302_v21 }
 0x6bf   :  { %1680 = vpow2.f32 %v1570_v22 }
 0x6c0   :  { %1682 = vpow2.f32 %v1571_v28 }
 0x6ca   :  { %v1679_v29 = vpop.eup %1678 }
 0x6cb   :  { %v1314_v31 = vadd.f32 1.0, %v1679_v29 }
 0x6cc   :  { %v1681_v32 = vpop.eup %1680 }
 0x6cd   :  { %1684 = vrcp.f32 %v1314_v31  ;;  %v1315_v33 = vadd.f32 1.0, %v1681_v32  ;;  %v1683_v34 = vpop.eup %1682 }
 0x6ce   :  { %1686 = vtanh.f32 %v1304_v30  ;;  %v1316_v38 = vadd.f32 1.0, %v1683_v34 }
 0x6cf   :  { %1688 = vrcp.f32 %v1315_v33 }
 0x6d0   :  { %1690 = vrcp.f32 %v1316_v38 }
 0x6da   :  { %v1685_v35 = vpop.eup %1684 }
 0x6db   :  { %v1687_v36 = vpop.eup %1686 }
 0x6dc   :  { %v1689_v37 = vpop.eup %1688  ;;  %v1325_v40 = vmul.f32 %v1687_v36, %v1685_v35 }
 0x6dd   :  { %v1324_v39 = vmul.f32 %v1689_v37, %v3027_v51  ;;  %v1691_v42 = vpop.eup %1690  ;;  %v1574_v51 = vld [vmem:[%s3136_s0 + $0xe8] sm:$0xff] }
 0x6df   :  { %v1326_v41 = vadd.f32 %v1325_v40, %v1324_v39 }
 0x6e1   :  { %1692 = vtanh.f32 %v1326_v41 }
 0x6ee   :  { %v1693_v43 = vpop.eup %1692 }
 0x6ef   :  { %v1328_v44 = vmul.f32 %v1693_v43, %v1691_v42 }
 0x6f1   :  { %1572 = vst [vmem:[%s3138_s4 + $0x30] sm:$0xff] %v1328_v44  ;;  %1401 = vmatmul.mubr.f32.vlgmr.msra.gmra.mxu0 %v1328_v44  ;;  %1472 = vmatmul.mubr.f32.vlgmr.msra.gmra.mxu1 %v1328_v44 }
 0x7b1   :  { %v1402_v49 = vpop.f32.mrf.mxu0  ;;  %v1473_v18 = vpop.f32.mrf.mxu1 }
 0x7b2   :  { %v1478_v5 = vadd.f32 %v1573_v45, %v1402_v49  ;;  %v1480_v50 = vadd.f32 %v1575_v20, %v1473_v18 }
 0x7b3   :  { %v1404_v14 = vpop.f32.mrf.mxu0  ;;  %v1475_v9 = vpop.f32.mrf.mxu1 }
 0x7b4   :  { %v1577_v47 = vmul.f32 -1.442695, %v1478_v5  ;;  %v1479_v19 = vadd.f32 %v1574_v51, %v1404_v14  ;;  %v1579_v12 = vmul.f32 -1.442695, %v1480_v50  ;;  %v1481_v16 = vadd.f32 %v1576_v2, %v1475_v9 }
 0x7b6   :  { %1694 = vpow2.f32 %v1577_v47  ;;  %v1578_v53 = vmul.f32 -1.442695, %v1479_v19 }
 0x7b8   :  { %1696 = vpow2.f32 %v1578_v53 }
 0x7b9   :  { %1698 = vpow2.f32 %v1579_v12 }
 0x7c3   :  { %v1695_v7 = vpop.eup %1694 }
 0x7c4   :  { %v1491_v10 = vadd.f32 1.0, %v1695_v7 }
 0x7c5   :  { %v1697_v56 = vpop.eup %1696 }
 0x7c6   :  { %1700 = vrcp.f32 %v1491_v10  ;;  %v1492_v55 = vadd.f32 1.0, %v1697_v56  ;;  %v1699_v58 = vpop.eup %1698 }
 0x7c7   :  { %1702 = vtanh.f32 %v1481_v16  ;;  %v1493_v60 = vadd.f32 1.0, %v1699_v58 }
 0x7c8   :  { %1704 = vrcp.f32 %v1492_v55 }
 0x7c9   :  { %1706 = vrcp.f32 %v1493_v60 }
 0x7d3   :  { %v1701_v61 = vpop.eup %1700 }
 0x7d4   :  { %v1703_v46 = vpop.eup %1702 }
 0x7d5   :  { %v1705_v57 = vpop.eup %1704  ;;  %v1502_v52 = vmul.f32 %v1703_v46, %v1701_v61 }
 0x7d6   :  { %v1501_v48 = vmul.f32 %v1705_v57, %v1326_v41  ;;  %v1707_v63 = vpop.eup %1706 }
 0x7d8   :  { %v1503_v54 = vadd.f32 %v1502_v52, %v1501_v48 }
 0x7da   :  { %1708 = vtanh.f32 %v1503_v54  ;;  %1509 = vst [vmem:[%s3139_s6] sm:$0xff] %v1503_v54 }
 0x7e7   :  { %v1709_v3 = vpop.eup %1708 }
 0x7e8   :  { %v1505_v62 = vmul.f32 %v1709_v3, %v1707_v63 }
 0x7ea   :  { %1580 = vst [vmem:[%s3138_s4 + $0x38] sm:$0xff] %v1505_v62  ;;  %1508 = vst [vmem:[%s3140_s5] sm:$0xff] %v1505_v62 }

</bundles_post_ra>
